<compile_context>
chip_gen: v7x
topology: tpu7x:2x2x1
jax: 0.10.0
libtpu: 0.0.40
codegen_flags: <defaults>
</compile_context>

<pallas_src>
import functools

import jax
import jax.numpy as jnp
from jax import lax
from jax.experimental import pallas as pl
from jax.experimental.pallas import tpu as pltpu


def _round_up(n, m):
    return ((n + m - 1) // m) * m


# --------------------------------------------------------------------------- #
# Kernel
# --------------------------------------------------------------------------- #
def _feature_transformer_kernel(
    x_ref, wqkv_ref, bqkv_ref, wo_ref, vecs_ref, w1_ref, b1_ref, w2_ref,
    cw_ref, cb_ref, out_ref, y_ref, ff_ref, *, num_heads, true_c, hd_pad):
    f32, bf16 = jnp.float32, jnp.bfloat16
    k_step = pl.program_id(0)
    n_steps = pl.num_programs(0)

    S, c_pad = x_ref.shape
    H128 = num_heads * hd_pad

    # Feature-validity mask for LayerNorm statistics (padded lanes are zero by
    # construction; only the mean/var divisor needs the true C).
    col = lax.broadcasted_iota(jnp.int32, (1, c_pad), 1)
    feat_mask = (col < true_c).astype(f32)
    inv_c = 1.0 / true_c

    def layer_norm(v, w, b, eps=1e-5):
        mu = jnp.sum(v, axis=-1, keepdims=True) * inv_c
        cen = (v - mu) * feat_mask
        var = jnp.sum(cen * cen, axis=-1, keepdims=True) * inv_c
        return cen * lax.rsqrt(var + eps) * w + b

    # ---- Step 0: fused-QKV attention + residual + LN1 -> y_ref; zero ff acc ----
    @pl.when(k_step == 0)
    def _():
        x = x_ref[...]                               # (S, c_pad) f32
        xb = x.astype(bf16)
        vecs = vecs_ref[...]                         # (8, c_pad) f32
        bo, ln1w, ln1b = vecs[0:1, :], vecs[1:2, :], vecs[2:3, :]

        # One fused QKV matmul (scale already folded into the Q columns).
        qkv = jnp.dot(xb, wqkv_ref[...], preferred_element_type=f32) + bqkv_ref[...]
        q = qkv[:, 0:H128]                           # 128-lane-aligned slices
        kk = qkv[:, H128:2 * H128]
        v = qkv[:, 2 * H128:3 * H128]

        heads = []
        for h in range(num_heads):                   # unrolled, all slices aligned
            lo = h * hd_pad
            qh = q[:, lo:lo + hd_pad].astype(bf16)   # (S, hd_pad)
            kh = kk[:, lo:lo + hd_pad].astype(bf16)
            vh = v[:, lo:lo + hd_pad].astype(bf16)
            # Contract head_dim directly (trans-B dot_general; no kh.T relayout).
            s = lax.dot_general(qh, kh, (((1,), (1,)), ((), ())),
                                preferred_element_type=f32)        # (S, S)
            s = s - jnp.max(s, axis=-1, keepdims=True)
            p = jnp.exp(s)
            p = p * pl.reciprocal(jnp.sum(p, axis=-1, keepdims=True), approx=True)
            heads.append(jnp.dot(p.astype(bf16), vh, preferred_element_type=f32))
        # Lane-concat (128-aligned) then ONE full-K output projection.
        heads_cat = jnp.concatenate(heads, axis=-1).astype(bf16)   # (S, H128)
        attn = jnp.dot(heads_cat, wo_ref[...], preferred_element_type=f32) + bo

        y_ref[...] = layer_norm(x + attn, ln1w, ln1b)
        ff_ref[...] = jnp.zeros_like(ff_ref)

    # ---- Every step: one d_ff tile of the ReLU FFN, accumulated in VMEM ----
    yb = y_ref[...].astype(bf16)
    hmid = jnp.dot(yb, w1_ref[...], preferred_element_type=f32) + b1_ref[...]
    hb = jnp.maximum(hmid, 0.0).astype(bf16)         # cast immediately: small live set
    ff_ref[...] += jnp.dot(hb, w2_ref[...], preferred_element_type=f32)

    # ---- Last step: + b2, residual, LN2, Conv1d over tokens, lane-dense store ----
    @pl.when(k_step == n_steps - 1)
    def _():
        vecs = vecs_ref[...]
        ln2w, ln2b, b2 = vecs[3:4, :], vecs[4:5, :], vecs[5:6, :]
        y2 = layer_norm(y_ref[...] + ff_ref[...] + b2, ln2w, ln2b)
        out = (jnp.dot(cw_ref[...], y2.astype(bf16), preferred_element_type=f32)
               + cb_ref[...])
        out_ref[...] = out.astype(out_ref.dtype)     # (num_channels, c_pad)


# --------------------------------------------------------------------------- #
# Wrapper
# --------------------------------------------------------------------------- #
def feature_transformer_forward(x, params, *, num_channels, tokenH, tokenW,
                                num_heads=8, tile_ff=512):
    """x: (in_channels, H, W) float32.  Returns (1, num_channels, tokenH, tokenW)."""
    C, H, W = x.shape
    S = H * W
    # The original PyTorch forward only typechecks when these hold.
    assert S == C, "Conv1d channel axis must equal in_channels (H*W == in_channels)"
    assert C == tokenH * tokenW, "final view requires in_channels == tokenH*tokenW"
    assert C % num_heads == 0, "embed_dim must be divisible by num_heads"

    f32, bf16 = jnp.float32, jnp.bfloat16
    hd = C // num_heads
    hd_pad = _round_up(hd, 128)            # per-head 128-lane group (no relayouts)
    H128 = num_heads * hd_pad
    c_pad = _round_up(C, 128)              # lane-dense feature axis
    d_ff = params["w1"].shape[0]
    if d_ff % tile_ff != 0:
        tile_ff = d_ff                     # fallback: single FFN tile
    n_k = d_ff // tile_ff
    scale = 1.0 / (hd ** 0.5)

    # ---- Host-side prep (tiny arrays; XLA fuses/constant-folds) ----
    x_tokens = x.reshape(C, S).T.astype(f32)                     # (S, C)
    x_pad = jnp.pad(x_tokens, ((0, 0), (0, c_pad - C)))          # (S, c_pad)

    def head_pack_w(w, scl=1.0):
        # (C_out, C_in) PyTorch layout -> (c_pad, H128) in (in, out) order with
        # each head's output lanes padded to hd_pad.
        wt = (w.T * scl).reshape(C, num_heads, hd)
        wt = jnp.pad(wt, ((0, c_pad - C), (0, 0), (0, hd_pad - hd)))
        return wt.reshape(c_pad, H128).astype(bf16)

    def head_pack_b(b, scl=1.0):
        bt = (b.reshape(1, num_heads, hd) * scl)
        bt = jnp.pad(bt, ((0, 0), (0, 0), (0, hd_pad - hd)))
        return bt.reshape(1, H128).astype(f32)

    # Fused QKV with the 1/sqrt(head_dim) scale folded into the Q part.
    wqkv = jnp.concatenate([head_pack_w(params["wq"], scale),
                            head_pack_w(params["wk"]),
                            head_pack_w(params["wv"])], axis=1)   # (c_pad, 3*H128)
    bqkv = jnp.concatenate([head_pack_b(params["bq"], scale),
                            head_pack_b(params["bk"]),
                            head_pack_b(params["bv"])], axis=1)   # (1, 3*H128)

    # Output projection with rows grouped per padded head.
    wo_g = params["wo"].T.reshape(num_heads, hd, C)
    wo_g = jnp.pad(wo_g, ((0, 0), (0, hd_pad - hd), (0, c_pad - C)))
    wo_g = wo_g.reshape(H128, c_pad).astype(bf16)                 # (H128, c_pad)

    # Stack the six small per-feature vectors into ONE (8, c_pad) input.
    def pad_vec(v):
        return jnp.pad(v.reshape(-1), (0, c_pad - C)).astype(f32)
    vecs = jnp.stack([pad_vec(params["bo"]),
                      pad_vec(params["ln1_w"]), pad_vec(params["ln1_b"]),
                      pad_vec(params["ln2_w"]), pad_vec(params["ln2_b"]),
                      pad_vec(params["b2"])], axis=0)             # (6, c_pad)
    vecs = jnp.pad(vecs, ((0, 8 - vecs.shape[0]), (0, 0)))        # (8, c_pad)

    # FFN weights, pre-transposed to (in, out); streamed over the grid.
    w1_t = jnp.pad(params["w1"].T, ((0, c_pad - C), (0, 0))).astype(bf16)  # (c_pad, d_ff)
    b1_p = params["b1"].astype(f32)                                        # (1, d_ff)
    w2_t = jnp.pad(params["w2"].T, ((0, 0), (0, c_pad - C))).astype(bf16)  # (d_ff, c_pad)

    # Conv1d(kernel_size=1) over the token axis.
    cw_b = params["cw"].astype(bf16)                                       # (NC, S)
    cb_b = jnp.tile(params["cb"].astype(f32), (1, c_pad))                  # (NC, c_pad)

    H3 = 3 * H128
    in_specs = [
        pl.BlockSpec((S, c_pad), lambda k: (0, 0)),              # x (resident)
        pl.BlockSpec((c_pad, H3), lambda k: (0, 0)),             # fused QKV weights
        pl.BlockSpec((1, H3), lambda k: (0, 0)),                 # fused QKV bias
        pl.BlockSpec((H128, c_pad), lambda k: (0, 0)),           # grouped wo
        pl.BlockSpec((8, c_pad), lambda k: (0, 0)),              # stacked small vecs
        pl.BlockSpec((c_pad, tile_ff), lambda k: (0, k)),        # w1 tile (streamed)
        pl.BlockSpec((1, tile_ff), lambda k: (0, k)),            # b1 tile (streamed)
        pl.BlockSpec((tile_ff, c_pad), lambda k: (k, 0)),        # w2 tile (streamed)
        pl.BlockSpec((num_channels, S), lambda k: (0, 0)),       # conv weight
        pl.BlockSpec((num_channels, c_pad), lambda k: (0, 0)),   # conv bias (bcast)
    ]
    out_specs = pl.BlockSpec((num_channels, c_pad), lambda k: (0, 0))
    scratch_shapes = [
        pltpu.VMEM((S, c_pad), jnp.float32),   # y = LN1(x + attn), resident
        pltpu.VMEM((S, c_pad), jnp.float32),   # FFN accumulator
    ]

    out_pad = pl.pallas_call(
        functools.partial(_feature_transformer_kernel,
                          num_heads=num_heads, true_c=C, hd_pad=hd_pad),
        out_shape=jax.ShapeDtypeStruct((num_channels, c_pad), jnp.float32),
        grid_spec=pltpu.PrefetchScalarGridSpec(
            num_scalar_prefetch=0,
            grid=(n_k,),
            in_specs=in_specs,
            out_specs=out_specs,
            scratch_shapes=scratch_shapes),
        compiler_params=pltpu.CompilerParams(
            dimension_semantics=("arbitrary",)),
    )(x_pad, wqkv, bqkv, wo_g, vecs, w1_t, b1_p, w2_t, cw_b, cb_b)

    # Slice off padded feature lanes and restore the NCHW view.
    return out_pad[:, :C].reshape(-1, num_channels, tokenH, tokenW)


# --------------------------------------------------------------------------- #
# Parameters & pure-f32 reference (PyTorch-layout math, no Pallas)
# --------------------------------------------------------------------------- #
def init_params(key, in_channels, d_ff, num_channels, seq_len):
    """Deterministic synthetic parameters matching the PyTorch module shapes."""
    C = in_channels
    ks = jax.random.split(key, 16)

    def rnd(k, shape, scale=0.05):
        return jax.random.normal(k, shape, dtype=jnp.float32) * scale

    return {
        # nn.MultiheadAttention in_proj (split into q/k/v) + out_proj
        "wq": rnd(ks[0], (C, C)), "bq": rnd(ks[1], (1, C)),
        "wk": rnd(ks[2], (C, C)), "bk": rnd(ks[3], (1, C)),
        "wv": rnd(ks[4], (C, C)), "bv": rnd(ks[5], (1, C)),
        "wo": rnd(ks[6], (C, C)), "bo": rnd(ks[7], (1, C)),
        # LayerNorms
        "ln1_w": jnp.ones((1, C), jnp.float32) + rnd(ks[8], (1, C), 0.01),
        "ln1_b": rnd(ks[9], (1, C), 0.01),
        "ln2_w": jnp.ones((1, C), jnp.float32) + rnd(ks[10], (1, C), 0.01),
        "ln2_b": rnd(ks[11], (1, C), 0.01),
        # FFN (dim_feedforward = 2048, nn.TransformerEncoderLayer default)
        "w1": rnd(ks[12], (d_ff, C)), "b1": rnd(ks[13], (1, d_ff)),
        "w2": rnd(ks[14], (C, d_ff)), "b2": rnd(ks[15], (1, C)),
        # Conv1d(in_channels, num_channels, kernel_size=1): weight (OC, S, 1)->(OC, S)
        "cw": rnd(jax.random.fold_in(key, 100), (num_channels, seq_len)),
        "cb": rnd(jax.random.fold_in(key, 101), (num_channels, 1)),
    }


def reference_forward(x, params, *, num_channels, tokenH, tokenW, num_heads=8):
    """Independent pure-f32 JAX reference written in the PyTorch convention."""
    C, H, W = x.shape
    xt = x.reshape(C, -1).T.astype(jnp.float32)              # (S, C)
    hd = C // num_heads
    scale = 1.0 / (hd ** 0.5)

    def lin(v, w, b):
        return v @ w.T + b

    def ln(v, w, b, eps=1e-5):
        mu = jnp.mean(v, -1, keepdims=True)
        var = jnp.mean((v - mu) ** 2, -1, keepdims=True)
        return (v - mu) * jax.lax.rsqrt(var + eps) * w + b

    q = lin(xt, params["wq"], params["bq"])
    k = lin(xt, params["wk"], params["bk"])
    v = lin(xt, params["wv"], params["bv"])
    heads = []
    for h in range(num_heads):
        lo = h * hd
        s = (q[:, lo:lo + hd] @ k[:, lo:lo + hd].T) * scale
        p = jax.nn.softmax(s, axis=-1)
        heads.append(p @ v[:, lo:lo + hd])
    attn = lin(jnp.concatenate(heads, -1), params["wo"], params["bo"])

    y = ln(xt + attn, params["ln1_w"], params["ln1_b"])
    ff = lin(jnp.maximum(lin(y, params["w1"], params["b1"]), 0.0),
             params["w2"], params["b2"])
    y = ln(y + ff, params["ln2_w"], params["ln2_b"])

    out = params["cw"] @ y + params["cb"]
    return out.reshape(-1, num_channels, tokenH, tokenW)


# --------------------------------------------------------------------------- #
if __name__ == "__main__":
    # Small shapes consistent with the module constraints:
    #   in_channels == tokenH * tokenW == H * W
    in_channels = 16
    tokenH = tokenW = 4
    num_channels = 32
    num_heads = 8          # nn.TransformerEncoderLayer(nhead=8); head_dim = 2
    d_ff = 2048            # nn.TransformerEncoderLayer default dim_feedforward

    key = jax.random.PRNGKey(0)
    kx, kp = jax.random.split(key)
    x = jax.random.normal(kx, (in_channels, tokenH, tokenW), dtype=jnp.float32)
    params = init_params(kp, in_channels, d_ff, num_channels,
                         seq_len=tokenH * tokenW)

    out = feature_transformer_forward(
        x, params, num_channels=num_channels, tokenH=tokenH, tokenW=tokenW,
        num_heads=num_heads)
    out = jax.block_until_ready(out)

    ref = reference_forward(
        x, params, num_channels=num_channels, tokenH=tokenH, tokenW=tokenW,
        num_heads=num_heads)

    assert out.shape == (1, num_channels, tokenH, tokenW), out.shape
    # bf16 MXU operands + approx reciprocal in the kernel vs a pure-f32 reference
    # -> tolerance loosened accordingly (observed errors ~1e-3).
    max_diff = float(jnp.max(jnp.abs(out - ref)))
    assert jnp.allclose(out, ref, atol=3e-2, rtol=3e-2), (
        f"mismatch vs f32 reference; max abs diff {max_diff}")

    print("KERNEL_OK")
</pallas_src>

<mosaic_0001>
module attributes {stable_mosaic.version = 11 : i64} {
  func.func @_feature_transformer_kernel(%arg0: i32, %arg1: memref<16x128xf32, #tpu.memory_space<vmem>>, %arg2: memref<128x3072xbf16, #tpu.memory_space<vmem>>, %arg3: memref<1x3072xf32, #tpu.memory_space<vmem>>, %arg4: memref<1024x128xbf16, #tpu.memory_space<vmem>>, %arg5: memref<8x128xf32, #tpu.memory_space<vmem>>, %arg6: memref<128x512xbf16, #tpu.memory_space<vmem>>, %arg7: memref<1x512xf32, #tpu.memory_space<vmem>>, %arg8: memref<512x128xbf16, #tpu.memory_space<vmem>>, %arg9: memref<32x16xbf16, #tpu.memory_space<vmem>>, %arg10: memref<32x128xf32, #tpu.memory_space<vmem>>, %arg11: memref<32x128xf32, #tpu.memory_space<vmem>>, %arg12: memref<16x128xf32, #tpu.memory_space<vmem>>, %arg13: memref<16x128xf32, #tpu.memory_space<vmem>>) attributes {dimension_semantics = [#tpu.dimension_semantics<arbitrary>], iteration_bounds = array<i64: 4>, scalar_prefetch = 0 : i64, scratch_operands = 2 : i64, tpu.core_type = #tpu.core_type<tc>, window_params = [{pipeline_mode = #tpu.pipeline_mode<synchronous>, transform_indices = @transform_0, window_bounds = array<i64: 16, 128>}, {pipeline_mode = #tpu.pipeline_mode<synchronous>, transform_indices = @transform_1, window_bounds = array<i64: 128, 3072>}, {pipeline_mode = #tpu.pipeline_mode<synchronous>, transform_indices = @transform_2, window_bounds = array<i64: 1, 3072>}, {pipeline_mode = #tpu.pipeline_mode<synchronous>, transform_indices = @transform_3, window_bounds = array<i64: 1024, 128>}, {pipeline_mode = #tpu.pipeline_mode<synchronous>, transform_indices = @transform_4, window_bounds = array<i64: 8, 128>}, {transform_indices = @transform_5, window_bounds = array<i64: 128, 512>}, {transform_indices = @transform_6, window_bounds = array<i64: 1, 512>}, {transform_indices = @transform_7, window_bounds = array<i64: 512, 128>}, {pipeline_mode = #tpu.pipeline_mode<synchronous>, transform_indices = @transform_8, window_bounds = array<i64: 32, 16>}, {pipeline_mode = #tpu.pipeline_mode<synchronous>, transform_indices = @transform_9, window_bounds = array<i64: 32, 128>}, {pipeline_mode = #tpu.pipeline_mode<synchronous>, transform_indices = @transform_10, window_bounds = array<i64: 32, 128>}]} {
    %0 = tpu.iota {dimensions = array<i32: 1>} : vector<1x128xi32>
    %c16_i32 = arith.constant 16 : i32
    %1 = vector.broadcast %c16_i32 : i32 to vector<1x128xi32>
    %2 = arith.cmpi slt, %0, %1 : vector<1x128xi32>
    %3 = arith.extui %2 : vector<1x128xi1> to vector<1x128xi32>
    %4 = arith.sitofp %3 : vector<1x128xi32> to vector<1x128xf32>
    %c0_i32 = arith.constant 0 : i32
    %5 = arith.cmpi eq, %arg0, %c0_i32 : i32
    %6 = arith.extui %5 : i1 to i32
    %c0_i32_0 = arith.constant 0 : i32
    %7 = arith.cmpi ne, %6, %c0_i32_0 : i32
    scf.if %7 {
      %c0_15 = arith.constant 0 : index
      %c0_16 = arith.constant 0 : index
      %26 = vector.load %arg1[%c0_15, %c0_16] : memref<16x128xf32, #tpu.memory_space<vmem>>, vector<16x128xf32>
      %27 = arith.truncf %26 : vector<16x128xf32> to vector<16x128xbf16>
      %c0_17 = arith.constant 0 : index
      %c0_18 = arith.constant 0 : index
      %28 = vector.load %arg5[%c0_17, %c0_18] : memref<8x128xf32, #tpu.memory_space<vmem>>, vector<8x128xf32>
      %29 = vector.extract_strided_slice %28 {offsets = [0, 0], sizes = [1, 128], strides = [1, 1]} : vector<8x128xf32> to vector<1x128xf32>
      %30 = vector.extract_strided_slice %28 {offsets = [1, 0], sizes = [1, 128], strides = [1, 1]} : vector<8x128xf32> to vector<1x128xf32>
      %31 = vector.extract_strided_slice %28 {offsets = [2, 0], sizes = [1, 128], strides = [1, 1]} : vector<8x128xf32> to vector<1x128xf32>
      %c0_19 = arith.constant 0 : index
      %c0_20 = arith.constant 0 : index
      %32 = vector.load %arg2[%c0_19, %c0_20] : memref<128x3072xbf16, #tpu.memory_space<vmem>>, vector<128x3072xbf16>
      %cst_21 = arith.constant dense<0.000000e+00> : vector<16x3072xf32>
      %33 = tpu.matmul %27, %32, %cst_21 {dimension_numbers = #tpu.dot_dimension_numbers<[1], [0], [0], [1], [0, 0, 1, 1], [], []>} : vector<16x128xbf16>, vector<128x3072xbf16>, vector<16x3072xf32> -> vector<16x3072xf32>
      %c0_22 = arith.constant 0 : index
      %c0_23 = arith.constant 0 : index
      %34 = vector.load %arg3[%c0_22, %c0_23] : memref<1x3072xf32, #tpu.memory_space<vmem>>, vector<1x3072xf32>
      %35 = vector.broadcast %34 : vector<1x3072xf32> to vector<16x3072xf32>
      %36 = arith.addf %33, %35 : vector<16x3072xf32>
      %37 = vector.extract_strided_slice %36 {offsets = [0, 0], sizes = [16, 1024], strides = [1, 1]} : vector<16x3072xf32> to vector<16x1024xf32>
      %38 = vector.extract_strided_slice %36 {offsets = [0, 1024], sizes = [16, 1024], strides = [1, 1]} : vector<16x3072xf32> to vector<16x1024xf32>
      %39 = vector.extract_strided_slice %36 {offsets = [0, 2048], sizes = [16, 1024], strides = [1, 1]} : vector<16x3072xf32> to vector<16x1024xf32>
      %40 = vector.extract_strided_slice %37 {offsets = [0, 0], sizes = [16, 128], strides = [1, 1]} : vector<16x1024xf32> to vector<16x128xf32>
      %41 = arith.truncf %40 : vector<16x128xf32> to vector<16x128xbf16>
      %42 = vector.extract_strided_slice %38 {offsets = [0, 0], sizes = [16, 128], strides = [1, 1]} : vector<16x1024xf32> to vector<16x128xf32>
      %43 = arith.truncf %42 : vector<16x128xf32> to vector<16x128xbf16>
      %44 = vector.extract_strided_slice %39 {offsets = [0, 0], sizes = [16, 128], strides = [1, 1]} : vector<16x1024xf32> to vector<16x128xf32>
      %45 = arith.truncf %44 : vector<16x128xf32> to vector<16x128xbf16>
      %cst_24 = arith.constant dense<0.000000e+00> : vector<16x16xf32>
      %46 = tpu.matmul %41, %43, %cst_24 {dimension_numbers = #tpu.dot_dimension_numbers<[1], [1], [0], [0], [0, 0, 1, 0], [], []>} : vector<16x128xbf16>, vector<16x128xbf16>, vector<16x16xf32> -> vector<16x16xf32>
      %cst_25 = arith.constant dense<0xFF800000> : vector<16xf32>
      %47 = vector.multi_reduction <maximumf>, %46, %cst_25 [1] : vector<16x16xf32> to vector<16xf32>
      %48 = vector.shape_cast %47 : vector<16xf32> to vector<16x1xf32>
      %49 = vector.broadcast %48 : vector<16x1xf32> to vector<16x16xf32>
      %50 = arith.subf %46, %49 : vector<16x16xf32>
      %51 = math.exp %50 : vector<16x16xf32>
      %cst_26 = arith.constant dense<0.000000e+00> : vector<16xf32>
      %52 = vector.multi_reduction <add>, %51, %cst_26 [1] : vector<16x16xf32> to vector<16xf32>
      %53 = vector.shape_cast %52 : vector<16xf32> to vector<16x1xf32>
      %54 = tpu.reciprocal %53 {approx = true} : vector<16x1xf32> -> vector<16x1xf32>
      %55 = vector.broadcast %54 : vector<16x1xf32> to vector<16x16xf32>
      %56 = arith.mulf %51, %55 : vector<16x16xf32>
      %57 = arith.truncf %56 : vector<16x16xf32> to vector<16x16xbf16>
      %cst_27 = arith.constant dense<0.000000e+00> : vector<16x128xf32>
      %58 = tpu.matmul %57, %45, %cst_27 {dimension_numbers = #tpu.dot_dimension_numbers<[1], [0], [0], [1], [0, 0, 1, 1], [], []>} : vector<16x16xbf16>, vector<16x128xbf16>, vector<16x128xf32> -> vector<16x128xf32>
      %59 = vector.extract_strided_slice %37 {offsets = [0, 128], sizes = [16, 128], strides = [1, 1]} : vector<16x1024xf32> to vector<16x128xf32>
      %60 = arith.truncf %59 : vector<16x128xf32> to vector<16x128xbf16>
      %61 = vector.extract_strided_slice %38 {offsets = [0, 128], sizes = [16, 128], strides = [1, 1]} : vector<16x1024xf32> to vector<16x128xf32>
      %62 = arith.truncf %61 : vector<16x128xf32> to vector<16x128xbf16>
      %63 = vector.extract_strided_slice %39 {offsets = [0, 128], sizes = [16, 128], strides = [1, 1]} : vector<16x1024xf32> to vector<16x128xf32>
      %64 = arith.truncf %63 : vector<16x128xf32> to vector<16x128xbf16>
      %cst_28 = arith.constant dense<0.000000e+00> : vector<16x16xf32>
      %65 = tpu.matmul %60, %62, %cst_28 {dimension_numbers = #tpu.dot_dimension_numbers<[1], [1], [0], [0], [0, 0, 1, 0], [], []>} : vector<16x128xbf16>, vector<16x128xbf16>, vector<16x16xf32> -> vector<16x16xf32>
      %cst_29 = arith.constant dense<0xFF800000> : vector<16xf32>
      %66 = vector.multi_reduction <maximumf>, %65, %cst_29 [1] : vector<16x16xf32> to vector<16xf32>
      %67 = vector.shape_cast %66 : vector<16xf32> to vector<16x1xf32>
      %68 = vector.broadcast %67 : vector<16x1xf32> to vector<16x16xf32>
      %69 = arith.subf %65, %68 : vector<16x16xf32>
      %70 = math.exp %69 : vector<16x16xf32>
      %cst_30 = arith.constant dense<0.000000e+00> : vector<16xf32>
      %71 = vector.multi_reduction <add>, %70, %cst_30 [1] : vector<16x16xf32> to vector<16xf32>
      %72 = vector.shape_cast %71 : vector<16xf32> to vector<16x1xf32>
      %73 = tpu.reciprocal %72 {approx = true} : vector<16x1xf32> -> vector<16x1xf32>
      %74 = vector.broadcast %73 : vector<16x1xf32> to vector<16x16xf32>
      %75 = arith.mulf %70, %74 : vector<16x16xf32>
      %76 = arith.truncf %75 : vector<16x16xf32> to vector<16x16xbf16>
      %cst_31 = arith.constant dense<0.000000e+00> : vector<16x128xf32>
      %77 = tpu.matmul %76, %64, %cst_31 {dimension_numbers = #tpu.dot_dimension_numbers<[1], [0], [0], [1], [0, 0, 1, 1], [], []>} : vector<16x16xbf16>, vector<16x128xbf16>, vector<16x128xf32> -> vector<16x128xf32>
      %78 = vector.extract_strided_slice %37 {offsets = [0, 256], sizes = [16, 128], strides = [1, 1]} : vector<16x1024xf32> to vector<16x128xf32>
      %79 = arith.truncf %78 : vector<16x128xf32> to vector<16x128xbf16>
      %80 = vector.extract_strided_slice %38 {offsets = [0, 256], sizes = [16, 128], strides = [1, 1]} : vector<16x1024xf32> to vector<16x128xf32>
      %81 = arith.truncf %80 : vector<16x128xf32> to vector<16x128xbf16>
      %82 = vector.extract_strided_slice %39 {offsets = [0, 256], sizes = [16, 128], strides = [1, 1]} : vector<16x1024xf32> to vector<16x128xf32>
      %83 = arith.truncf %82 : vector<16x128xf32> to vector<16x128xbf16>
      %cst_32 = arith.constant dense<0.000000e+00> : vector<16x16xf32>
      %84 = tpu.matmul %79, %81, %cst_32 {dimension_numbers = #tpu.dot_dimension_numbers<[1], [1], [0], [0], [0, 0, 1, 0], [], []>} : vector<16x128xbf16>, vector<16x128xbf16>, vector<16x16xf32> -> vector<16x16xf32>
      %cst_33 = arith.constant dense<0xFF800000> : vector<16xf32>
      %85 = vector.multi_reduction <maximumf>, %84, %cst_33 [1] : vector<16x16xf32> to vector<16xf32>
      %86 = vector.shape_cast %85 : vector<16xf32> to vector<16x1xf32>
      %87 = vector.broadcast %86 : vector<16x1xf32> to vector<16x16xf32>
      %88 = arith.subf %84, %87 : vector<16x16xf32>
      %89 = math.exp %88 : vector<16x16xf32>
      %cst_34 = arith.constant dense<0.000000e+00> : vector<16xf32>
      %90 = vector.multi_reduction <add>, %89, %cst_34 [1] : vector<16x16xf32> to vector<16xf32>
      %91 = vector.shape_cast %90 : vector<16xf32> to vector<16x1xf32>
      %92 = tpu.reciprocal %91 {approx = true} : vector<16x1xf32> -> vector<16x1xf32>
      %93 = vector.broadcast %92 : vector<16x1xf32> to vector<16x16xf32>
      %94 = arith.mulf %89, %93 : vector<16x16xf32>
      %95 = arith.truncf %94 : vector<16x16xf32> to vector<16x16xbf16>
      %cst_35 = arith.constant dense<0.000000e+00> : vector<16x128xf32>
      %96 = tpu.matmul %95, %83, %cst_35 {dimension_numbers = #tpu.dot_dimension_numbers<[1], [0], [0], [1], [0, 0, 1, 1], [], []>} : vector<16x16xbf16>, vector<16x128xbf16>, vector<16x128xf32> -> vector<16x128xf32>
      %97 = vector.extract_strided_slice %37 {offsets = [0, 384], sizes = [16, 128], strides = [1, 1]} : vector<16x1024xf32> to vector<16x128xf32>
      %98 = arith.truncf %97 : vector<16x128xf32> to vector<16x128xbf16>
      %99 = vector.extract_strided_slice %38 {offsets = [0, 384], sizes = [16, 128], strides = [1, 1]} : vector<16x1024xf32> to vector<16x128xf32>
      %100 = arith.truncf %99 : vector<16x128xf32> to vector<16x128xbf16>
      %101 = vector.extract_strided_slice %39 {offsets = [0, 384], sizes = [16, 128], strides = [1, 1]} : vector<16x1024xf32> to vector<16x128xf32>
      %102 = arith.truncf %101 : vector<16x128xf32> to vector<16x128xbf16>
      %cst_36 = arith.constant dense<0.000000e+00> : vector<16x16xf32>
      %103 = tpu.matmul %98, %100, %cst_36 {dimension_numbers = #tpu.dot_dimension_numbers<[1], [1], [0], [0], [0, 0, 1, 0], [], []>} : vector<16x128xbf16>, vector<16x128xbf16>, vector<16x16xf32> -> vector<16x16xf32>
      %cst_37 = arith.constant dense<0xFF800000> : vector<16xf32>
      %104 = vector.multi_reduction <maximumf>, %103, %cst_37 [1] : vector<16x16xf32> to vector<16xf32>
      %105 = vector.shape_cast %104 : vector<16xf32> to vector<16x1xf32>
      %106 = vector.broadcast %105 : vector<16x1xf32> to vector<16x16xf32>
      %107 = arith.subf %103, %106 : vector<16x16xf32>
      %108 = math.exp %107 : vector<16x16xf32>
      %cst_38 = arith.constant dense<0.000000e+00> : vector<16xf32>
      %109 = vector.multi_reduction <add>, %108, %cst_38 [1] : vector<16x16xf32> to vector<16xf32>
      %110 = vector.shape_cast %109 : vector<16xf32> to vector<16x1xf32>
      %111 = tpu.reciprocal %110 {approx = true} : vector<16x1xf32> -> vector<16x1xf32>
      %112 = vector.broadcast %111 : vector<16x1xf32> to vector<16x16xf32>
      %113 = arith.mulf %108, %112 : vector<16x16xf32>
      %114 = arith.truncf %113 : vector<16x16xf32> to vector<16x16xbf16>
      %cst_39 = arith.constant dense<0.000000e+00> : vector<16x128xf32>
      %115 = tpu.matmul %114, %102, %cst_39 {dimension_numbers = #tpu.dot_dimension_numbers<[1], [0], [0], [1], [0, 0, 1, 1], [], []>} : vector<16x16xbf16>, vector<16x128xbf16>, vector<16x128xf32> -> vector<16x128xf32>
      %116 = vector.extract_strided_slice %37 {offsets = [0, 512], sizes = [16, 128], strides = [1, 1]} : vector<16x1024xf32> to vector<16x128xf32>
      %117 = arith.truncf %116 : vector<16x128xf32> to vector<16x128xbf16>
      %118 = vector.extract_strided_slice %38 {offsets = [0, 512], sizes = [16, 128], strides = [1, 1]} : vector<16x1024xf32> to vector<16x128xf32>
      %119 = arith.truncf %118 : vector<16x128xf32> to vector<16x128xbf16>
      %120 = vector.extract_strided_slice %39 {offsets = [0, 512], sizes = [16, 128], strides = [1, 1]} : vector<16x1024xf32> to vector<16x128xf32>
      %121 = arith.truncf %120 : vector<16x128xf32> to vector<16x128xbf16>
      %cst_40 = arith.constant dense<0.000000e+00> : vector<16x16xf32>
      %122 = tpu.matmul %117, %119, %cst_40 {dimension_numbers = #tpu.dot_dimension_numbers<[1], [1], [0], [0], [0, 0, 1, 0], [], []>} : vector<16x128xbf16>, vector<16x128xbf16>, vector<16x16xf32> -> vector<16x16xf32>
      %cst_41 = arith.constant dense<0xFF800000> : vector<16xf32>
      %123 = vector.multi_reduction <maximumf>, %122, %cst_41 [1] : vector<16x16xf32> to vector<16xf32>
      %124 = vector.shape_cast %123 : vector<16xf32> to vector<16x1xf32>
      %125 = vector.broadcast %124 : vector<16x1xf32> to vector<16x16xf32>
      %126 = arith.subf %122, %125 : vector<16x16xf32>
      %127 = math.exp %126 : vector<16x16xf32>
      %cst_42 = arith.constant dense<0.000000e+00> : vector<16xf32>
      %128 = vector.multi_reduction <add>, %127, %cst_42 [1] : vector<16x16xf32> to vector<16xf32>
      %129 = vector.shape_cast %128 : vector<16xf32> to vector<16x1xf32>
      %130 = tpu.reciprocal %129 {approx = true} : vector<16x1xf32> -> vector<16x1xf32>
      %131 = vector.broadcast %130 : vector<16x1xf32> to vector<16x16xf32>
      %132 = arith.mulf %127, %131 : vector<16x16xf32>
      %133 = arith.truncf %132 : vector<16x16xf32> to vector<16x16xbf16>
      %cst_43 = arith.constant dense<0.000000e+00> : vector<16x128xf32>
      %134 = tpu.matmul %133, %121, %cst_43 {dimension_numbers = #tpu.dot_dimension_numbers<[1], [0], [0], [1], [0, 0, 1, 1], [], []>} : vector<16x16xbf16>, vector<16x128xbf16>, vector<16x128xf32> -> vector<16x128xf32>
      %135 = vector.extract_strided_slice %37 {offsets = [0, 640], sizes = [16, 128], strides = [1, 1]} : vector<16x1024xf32> to vector<16x128xf32>
      %136 = arith.truncf %135 : vector<16x128xf32> to vector<16x128xbf16>
      %137 = vector.extract_strided_slice %38 {offsets = [0, 640], sizes = [16, 128], strides = [1, 1]} : vector<16x1024xf32> to vector<16x128xf32>
      %138 = arith.truncf %137 : vector<16x128xf32> to vector<16x128xbf16>
      %139 = vector.extract_strided_slice %39 {offsets = [0, 640], sizes = [16, 128], strides = [1, 1]} : vector<16x1024xf32> to vector<16x128xf32>
      %140 = arith.truncf %139 : vector<16x128xf32> to vector<16x128xbf16>
      %cst_44 = arith.constant dense<0.000000e+00> : vector<16x16xf32>
      %141 = tpu.matmul %136, %138, %cst_44 {dimension_numbers = #tpu.dot_dimension_numbers<[1], [1], [0], [0], [0, 0, 1, 0], [], []>} : vector<16x128xbf16>, vector<16x128xbf16>, vector<16x16xf32> -> vector<16x16xf32>
      %cst_45 = arith.constant dense<0xFF800000> : vector<16xf32>
      %142 = vector.multi_reduction <maximumf>, %141, %cst_45 [1] : vector<16x16xf32> to vector<16xf32>
      %143 = vector.shape_cast %142 : vector<16xf32> to vector<16x1xf32>
      %144 = vector.broadcast %143 : vector<16x1xf32> to vector<16x16xf32>
      %145 = arith.subf %141, %144 : vector<16x16xf32>
      %146 = math.exp %145 : vector<16x16xf32>
      %cst_46 = arith.constant dense<0.000000e+00> : vector<16xf32>
      %147 = vector.multi_reduction <add>, %146, %cst_46 [1] : vector<16x16xf32> to vector<16xf32>
      %148 = vector.shape_cast %147 : vector<16xf32> to vector<16x1xf32>
      %149 = tpu.reciprocal %148 {approx = true} : vector<16x1xf32> -> vector<16x1xf32>
      %150 = vector.broadcast %149 : vector<16x1xf32> to vector<16x16xf32>
      %151 = arith.mulf %146, %150 : vector<16x16xf32>
      %152 = arith.truncf %151 : vector<16x16xf32> to vector<16x16xbf16>
      %cst_47 = arith.constant dense<0.000000e+00> : vector<16x128xf32>
      %153 = tpu.matmul %152, %140, %cst_47 {dimension_numbers = #tpu.dot_dimension_numbers<[1], [0], [0], [1], [0, 0, 1, 1], [], []>} : vector<16x16xbf16>, vector<16x128xbf16>, vector<16x128xf32> -> vector<16x128xf32>
      %154 = vector.extract_strided_slice %37 {offsets = [0, 768], sizes = [16, 128], strides = [1, 1]} : vector<16x1024xf32> to vector<16x128xf32>
      %155 = arith.truncf %154 : vector<16x128xf32> to vector<16x128xbf16>
      %156 = vector.extract_strided_slice %38 {offsets = [0, 768], sizes = [16, 128], strides = [1, 1]} : vector<16x1024xf32> to vector<16x128xf32>
      %157 = arith.truncf %156 : vector<16x128xf32> to vector<16x128xbf16>
      %158 = vector.extract_strided_slice %39 {offsets = [0, 768], sizes = [16, 128], strides = [1, 1]} : vector<16x1024xf32> to vector<16x128xf32>
      %159 = arith.truncf %158 : vector<16x128xf32> to vector<16x128xbf16>
      %cst_48 = arith.constant dense<0.000000e+00> : vector<16x16xf32>
      %160 = tpu.matmul %155, %157, %cst_48 {dimension_numbers = #tpu.dot_dimension_numbers<[1], [1], [0], [0], [0, 0, 1, 0], [], []>} : vector<16x128xbf16>, vector<16x128xbf16>, vector<16x16xf32> -> vector<16x16xf32>
      %cst_49 = arith.constant dense<0xFF800000> : vector<16xf32>
      %161 = vector.multi_reduction <maximumf>, %160, %cst_49 [1] : vector<16x16xf32> to vector<16xf32>
      %162 = vector.shape_cast %161 : vector<16xf32> to vector<16x1xf32>
      %163 = vector.broadcast %162 : vector<16x1xf32> to vector<16x16xf32>
      %164 = arith.subf %160, %163 : vector<16x16xf32>
      %165 = math.exp %164 : vector<16x16xf32>
      %cst_50 = arith.constant dense<0.000000e+00> : vector<16xf32>
      %166 = vector.multi_reduction <add>, %165, %cst_50 [1] : vector<16x16xf32> to vector<16xf32>
      %167 = vector.shape_cast %166 : vector<16xf32> to vector<16x1xf32>
      %168 = tpu.reciprocal %167 {approx = true} : vector<16x1xf32> -> vector<16x1xf32>
      %169 = vector.broadcast %168 : vector<16x1xf32> to vector<16x16xf32>
      %170 = arith.mulf %165, %169 : vector<16x16xf32>
      %171 = arith.truncf %170 : vector<16x16xf32> to vector<16x16xbf16>
      %cst_51 = arith.constant dense<0.000000e+00> : vector<16x128xf32>
      %172 = tpu.matmul %171, %159, %cst_51 {dimension_numbers = #tpu.dot_dimension_numbers<[1], [0], [0], [1], [0, 0, 1, 1], [], []>} : vector<16x16xbf16>, vector<16x128xbf16>, vector<16x128xf32> -> vector<16x128xf32>
      %173 = vector.extract_strided_slice %37 {offsets = [0, 896], sizes = [16, 128], strides = [1, 1]} : vector<16x1024xf32> to vector<16x128xf32>
      %174 = arith.truncf %173 : vector<16x128xf32> to vector<16x128xbf16>
      %175 = vector.extract_strided_slice %38 {offsets = [0, 896], sizes = [16, 128], strides = [1, 1]} : vector<16x1024xf32> to vector<16x128xf32>
      %176 = arith.truncf %175 : vector<16x128xf32> to vector<16x128xbf16>
      %177 = vector.extract_strided_slice %39 {offsets = [0, 896], sizes = [16, 128], strides = [1, 1]} : vector<16x1024xf32> to vector<16x128xf32>
      %178 = arith.truncf %177 : vector<16x128xf32> to vector<16x128xbf16>
      %cst_52 = arith.constant dense<0.000000e+00> : vector<16x16xf32>
      %179 = tpu.matmul %174, %176, %cst_52 {dimension_numbers = #tpu.dot_dimension_numbers<[1], [1], [0], [0], [0, 0, 1, 0], [], []>} : vector<16x128xbf16>, vector<16x128xbf16>, vector<16x16xf32> -> vector<16x16xf32>
      %cst_53 = arith.constant dense<0xFF800000> : vector<16xf32>
      %180 = vector.multi_reduction <maximumf>, %179, %cst_53 [1] : vector<16x16xf32> to vector<16xf32>
      %181 = vector.shape_cast %180 : vector<16xf32> to vector<16x1xf32>
      %182 = vector.broadcast %181 : vector<16x1xf32> to vector<16x16xf32>
      %183 = arith.subf %179, %182 : vector<16x16xf32>
      %184 = math.exp %183 : vector<16x16xf32>
      %cst_54 = arith.constant dense<0.000000e+00> : vector<16xf32>
      %185 = vector.multi_reduction <add>, %184, %cst_54 [1] : vector<16x16xf32> to vector<16xf32>
      %186 = vector.shape_cast %185 : vector<16xf32> to vector<16x1xf32>
      %187 = tpu.reciprocal %186 {approx = true} : vector<16x1xf32> -> vector<16x1xf32>
      %188 = vector.broadcast %187 : vector<16x1xf32> to vector<16x16xf32>
      %189 = arith.mulf %184, %188 : vector<16x16xf32>
      %190 = arith.truncf %189 : vector<16x16xf32> to vector<16x16xbf16>
      %cst_55 = arith.constant dense<0.000000e+00> : vector<16x128xf32>
      %191 = tpu.matmul %190, %178, %cst_55 {dimension_numbers = #tpu.dot_dimension_numbers<[1], [0], [0], [1], [0, 0, 1, 1], [], []>} : vector<16x16xbf16>, vector<16x128xbf16>, vector<16x128xf32> -> vector<16x128xf32>
      %192 = tpu.concatenate %58, %77, %96, %115, %134, %153, %172, %191 in 1 : vector<16x128xf32>, vector<16x128xf32>, vector<16x128xf32>, vector<16x128xf32>, vector<16x128xf32>, vector<16x128xf32>, vector<16x128xf32>, vector<16x128xf32> -> vector<16x1024xf32>
      %193 = arith.truncf %192 : vector<16x1024xf32> to vector<16x1024xbf16>
      %c0_56 = arith.constant 0 : index
      %c0_57 = arith.constant 0 : index
      %194 = vector.load %arg4[%c0_56, %c0_57] : memref<1024x128xbf16, #tpu.memory_space<vmem>>, vector<1024x128xbf16>
      %cst_58 = arith.constant dense<0.000000e+00> : vector<16x128xf32>
      %195 = tpu.matmul %193, %194, %cst_58 {dimension_numbers = #tpu.dot_dimension_numbers<[1], [0], [0], [1], [0, 0, 1, 1], [], []>} : vector<16x1024xbf16>, vector<1024x128xbf16>, vector<16x128xf32> -> vector<16x128xf32>
      %196 = vector.broadcast %29 : vector<1x128xf32> to vector<16x128xf32>
      %197 = arith.addf %195, %196 : vector<16x128xf32>
      %198 = arith.addf %26, %197 : vector<16x128xf32>
      %cst_59 = arith.constant dense<0.000000e+00> : vector<16xf32>
      %199 = vector.multi_reduction <add>, %198, %cst_59 [1] : vector<16x128xf32> to vector<16xf32>
      %200 = vector.shape_cast %199 : vector<16xf32> to vector<16x1xf32>
      %cst_60 = arith.constant 6.250000e-02 : f32
      %201 = vector.broadcast %cst_60 : f32 to vector<16x1xf32>
      %202 = arith.mulf %200, %201 : vector<16x1xf32>
      %203 = vector.broadcast %202 : vector<16x1xf32> to vector<16x128xf32>
      %204 = arith.subf %198, %203 : vector<16x128xf32>
      %205 = vector.broadcast %4 : vector<1x128xf32> to vector<16x128xf32>
      %206 = arith.mulf %204, %205 : vector<16x128xf32>
      %207 = arith.mulf %206, %206 : vector<16x128xf32>
      %cst_61 = arith.constant dense<0.000000e+00> : vector<16xf32>
      %208 = vector.multi_reduction <add>, %207, %cst_61 [1] : vector<16x128xf32> to vector<16xf32>
      %209 = vector.shape_cast %208 : vector<16xf32> to vector<16x1xf32>
      %cst_62 = arith.constant 6.250000e-02 : f32
      %210 = vector.broadcast %cst_62 : f32 to vector<16x1xf32>
      %211 = arith.mulf %209, %210 : vector<16x1xf32>
      %cst_63 = arith.constant 9.99999974E-6 : f32
      %212 = vector.broadcast %cst_63 : f32 to vector<16x1xf32>
      %213 = arith.addf %211, %212 : vector<16x1xf32>
      %214 = math.rsqrt %213 : vector<16x1xf32>
      %215 = vector.broadcast %214 : vector<16x1xf32> to vector<16x128xf32>
      %216 = arith.mulf %206, %215 : vector<16x128xf32>
      %217 = vector.broadcast %30 : vector<1x128xf32> to vector<16x128xf32>
      %218 = arith.mulf %216, %217 : vector<16x128xf32>
      %219 = vector.broadcast %31 : vector<1x128xf32> to vector<16x128xf32>
      %220 = arith.addf %218, %219 : vector<16x128xf32>
      %c0_64 = arith.constant 0 : index
      %c0_65 = arith.constant 0 : index
      %221 = vector.load %arg12[%c0_64, %c0_65] : memref<16x128xf32, #tpu.memory_space<vmem>>, vector<16x128xf32>
      tpu.vector_store %arg12[%c0_64, %c0_65], %220 {strides = array<i32>} : memref<16x128xf32, #tpu.memory_space<vmem>>, vector<16x128xf32>,
      %cst_66 = arith.constant 0.000000e+00 : f32
      %222 = vector.broadcast %cst_66 : f32 to vector<16x128xf32>
      %c0_67 = arith.constant 0 : index
      %c0_68 = arith.constant 0 : index
      %223 = vector.load %arg13[%c0_67, %c0_68] : memref<16x128xf32, #tpu.memory_space<vmem>>, vector<16x128xf32>
      tpu.vector_store %arg13[%c0_67, %c0_68], %222 {strides = array<i32>} : memref<16x128xf32, #tpu.memory_space<vmem>>, vector<16x128xf32>,
    } else {
    }
    %c0 = arith.constant 0 : index
    %c0_1 = arith.constant 0 : index
    %8 = vector.load %arg12[%c0, %c0_1] : memref<16x128xf32, #tpu.memory_space<vmem>>, vector<16x128xf32>
    %9 = arith.truncf %8 : vector<16x128xf32> to vector<16x128xbf16>
    %c0_2 = arith.constant 0 : index
    %c0_3 = arith.constant 0 : index
    %10 = vector.load %arg6[%c0_2, %c0_3] : memref<128x512xbf16, #tpu.memory_space<vmem>>, vector<128x512xbf16>
    %cst = arith.constant dense<0.000000e+00> : vector<16x512xf32>
    %11 = tpu.matmul %9, %10, %cst {dimension_numbers = #tpu.dot_dimension_numbers<[1], [0], [0], [1], [0, 0, 1, 1], [], []>} : vector<16x128xbf16>, vector<128x512xbf16>, vector<16x512xf32> -> vector<16x512xf32>
    %c0_4 = arith.constant 0 : index
    %c0_5 = arith.constant 0 : index
    %12 = vector.load %arg7[%c0_4, %c0_5] : memref<1x512xf32, #tpu.memory_space<vmem>>, vector<1x512xf32>
    %13 = vector.broadcast %12 : vector<1x512xf32> to vector<16x512xf32>
    %14 = arith.addf %11, %13 : vector<16x512xf32>
    %cst_6 = arith.constant 0.000000e+00 : f32
    %15 = vector.broadcast %cst_6 : f32 to vector<16x512xf32>
    %16 = arith.maximumf %14, %15 : vector<16x512xf32>
    %17 = arith.truncf %16 : vector<16x512xf32> to vector<16x512xbf16>
    %c0_7 = arith.constant 0 : index
    %c0_8 = arith.constant 0 : index
    %18 = vector.load %arg13[%c0_7, %c0_8] : memref<16x128xf32, #tpu.memory_space<vmem>>, vector<16x128xf32>
    %c0_9 = arith.constant 0 : index
    %c0_10 = arith.constant 0 : index
    %19 = vector.load %arg8[%c0_9, %c0_10] : memref<512x128xbf16, #tpu.memory_space<vmem>>, vector<512x128xbf16>
    %cst_11 = arith.constant dense<0.000000e+00> : vector<16x128xf32>
    %20 = tpu.matmul %17, %19, %cst_11 {dimension_numbers = #tpu.dot_dimension_numbers<[1], [0], [0], [1], [0, 0, 1, 1], [], []>} : vector<16x512xbf16>, vector<512x128xbf16>, vector<16x128xf32> -> vector<16x128xf32>
    %21 = arith.addf %18, %20 : vector<16x128xf32>
    %c0_12 = arith.constant 0 : index
    %c0_13 = arith.constant 0 : index
    %22 = vector.load %arg13[%c0_12, %c0_13] : memref<16x128xf32, #tpu.memory_space<vmem>>, vector<16x128xf32>
    tpu.vector_store %arg13[%c0_12, %c0_13], %21 {strides = array<i32>} : memref<16x128xf32, #tpu.memory_space<vmem>>, vector<16x128xf32>,
    %c3_i32 = arith.constant 3 : i32
    %23 = arith.cmpi eq, %arg0, %c3_i32 : i32
    %24 = arith.extui %23 : i1 to i32
    %c0_i32_14 = arith.constant 0 : i32
    %25 = arith.cmpi ne, %24, %c0_i32_14 : i32
    scf.if %25 {
      %c0_15 = arith.constant 0 : index
      %c0_16 = arith.constant 0 : index
      %26 = vector.load %arg5[%c0_15, %c0_16] : memref<8x128xf32, #tpu.memory_space<vmem>>, vector<8x128xf32>
      %27 = vector.extract_strided_slice %26 {offsets = [3, 0], sizes = [1, 128], strides = [1, 1]} : vector<8x128xf32> to vector<1x128xf32>
      %28 = vector.extract_strided_slice %26 {offsets = [4, 0], sizes = [1, 128], strides = [1, 1]} : vector<8x128xf32> to vector<1x128xf32>
      %29 = vector.extract_strided_slice %26 {offsets = [5, 0], sizes = [1, 128], strides = [1, 1]} : vector<8x128xf32> to vector<1x128xf32>
      %c0_17 = arith.constant 0 : index
      %c0_18 = arith.constant 0 : index
      %30 = vector.load %arg12[%c0_17, %c0_18] : memref<16x128xf32, #tpu.memory_space<vmem>>, vector<16x128xf32>
      %c0_19 = arith.constant 0 : index
      %c0_20 = arith.constant 0 : index
      %31 = vector.load %arg13[%c0_19, %c0_20] : memref<16x128xf32, #tpu.memory_space<vmem>>, vector<16x128xf32>
      %32 = arith.addf %30, %31 : vector<16x128xf32>
      %33 = vector.broadcast %29 : vector<1x128xf32> to vector<16x128xf32>
      %34 = arith.addf %32, %33 : vector<16x128xf32>
      %cst_21 = arith.constant dense<0.000000e+00> : vector<16xf32>
      %35 = vector.multi_reduction <add>, %34, %cst_21 [1] : vector<16x128xf32> to vector<16xf32>
      %36 = vector.shape_cast %35 : vector<16xf32> to vector<16x1xf32>
      %cst_22 = arith.constant 6.250000e-02 : f32
      %37 = vector.broadcast %cst_22 : f32 to vector<16x1xf32>
      %38 = arith.mulf %36, %37 : vector<16x1xf32>
      %39 = vector.broadcast %38 : vector<16x1xf32> to vector<16x128xf32>
      %40 = arith.subf %34, %39 : vector<16x128xf32>
      %41 = vector.broadcast %4 : vector<1x128xf32> to vector<16x128xf32>
      %42 = arith.mulf %40, %41 : vector<16x128xf32>
      %43 = arith.mulf %42, %42 : vector<16x128xf32>
      %cst_23 = arith.constant dense<0.000000e+00> : vector<16xf32>
      %44 = vector.multi_reduction <add>, %43, %cst_23 [1] : vector<16x128xf32> to vector<16xf32>
      %45 = vector.shape_cast %44 : vector<16xf32> to vector<16x1xf32>
      %cst_24 = arith.constant 6.250000e-02 : f32
      %46 = vector.broadcast %cst_24 : f32 to vector<16x1xf32>
      %47 = arith.mulf %45, %46 : vector<16x1xf32>
      %cst_25 = arith.constant 9.99999974E-6 : f32
      %48 = vector.broadcast %cst_25 : f32 to vector<16x1xf32>
      %49 = arith.addf %47, %48 : vector<16x1xf32>
      %50 = math.rsqrt %49 : vector<16x1xf32>
      %51 = vector.broadcast %50 : vector<16x1xf32> to vector<16x128xf32>
      %52 = arith.mulf %42, %51 : vector<16x128xf32>
      %53 = vector.broadcast %27 : vector<1x128xf32> to vector<16x128xf32>
      %54 = arith.mulf %52, %53 : vector<16x128xf32>
      %55 = vector.broadcast %28 : vector<1x128xf32> to vector<16x128xf32>
      %56 = arith.addf %54, %55 : vector<16x128xf32>
      %c0_26 = arith.constant 0 : index
      %c0_27 = arith.constant 0 : index
      %57 = vector.load %arg9[%c0_26, %c0_27] : memref<32x16xbf16, #tpu.memory_space<vmem>>, vector<32x16xbf16>
      %58 = arith.truncf %56 : vector<16x128xf32> to vector<16x128xbf16>
      %cst_28 = arith.constant dense<0.000000e+00> : vector<32x128xf32>
      %59 = tpu.matmul %57, %58, %cst_28 {dimension_numbers = #tpu.dot_dimension_numbers<[1], [0], [0], [1], [0, 0, 1, 1], [], []>} : vector<32x16xbf16>, vector<16x128xbf16>, vector<32x128xf32> -> vector<32x128xf32>
      %c0_29 = arith.constant 0 : index
      %c0_30 = arith.constant 0 : index
      %60 = vector.load %arg10[%c0_29, %c0_30] : memref<32x128xf32, #tpu.memory_space<vmem>>, vector<32x128xf32>
      %61 = arith.addf %59, %60 : vector<32x128xf32>
      %c0_31 = arith.constant 0 : index
      %c0_32 = arith.constant 0 : index
      %62 = vector.load %arg11[%c0_31, %c0_32] : memref<32x128xf32, #tpu.memory_space<vmem>>, vector<32x128xf32>
      tpu.vector_store %arg11[%c0_31, %c0_32], %61 {strides = array<i32>} : memref<32x128xf32, #tpu.memory_space<vmem>>, vector<32x128xf32>,
    } else {
    }
    return
  }
  func.func @transform_0(%arg0: i32) -> (i32, i32) {
    %c0_i32 = arith.constant 0 : i32
    %c0_i32_0 = arith.constant 0 : i32
    %c0_i32_1 = arith.constant 0 : i32
    return %c0_i32, %c0_i32_0 : i32, i32
  }
  func.func @transform_1(%arg0: i32) -> (i32, i32) {
    %c0_i32 = arith.constant 0 : i32
    %c0_i32_0 = arith.constant 0 : i32
    %c0_i32_1 = arith.constant 0 : i32
    return %c0_i32, %c0_i32_0 : i32, i32
  }
  func.func @transform_2(%arg0: i32) -> (i32, i32) {
    %c0_i32 = arith.constant 0 : i32
    %c0_i32_0 = arith.constant 0 : i32
    %c0_i32_1 = arith.constant 0 : i32
    return %c0_i32, %c0_i32_0 : i32, i32
  }
  func.func @transform_3(%arg0: i32) -> (i32, i32) {
    %c0_i32 = arith.constant 0 : i32
    %c0_i32_0 = arith.constant 0 : i32
    %c0_i32_1 = arith.constant 0 : i32
    return %c0_i32, %c0_i32_0 : i32, i32
  }
  func.func @transform_4(%arg0: i32) -> (i32, i32) {
    %c0_i32 = arith.constant 0 : i32
    %c0_i32_0 = arith.constant 0 : i32
    %c0_i32_1 = arith.constant 0 : i32
    return %c0_i32, %c0_i32_0 : i32, i32
  }
  func.func @transform_5(%arg0: i32) -> (i32, i32) {
    %c0_i32 = arith.constant 0 : i32
    %c0_i32_0 = arith.constant 0 : i32
    return %c0_i32, %arg0 : i32, i32
  }
  func.func @transform_6(%arg0: i32) -> (i32, i32) {
    %c0_i32 = arith.constant 0 : i32
    %c0_i32_0 = arith.constant 0 : i32
    return %c0_i32, %arg0 : i32, i32
  }
  func.func @transform_7(%arg0: i32) -> (i32, i32) {
    %c0_i32 = arith.constant 0 : i32
    %c0_i32_0 = arith.constant 0 : i32
    return %arg0, %c0_i32 : i32, i32
  }
  func.func @transform_8(%arg0: i32) -> (i32, i32) {
    %c0_i32 = arith.constant 0 : i32
    %c0_i32_0 = arith.constant 0 : i32
    %c0_i32_1 = arith.constant 0 : i32
    return %c0_i32, %c0_i32_0 : i32, i32
  }
  func.func @transform_9(%arg0: i32) -> (i32, i32) {
    %c0_i32 = arith.constant 0 : i32
    %c0_i32_0 = arith.constant 0 : i32
    %c0_i32_1 = arith.constant 0 : i32
    return %c0_i32, %c0_i32_0 : i32, i32
  }
  func.func @transform_10(%arg0: i32) -> (i32, i32) {
    %c0_i32 = arith.constant 0 : i32
    %c0_i32_0 = arith.constant 0 : i32
    %c0_i32_1 = arith.constant 0 : i32
    return %c0_i32, %c0_i32_0 : i32, i32
  }
}

</mosaic_0001>

<bundles_post_ra>
// kernel: tpu_custom_call.1
= control target key start
LH: loop header
LB: loop body
LE: loop exit
PB: predicated region body
PF: predicated region fallthrough
CT: control target
= control target key end

     0   :  { %s7073_s0 = inlined_call_operand.hbm [shape: f32[16,128], index: 0, kind: input, shape index: {}]   ;;  %s7074_s1 = inlined_call_operand.hbm [shape: bf16[128,3072], index: 1, kind: input, shape index: {}]   ;;  %s7075_s2 = inlined_call_operand.vmem [shape: f32[1,3072], index: 2, kind: input, shape index: {}]   ;;  %s7076_s3 = inlined_call_operand.hbm [shape: bf16[1024,128], index: 3, kind: input, shape index: {}]   ;;  %s7077_s4 = inlined_call_operand.hbm [shape: f32[8,128], index: 4, kind: input, shape index: {}]   ;;  %s7078_s5 = inlined_call_operand.hbm [shape: bf16[128,2048], index: 5, kind: input, shape index: {}]   ;;  %s7079_s6 = inlined_call_operand.hbm [shape: f32[1,2048], index: 6, kind: input, shape index: {}]   ;;  %s7080_s7 = inlined_call_operand.hbm [shape: bf16[2048,128], index: 7, kind: input, shape index: {}]   ;;  %s7081_s8 = inlined_call_operand.vmem [shape: bf16[32,16], index: 8, kind: input, shape index: {}]   ;;  %s7082_s9 = inlined_call_operand.vmem [shape: f32[32,128], index: 9, kind: input, shape index: {}]   ;;  %s7083_s10 = inlined_call_operand.hbm [shape: f32[32,128], index: 10, kind: output, shape index: {}]  }
   0x1   :  { %7103 = sst [smem:[#allocation24_spill]] %s7073_s0 }
   0x2   :  { %7104 = sst [smem:[#allocation25_spill]] %s7075_s2 }
   0x3   :  { %7105 = sst [smem:[#allocation26_spill]] %s7078_s5 }
   0x4   :  { %7106 = sst [smem:[#allocation27_spill]] %s7081_s8 }
   0x5   :  { %7107 = sst [smem:[#allocation28_spill]] %s7082_s9 }
   0x6   :  { %7108 = sst [smem:[#allocation29_spill]] %s7083_s10 }
   0x7   :  { %15 = vsyncpa [#allocation5], 0 }
   0x8   :  { %16 = vsyncpa [#allocation8], 0 }
   0x9   :  { %17 = vsyncpa [#allocation11], 0 }
   0xa   :  { %18 = vsyncpa [#allocation6], 0  ;;  %s6178_s13 = smov 0   ;;  %s6180_s14 = smov 0  }
   0xb   :  { %s6182_s15 = smov 0   ;;  %s6184_s16 = smov 0  }
   0xc LB: > { %s6197_s17 = sadd.s32 4294967295, %s6097_s16   ;;  %s6200_s18 = sadd.s32 1, %s6097_s16   ;;  %s6097_s16 = sphi %s6184_s16, %s7144_s16   ;;  %s6093_s15 = sphi %s6182_s15, %s7148_s15   ;;  %s6089_s14 = sphi %s6180_s14, %s7147_s14   ;;  %s6085_s13 = sphi %s6178_s13, %s7146_s13  }
   0xd   : > { %7109 = sst [smem:[#allocation21_spill]] %s6200_s18  ;;  %s133_s19 = ssub.s32 %s6097_s16, %s6200_s18 }
   0xe   : > { %s136_s20 = sadd.s32 1, %s6093_s15  ;;  %p134_p0 = scmp.eq.s32.totalorder %s133_s19, 0 }
   0xf   : > { %p143_p1 = scmp.ne.s32.totalorder %s6093_s15, %s6089_s14  ;;  %p144_p2 = scmp.eq.s32.totalorder %s6097_s16, 0 }
  0x10   : > { %p149_p3 = scmp.ne.s32.totalorder %s6089_s14, %s6085_s13  ;;  %p7084_p5 = scmp.eq.s32.totalorder %s6197_s17, 0 }
  0x11   : > { %s6210_s21 = scalar_select %p134_p0, %s6093_s15, %s136_s20  }
  0x12   : > { %p6212_p4 = por %p144_p2, %p143_p1  ;;  %p4851_p6 = scmp.ge.s32.totalorder %s6097_s16, 1 }
  0x13   : > { %7110 = sst [smem:[#allocation22_spill]] %s6210_s21  ;;  %p275_p7 = scmp.lt.s32.totalorder %s6097_s16, 5 }
  0x14   : > { %p6221_p8 = por %p7084_p5, %p149_p3  ;;  %s6099_s25 = smov [#allocation4]  }
  0x15   : > { %p6226_p10 = pnand %p4851_p6, %p275_p7  ;;  %s287_s26 = sshll.u32 %s6099_s25, 4  ;;  %s288_s26 = int_to_ptr.vmem [resolvable:$true] %s287_s26 }
  0x16   : > { %s7112_s23 = scalar_select %p6221_p8, 1, 0 }
  0x17   : > { %s7114_s24 = scalar_select %p6226_p10, 1, 0 }
  0x18   : > { %7113 = sst [smem:[#allocation23_spill]] %s7112_s23  ;;  %p5511_p11 = pneg %p6226_p10 }
  0x19   : > { %p5538_p13 = scmp.lt.s32.totalorder %s6097_s16, 4  ;;  %s347_s28 = sand.u32 1, %s6097_s16  }
  0x1a   : > { %p6234_p12 = pnand %p5511_p11, %p7084_p5  ;;  %s7117_s0 = sld [smem:[#allocation24_spill]] }
  0x1b   : > { %p6243_p0 = pnand %p5538_p13, %p6212_p4 }
  0x1c   : > { %s7115_s27 = scalar_select %p6234_p12, 1, 0 }
  0x1d   : > { %s7116_s30 = scalar_select %p6243_p0, 1, 0 }
  0x1e   : > { %p6255_p2 = pneg %p6234_p12 }
  0x20   : > { %s5819_s13 = scalar_lea.hbm %s7117_s0, 256 }
  0x21   : > { %p5820_p1 = scmp.ne.s32.totalorder %s7117_s0, %s5819_s13  ;;  %p5826_p6 = scmp.lt.u32.totalorder %s5819_s13, %s7117_s0 }
  0x22   : > { %s7118_s25 = scalar_select %p6255_p2, 1, 0 }
  0x23   : > { %p5822_p3 = pnand %p6255_p2, %p5820_p1 }
  0x25   : > { %p5823_p4 = pneg %p5822_p3 }
  0x27   : > { %p5828_p7 = pnand %p5826_p6, %p5823_p4 }
  0x29   : > { %5831 = shalt.err (!%p5828_p7)
}
  0x2a   : > { %s5832_s11 = scalar_lea.vmem %s288_s26, 256  ;;  %p5840_p5 = scmp.lt.s32.totalorder %s288_s26, %s288_s26 }
  0x2b   : > { %p5833_p11 = scmp.ne.s32.totalorder %s288_s26, %s5832_s11  ;;  %p5841_p8 = scmp.lt.s32.totalorder %s5832_s11, %s5832_s11 }
  0x2d   : > { %p5835_p13 = pnand %p5833_p11, %p6255_p2  ;;  %p5842_p10 = por %p5841_p8, %p5840_p5 }
  0x2f   : > { %p5836_p9 = pneg %p5835_p13 }
  0x31   : > { %p5843_p0 = pnand %p5842_p10, %p5836_p9 }
  0x33   : > { %5846 = shalt.err (!%p5843_p0)
}
  0x34   : > { %s6100_s12 = smov 128   ;;  %s6101_s29 = smov 8  }
  0x35   : > { %5514 = dma.hbm_to_vmem [thread:$0]  (!%p6234_p12), %s7117_s0, 256, %s288_s26, [#allocation5], %s6100_s12, %s6100_s12, %s6101_s29  }
  0x36   : > { %s7119_s20 = sand.u32 1, %s6093_s15   ;;  %s5213_s21 = sshll.u32 %s6097_s16, 8 }
  0x37   : > { %s6273_s22 = sshll.u32 %s7119_s20, 8  ;;  %s7120_s5 = sld [smem:[#allocation26_spill]] }
  0x38   : > { %s351_s9 = scalar_lea.vmem [#allocation12], %s6273_s22  ;;  %s6284_s13 = scalar_lea.sflag [#allocation5], %s347_s28 }
  0x39   : > { %s358_s8 = sshll.u32 %s351_s9, 4  ;;  %p7121_p8 = scmp.ne.s32.totalorder %s7116_s30, 0  ;;  %s6282_s8 = int_to_ptr.vmem [resolvable:$true] %s358_s8 }
  0x3b   : > { %p6290_p9 = pneg %p7121_p8 }
  0x3d   : > { %s6279_s10 = scalar_lea.hbm %s7120_s5, %s5213_s21  ;;  %s5852_s29 = scalar_lea.hbm %s7120_s5, 16384 }
  0x3e   : > { %s5847_s26 = scalar_lea.hbm %s6279_s10, 4096  ;;  %p5853_p1 = scmp.lt.u32.totalorder %s6279_s10, %s7120_s5 }
  0x3f   : > { %p5848_p5 = scmp.ne.s32.totalorder %s6279_s10, %s5847_s26  ;;  %p5854_p3 = scmp.lt.u32.totalorder %s5852_s29, %s5847_s26 }
  0x40   : > { %s7122_s12 = scalar_select %p6290_p9, 1, 0 }
  0x41   : > { %p5850_p10 = pnand %p6290_p9, %p5848_p5  ;;  %p5855_p4 = por %p5854_p3, %p5853_p1 }
  0x42   : > { %p5856_p6 = scmp.lt.u32.totalorder %s5847_s26, %s6279_s10 }
  0x43   : > { %p5851_p0 = pneg %p5850_p10 }
  0x44   : > { %p5857_p7 = por %p5856_p6, %p5855_p4 }
  0x46   : > { %p5858_p11 = pnand %p5857_p7, %p5851_p0 }
  0x48   : > { %5861 = shalt.err (!%p5858_p11)
}
  0x49   : > { %s5862_s28 = scalar_lea.vmem %s6282_s8, 4096  ;;  %s6102_s20 = smov [#allocation12]  }
  0x4a   : > { %p5863_p13 = scmp.ne.s32.totalorder %s6282_s8, %s5862_s28  ;;  %s5867_s11 = sshll.u32 %s6102_s20, 4  ;;  %s5868_s11 = int_to_ptr.vmem [resolvable:$false] %s5867_s11 }
  0x4b   : > { %s5869_s18 = scalar_lea.vmem %s5868_s11, 8192  ;;  %p5870_p12 = scmp.lt.s32.totalorder %s6282_s8, %s5868_s11 }
  0x4c   : > { %p5865_p5 = pnand %p5863_p13, %p6290_p9  ;;  %p5871_p2 = scmp.lt.s32.totalorder %s5869_s18, %s5862_s28 }
  0x4e   : > { %p5866_p10 = pneg %p5865_p5  ;;  %p5872_p1 = por %p5871_p2, %p5870_p12 }
  0x50   : > { %p5873_p3 = pnand %p5872_p1, %p5866_p10 }
  0x52   : > { %5876 = shalt.err (!%p5873_p3)
}
  0x53   : > { %s6103_s26 = smov 1024   ;;  %s6104_s21 = smov 256  }
  0x54   : > { %s6105_s29 = smov 16   ;;  %s6106_s9 = smov [#allocation7]  }
  0x55   : > { %5527 = dma.hbm_to_vmem [thread:$0]  (!%p7121_p8), %s6279_s10, 4096, %s6282_s8, %s6284_s13, %s6103_s26, %s6104_s21, %s6105_s29  }
  0x56   : > { %s300_s19 = sshll.u32 %s6106_s9, 4  ;;  %s5877_s28 = scalar_lea.hbm %s7074_s1, 24576  ;;  %s301_s19 = int_to_ptr.vmem [resolvable:$true] %s300_s19 }
  0x57   : > { %p5878_p12 = scmp.ne.s32.totalorder %s7074_s1, %s5877_s28  ;;  %p7123_p2 = scmp.ne.s32.totalorder %s7118_s25, 0 }
  0x58   : > { %p5884_p6 = scmp.lt.u32.totalorder %s5877_s28, %s7074_s1 }
  0x59   : > { %p5880_p0 = pnand %p5878_p12, %p7123_p2 }
  0x5b   : > { %p5881_p4 = pneg %p5880_p0 }
  0x5d   : > { %p5886_p7 = pnand %p5884_p6, %p5881_p4 }
  0x5f   : > { %5889 = shalt.err (!%p5886_p7)
}
  0x60   : > { %s5890_s8 = scalar_lea.vmem %s301_s19, 24576  ;;  %p5898_p10 = scmp.lt.s32.totalorder %s301_s19, %s301_s19 }
  0x61   : > { %p5891_p11 = scmp.ne.s32.totalorder %s301_s19, %s5890_s8  ;;  %p5899_p1 = scmp.lt.s32.totalorder %s5890_s8, %s5890_s8 }
  0x63   : > { %p5893_p13 = pnand %p5891_p11, %p7123_p2  ;;  %p5900_p3 = por %p5899_p1, %p5898_p10 }
  0x65   : > { %p5894_p5 = pneg %p5893_p13 }
  0x67   : > { %p5901_p8 = pnand %p5900_p3, %p5894_p5 }
  0x69   : > { %5904 = shalt.err (!%p5901_p8)
}
  0x6a   : > { %s6107_s0 = smov 1536   ;;  %s6108_s2 = smov 96  }
  0x6b   : > { %p7124_p12 = scmp.ne.s32.totalorder %s7115_s27, 0  ;;  %s7125_s26 = sand.u32 1, %s6093_s15  }
  0x6c   : > { %s4860_s21 = sshll.u32 %s7125_s26, 2  ;;  %s5214_s29 = sshll.u32 %s6097_s16, 6 }
  0x6d   : > { %5517 = dma.hbm_to_vmem [thread:$0]  (!%p7124_p12), %s7074_s1, 24576, %s301_s19, [#allocation8], %s6107_s0, %s6107_s0, %s6108_s2  }
  0x6e   : > { %s6338_s28 = scalar_lea.hbm %s7079_s6, %s5214_s29  ;;  %s372_s11 = scalar_lea.vmem [#allocation13], %s4860_s21 }
  0x6f   : > { %s380_s18 = sshll.u32 %s372_s11, 4  ;;  %s6109_s8 = smov [#allocation9]   ;;  %s6340_s18 = int_to_ptr.vmem [resolvable:$true] %s380_s18 }
  0x70   : > { %s316_s23 = sshll.u32 %s6109_s8, 4  ;;  %s5905_s5 = scalar_lea.hbm %s6338_s28, 64  ;;  %s317_s23 = int_to_ptr.vmem [resolvable:$true] %s316_s23 }
  0x71   : > { %p5906_p8 = scmp.ne.s32.totalorder %s6338_s28, %s5905_s5  ;;  %s5910_s2 = scalar_lea.hbm %s7079_s6, 256 }
  0x72   : > { %p5911_p6 = scmp.lt.u32.totalorder %s6338_s28, %s7079_s6  ;;  %p5912_p7 = scmp.lt.u32.totalorder %s5910_s2, %s5905_s5 }
  0x73   : > { %p5908_p0 = pnand %p5906_p8, %p6290_p9  ;;  %p5914_p13 = scmp.lt.u32.totalorder %s5905_s5, %s6338_s28 }
  0x74   : > { %p5913_p11 = por %p5912_p7, %p5911_p6 }
  0x75   : > { %p5909_p4 = pneg %p5908_p0 }
  0x76   : > { %p5915_p5 = por %p5914_p13, %p5913_p11 }
  0x78   : > { %p5916_p10 = pnand %p5915_p5, %p5909_p4 }
  0x7a   : > { %5919 = shalt.err (!%p5916_p10)
}
  0x7b   : > { %s5920_s21 = scalar_lea.vmem %s6340_s18, 64  ;;  %s6110_s29 = smov [#allocation13]  }
  0x7c   : > { %p5921_p1 = scmp.ne.s32.totalorder %s6340_s18, %s5920_s21  ;;  %s5925_s9 = sshll.u32 %s6110_s29, 4  ;;  %s5926_s9 = int_to_ptr.vmem [resolvable:$false] %s5925_s9 }
  0x7d   : > { %s5927_s20 = scalar_lea.vmem %s5926_s9, 128  ;;  %p5928_p0 = scmp.lt.s32.totalorder %s6340_s18, %s5926_s9 }
  0x7e   : > { %p5923_p3 = pnand %p5921_p1, %p6290_p9  ;;  %p5929_p12 = scmp.lt.s32.totalorder %s5927_s20, %s5920_s21 }
  0x80   : > { %p5924_p8 = pneg %p5923_p3  ;;  %p5930_p6 = por %p5929_p12, %p5928_p0 }
  0x82   : > { %p5931_p7 = pnand %p5930_p6, %p5924_p8 }
  0x84   : > { %5934 = shalt.err (!%p5931_p7)
}
  0x85   : > { %p7126_p4 = scmp.ne.s32.totalorder %s7116_s30, 0  ;;  %s5935_s5 = scalar_lea.hbm %s7076_s3, 8192 }
  0x86   : > { %p5936_p11 = scmp.ne.s32.totalorder %s7076_s3, %s5935_s5  ;;  %p5942_p5 = scmp.lt.u32.totalorder %s5935_s5, %s7076_s3 }
  0x87   : > { %5530 = dma.hbm_to_vmem [thread:$0]  (!%p7126_p4), %s6338_s28, 64, %s6340_s18, %s6284_s13  }
  0x88   : > { %p5938_p12 = pnand %p5936_p11, %p7123_p2 }
  0x8a   : > { %p5939_p13 = pneg %p5938_p12 }
  0x8c   : > { %p5944_p10 = pnand %p5942_p5, %p5939_p13 }
  0x8e   : > { %5947 = shalt.err (!%p5944_p10)
}
  0x8f   : > { %s5948_s26 = scalar_lea.vmem %s317_s23, 8192  ;;  %p5956_p0 = scmp.lt.s32.totalorder %s317_s23, %s317_s23 }
  0x90   : > { %p5949_p1 = scmp.ne.s32.totalorder %s317_s23, %s5948_s26  ;;  %p5957_p6 = scmp.lt.s32.totalorder %s5948_s26, %s5948_s26 }
  0x92   : > { %p5951_p3 = pnand %p5949_p1, %p7123_p2  ;;  %p5958_p7 = por %p5957_p6, %p5956_p0 }
  0x94   : > { %p5952_p8 = pneg %p5951_p3 }
  0x96   : > { %p5959_p4 = pnand %p5958_p7, %p5952_p8 }
  0x98   : > { %5962 = shalt.err (!%p5959_p4)
}
  0x99   : > { %s6111_s28 = smov 64   ;;  %s6112_s18 = smov 4  }
  0x9a   : > { %p7127_p11 = scmp.ne.s32.totalorder %s7115_s27, 0  ;;  %s6113_s9 = smov [#allocation10]  }
  0x9b   : > { %s330_s20 = sshll.u32 %s6113_s9, 4  ;;  %s5215_s11 = sshll.u32 %s6097_s16, 12  ;;  %s331_s20 = int_to_ptr.vmem [resolvable:$true] %s330_s20 }
  0x9c   : > { %5520 = dma.hbm_to_vmem [thread:$0]  (!%p7127_p11), %s7076_s3, 8192, %s317_s23, [#allocation8], %s6111_s28, %s6111_s28, %s6112_s18  }
  0x9d   : > { %s5963_s19 = scalar_lea.hbm %s7077_s4, 128 }
  0x9e   : > { %p5964_p4 = scmp.ne.s32.totalorder %s7077_s4, %s5963_s19  ;;  %p5970_p5 = scmp.lt.u32.totalorder %s5963_s19, %s7077_s4 }
  0xa0   : > { %p5966_p12 = pnand %p5964_p4, %p7123_p2 }
  0xa2   : > { %p5967_p13 = pneg %p5966_p12 }
  0xa4   : > { %p5972_p10 = pnand %p5970_p5, %p5967_p13 }
  0xa6   : > { %5975 = shalt.err (!%p5972_p10)
}
  0xa7   : > { %s5976_s23 = scalar_lea.vmem %s331_s20, 128  ;;  %p5984_p0 = scmp.lt.s32.totalorder %s331_s20, %s331_s20 }
  0xa8   : > { %p5977_p1 = scmp.ne.s32.totalorder %s331_s20, %s5976_s23  ;;  %p5985_p6 = scmp.lt.s32.totalorder %s5976_s23, %s5976_s23 }
  0xaa   : > { %p5979_p3 = pnand %p5977_p1, %p7123_p2  ;;  %p5986_p7 = por %p5985_p6, %p5984_p0 }
  0xac   : > { %p5980_p8 = pneg %p5979_p3 }
  0xae   : > { %p5987_p9 = pnand %p5986_p7, %p5980_p8 }
  0xb0   : > { %5990 = shalt.err (!%p5987_p9)
}
  0xb1   : > { %5523 = dma.hbm_to_vmem [thread:$0]  (!%p7127_p11), %s7077_s4, 128, %s331_s20, [#allocation11]  }
  0xb2   : > { %s6407_s8 = scalar_lea.hbm %s7080_s7, %s5215_s11  ;;  %s391_s25 = scalar_lea.vmem [#allocation14], %s6273_s22 }
  0xb3   : > { %s398_s5 = sshll.u32 %s391_s25, 4  ;;  %s5991_s27 = scalar_lea.hbm %s6407_s8, 4096  ;;  %s6410_s5 = int_to_ptr.vmem [resolvable:$true] %s398_s5 }
  0xb4   : > { %p5992_p9 = scmp.ne.s32.totalorder %s6407_s8, %s5991_s27  ;;  %p7128_p2 = scmp.ne.s32.totalorder %s7122_s12, 0 }
  0xb5   : > { %s5996_s0 = scalar_lea.hbm %s7080_s7, 16384  ;;  %p5997_p11 = scmp.lt.u32.totalorder %s6407_s8, %s7080_s7 }
  0xb6   : > { %p5994_p4 = pnand %p5992_p9, %p7128_p2  ;;  %p5998_p13 = scmp.lt.u32.totalorder %s5996_s0, %s5991_s27 }
  0xb7   : > { %p6000_p10 = scmp.lt.u32.totalorder %s5991_s27, %s6407_s8 }
  0xb8   : > { %p5995_p12 = pneg %p5994_p4  ;;  %p5999_p5 = por %p5998_p13, %p5997_p11 }
  0xba   : > { %p6001_p1 = por %p6000_p10, %p5999_p5 }
  0xbc   : > { %p6002_p3 = pnand %p6001_p1, %p5995_p12 }
  0xbe   : > { %6005 = shalt.err (!%p6002_p3)
}
  0xbf   : > { %s6006_s22 = scalar_lea.vmem %s6410_s5, 4096  ;;  %s6114_s10 = smov [#allocation14]  }
  0xc0   : > { %p6007_p8 = scmp.ne.s32.totalorder %s6410_s5, %s6006_s22  ;;  %s6011_s26 = sshll.u32 %s6114_s10, 4  ;;  %s6012_s26 = int_to_ptr.vmem [resolvable:$false] %s6011_s26 }
  0xc1   : > { %s6013_s23 = scalar_lea.vmem %s6012_s26, 8192  ;;  %p6014_p7 = scmp.lt.s32.totalorder %s6410_s5, %s6012_s26 }
  0xc2   : > { %p6009_p0 = pnand %p6007_p8, %p7128_p2  ;;  %p6015_p9 = scmp.lt.s32.totalorder %s6013_s23, %s6006_s22 }
  0xc4   : > { %p6010_p6 = pneg %p6009_p0  ;;  %p6016_p4 = por %p6015_p9, %p6014_p7 }
  0xc6   : > { %p6017_p11 = pnand %p6016_p4, %p6010_p6 }
  0xc8   : > { %6020 = shalt.err (!%p6017_p11)
}
  0xc9   : > { %p7129_p12 = scmp.ne.s32.totalorder %s7116_s30, 0  ;;  %p7130_p2 = scmp.ne.s32.totalorder %s7114_s24, 0 }
  0xca   : > { %p7131_p13 = scmp.eq.s32.totalorder (!%p7130_p2), %s6197_s17, 0 }
  0xcb   : > { %5533 = dma.hbm_to_vmem [thread:$0]  (!%p7129_p12), %s6407_s8, 4096, %s6410_s5, %s6284_s13, %s6111_s28, %s6111_s28, %s6112_s18  }
  0xcc   : > { %410 = sbr.rel (%p7130_p2) target bundleno = 2955 (0xb8b), region = 60 }
  0xd3   : > { %6064 = dma.done.wait (%p7131_p13), [#allocation5], 256   ;;  %p7132_p5 = pmov %p7131_p13 }
  0xd5   : > { %6066 = vsyncadd (%p7132_p5), [#allocation5], 4294967040  ;;  %p7133_p10 = pmov %p7132_p5 }
  0xd6   : > { %p7134_p1 = pmov %p7132_p5 }
  0xd7   : > { %6068 = dma.done.wait (%p7133_p10), [#allocation8], 32768  }
  0xd8   : > { %6070 = vsyncadd (%p7134_p1), [#allocation8], 4294934528  ;;  %p7135_p3 = pmov %p7134_p1 }
  0xd9   : > { %p7136_p8 = pmov %p7134_p1 }
  0xda   : > { %6072 = dma.done.wait (%p7135_p3), [#allocation11], 128  }
  0xdb   : > { %6074 = vsyncadd (%p7136_p8), [#allocation11], 4294967168  ;;  %s7137_s24 = sld [smem:[#allocation23_spill]]  ;;  %s428_s30 = sand.u32 1, %s6197_s17  }
  0xdc   : > { %s430_s13 = sand.u32 1, %s6089_s14   ;;  %s429_s28 = scalar_lea.sflag [#allocation5], %s428_s30 }
  0xdd   : > { %s4871_s12 = sshll.u32 %s430_s13, 8 }
  0xde   : > { %s6453_s18 = scalar_lea.vmem [#allocation12], %s4871_s12 }
  0xe1   : > { %p7138_p0 = scmp.ne.s32.totalorder %s7137_s24, 0 }
  0xe3   : > { %6076 = dma.done.wait (%p7138_p0), %s429_s28, 8256  }
  0xe4   : > { %6078 = vsyncadd (%p7138_p0), %s429_s28, 4294959040  ;;  %s6459_s16 = sshll.u32 %s430_s13, 2  ;;  %v496_v0 = vlaneseq  ;;  %v6115_v2 = vmov 0.0   ;;  %s6465_s29 = scalar_lea.vmem [#allocation14], %s4871_s12 }
  0xe5   : > { %s441_s21 = scalar_lea.vmem [#allocation13], %s6459_s16  ;;  %p7139_p6 = scmp.ne.s32.totalorder %s6197_s17, 0 }
  0xe6   : > { %v497_v1 = vand.u32 127, %v496_v0  ;;  %v509_v4 = vld [vmem:[#allocation7] sm:$0xff] (!%p7139_p6)  ;;  %v6116_v10 = vmov (!%p7139_p6), 0   ;;  %v510_v14 = vld [vmem:[#allocation7 + $0x8] sm:$0xff] (!%p7139_p6)  ;;  %vm6118_vm1 = vmmov (!%p7139_p6), 0   ;;  %s7140_s25 = sld [smem:[#allocation25_spill]] (!%p7139_p6) }
  0xe7   : > { %504 = sbr.rel (%p7139_p6) target bundleno = 1895 (0x767), region = 92  ;;  %v521_v5 = vld [vmem:[#allocation7 + $0x60] sm:$0xff] (!%p7139_p6)  ;;  %1819 = vmatprep.mubr.bf16.mxu0 (!%p7139_p6), %v6116_v10  ;;  %1862 = vmatprep.mubr.bf16.mxu1 (!%p7139_p6), %v6116_v10  ;;  %v522_v15 = vld [vmem:[#allocation7 + $0x68] sm:$0xff] (!%p7139_p6)  ;;  %vm2347_vm2 = vcmask (!%p7139_p6), 130048  }
  0xe8   : > { %vm498_vm0 = vcmp.lt.s32.totalorder %v497_v1, 16  ;;  %v533_v6 = vld [vmem:[#allocation7 + $0xc0] sm:$0xff] (!%p7139_p6)  ;;  %v4877_v7 = vcombine.high (!%p7139_p6), %v509_v4, %v521_v5  ;;  %v4876_v8 = vcombine.low (!%p7139_p6), %v509_v4, %v521_v5  ;;  %v4879_v17 = vcombine.high (!%p7139_p6), %v510_v14, %v522_v15  ;;  %v534_v19 = vld [vmem:[#allocation7 + $0xc8] sm:$0xff] (!%p7139_p6)  ;;  %v523_v4 = vld [vmem:[#allocation7 + $0x70] sm:$0xff] (!%p7139_p6) }
  0xe9   : > { %v6462_v3 = vsel %vm498_vm0, 1.0, %v6115_v2  ;;  %v545_v9 = vld [vmem:[#allocation7 + $0x120] sm:$0xff] (!%p7139_p6)  ;;  %v4878_v18 = vcombine.low (!%p7139_p6), %v510_v14, %v522_v15  ;;  %v546_v20 = vld [vmem:[#allocation7 + $0x128] sm:$0xff] (!%p7139_p6)  ;;  %v511_v2 = vld [vmem:[#allocation7 + $0x10] sm:$0xff] (!%p7139_p6) }
  0xea   : > { %v4901_v11 = vcombine.high (!%p7139_p6), %v533_v6, %v545_v9  ;;  %v557_v12 = vld [vmem:[#allocation7 + $0x180] sm:$0xff] (!%p7139_p6)  ;;  %1787 = vmatprep.subr.bf16.mxu0 (!%p7139_p6), %v4877_v7  ;;  %v4900_v16 = vcombine.low (!%p7139_p6), %v533_v6, %v545_v9  ;;  %v4903_v22 = vcombine.high (!%p7139_p6), %v534_v19, %v546_v20  ;;  %v558_v23 = vld [vmem:[#allocation7 + $0x188] sm:$0xff] (!%p7139_p6)  ;;  %1830 = vmatprep.subr.bf16.mxu1 (!%p7139_p6), %v4879_v17  ;;  %v505_v7 = vld [vmem:[#allocation4] sm:$0xff] (!%p7139_p6) }
  0xeb   : > { %v569_v13 = vld [vmem:[#allocation7 + $0x1e0] sm:$0xff] (!%p7139_p6)  ;;  %1788 = vmatpush1.bf16.msra.mxu0 (!%p7139_p6), %v4876_v8  ;;  %v570_v24 = vld [vmem:[#allocation7 + $0x1e8] sm:$0xff] (!%p7139_p6)  ;;  %1831 = vmatpush1.bf16.msra.mxu1 (!%p7139_p6), %v4878_v18  ;;  %v4902_v27 = vcombine.low (!%p7139_p6), %v534_v19, %v546_v20  ;;  %v506_v8 = vld [vmem:[#allocation4 + $0x8] sm:$0xff] (!%p7139_p6)  ;;  %v4880_v18 = vcombine.low (!%p7139_p6), %v511_v2, %v523_v4 }
  0xec   : > { %1789 = vmatprep.subr.bf16.mxu0 (!%p7139_p6), %v4901_v11  ;;  %v4925_v21 = vcombine.high (!%p7139_p6), %v557_v12, %v569_v13  ;;  %v581_v25 = vld [vmem:[#allocation7 + $0x240] sm:$0xff] (!%p7139_p6)  ;;  %v4924_v28 = vcombine.low (!%p7139_p6), %v557_v12, %v569_v13  ;;  %1832 = vmatprep.subr.bf16.mxu1 (!%p7139_p6), %v4903_v22  ;;  %v4927_v29 = vcombine.high (!%p7139_p6), %v558_v23, %v570_v24  ;;  %v582_v31 = vld [vmem:[#allocation7 + $0x248] sm:$0xff] (!%p7139_p6)  ;;  %v512_v12 = vld [vmem:[#allocation7 + $0x18] sm:$0xff] (!%p7139_p6) }
  0xed   : > { %v593_v26 = vld [vmem:[#allocation7 + $0x2a0] sm:$0xff] (!%p7139_p6)  ;;  %v594_v32 = vld [vmem:[#allocation7 + $0x2a8] sm:$0xff] (!%p7139_p6)  ;;  %v4926_v35 = vcombine.low (!%p7139_p6), %v558_v23, %v570_v24  ;;  %v4881_v11 = vcombine.high (!%p7139_p6), %v511_v2, %v523_v4  ;;  %v524_v13 = vld [vmem:[#allocation7 + $0x78] sm:$0xff] (!%p7139_p6) }
  0xee   : > { %v4949_v30 = vcombine.high %v581_v25, %v593_v26  ;;  %v605_v33 = vld [vmem:[#allocation7 + $0x300] sm:$0xff]  ;;  %v4948_v36 = vcombine.low %v581_v25, %v593_v26  ;;  %v4951_v37 = vcombine.high %v582_v31, %v594_v32  ;;  %v606_v39 = vld [vmem:[#allocation7 + $0x308] sm:$0xff]  ;;  %v4950_v43 = vcombine.low %v582_v31, %v594_v32  ;;  %v535_v14 = vld [vmem:[#allocation7 + $0xd0] sm:$0xff] }
  0xef   : > { %1790 = vmatpush1.bf16.msra.mxu0 %v4900_v16  ;;  %v617_v34 = vld [vmem:[#allocation7 + $0x360] sm:$0xff]  ;;  %1833 = vmatpush1.bf16.msra.mxu1 %v4902_v27  ;;  %v618_v40 = vld [vmem:[#allocation7 + $0x368] sm:$0xff]  ;;  %v547_v15 = vld [vmem:[#allocation7 + $0x130] sm:$0xff]  ;;  %v6471_v16 = vpack.c.bf16 %v506_v8, %v505_v7  ;;  %v4883_v19 = vcombine.high %v512_v12, %v524_v13  ;;  %v4882_v25 = vcombine.low %v512_v12, %v524_v13 }
  0xf0   : > { %1791 = vmatprep.subr.bf16.mxu0 %v4925_v21  ;;  %1834 = vmatprep.subr.bf16.mxu1 %v4927_v29  ;;  %v4973_v38 = vcombine.high %v605_v33, %v617_v34  ;;  %v629_v41 = vld [vmem:[#allocation7 + $0x3c0] sm:$0xff]  ;;  %v4972_v44 = vcombine.low %v605_v33, %v617_v34  ;;  %v4975_v45 = vcombine.high %v606_v39, %v618_v40  ;;  %v630_v47 = vld [vmem:[#allocation7 + $0x3c8] sm:$0xff]  ;;  %v536_v21 = vld [vmem:[#allocation7 + $0xd8] sm:$0xff] }
  0xf1   : > { %v641_v42 = vld [vmem:[#allocation7 + $0x420] sm:$0xff]  ;;  %v642_v48 = vld [vmem:[#allocation7 + $0x428] sm:$0xff]  ;;  %v4974_v51 = vcombine.low %v606_v39, %v618_v40  ;;  %v4905_v20 = vcombine.high %v535_v14, %v547_v15  ;;  %v548_v22 = vld [vmem:[#allocation7 + $0x138] sm:$0xff]  ;;  %v4904_v26 = vcombine.low %v535_v14, %v547_v15 }
  0xf2   : > { %v4997_v46 = vcombine.high %v629_v41, %v641_v42  ;;  %v653_v49 = vld [vmem:[#allocation7 + $0x480] sm:$0xff]  ;;  %v4996_v52 = vcombine.low %v629_v41, %v641_v42  ;;  %v4999_v53 = vcombine.high %v630_v47, %v642_v48  ;;  %v654_v55 = vld [vmem:[#allocation7 + $0x488] sm:$0xff]  ;;  %v4998_v59 = vcombine.low %v630_v47, %v642_v48  ;;  %v559_v23 = vld [vmem:[#allocation7 + $0x190] sm:$0xff] }
  0xf3   : > { %1792 = vmatpush1.bf16.msra.mxu0 %v4924_v28  ;;  %1835 = vmatpush1.bf16.msra.mxu1 %v4926_v35  ;;  %v665_v50 = vld [vmem:[#allocation7 + $0x4e0] sm:$0xff]  ;;  %v666_v56 = vld [vmem:[#allocation7 + $0x4e8] sm:$0xff]  ;;  %v571_v24 = vld [vmem:[#allocation7 + $0x1f0] sm:$0xff]  ;;  %v4907_v27 = vcombine.high %v536_v21, %v548_v22  ;;  %v4906_v33 = vcombine.low %v536_v21, %v548_v22 }
  0xf4   : > { %1793 = vmatprep.subr.bf16.mxu0 %v4949_v30  ;;  %1836 = vmatprep.subr.bf16.mxu1 %v4951_v37  ;;  %v5021_v54 = vcombine.high %v653_v49, %v665_v50  ;;  %v677_v57 = vld [vmem:[#allocation7 + $0x540] sm:$0xff]  ;;  %v5020_v60 = vcombine.low %v653_v49, %v665_v50  ;;  %v5023_v61 = vcombine.high %v654_v55, %v666_v56  ;;  %v678_v63 = vld [vmem:[#allocation7 + $0x548] sm:$0xff]  ;;  %v560_v29 = vld [vmem:[#allocation7 + $0x198] sm:$0xff] }
  0xf5   : > { %v689_v58 = vld [vmem:[#allocation7 + $0x5a0] sm:$0xff]  ;;  %v690_v1 = vld [vmem:[#allocation7 + $0x5a8] sm:$0xff]  ;;  %v5022_v5 = vcombine.low %v654_v55, %v666_v56  ;;  %v4929_v28 = vcombine.high %v559_v23, %v571_v24  ;;  %v572_v30 = vld [vmem:[#allocation7 + $0x1f8] sm:$0xff]  ;;  %v4928_v34 = vcombine.low %v559_v23, %v571_v24 }
  0xf6   : > { %v5045_v62 = vcombine.high %v677_v57, %v689_v58  ;;  %v5044_v6 = vcombine.low %v677_v57, %v689_v58  ;;  %v5047_v9 = vcombine.high %v678_v63, %v690_v1  ;;  %v5046_v17 = vcombine.low %v678_v63, %v690_v1  ;;  %v583_v31 = vld [vmem:[#allocation7 + $0x250] sm:$0xff]  ;;  %v584_v37 = vld [vmem:[#allocation7 + $0x258] sm:$0xff]  ;;  %v513_v7 = vld [vmem:[#allocation7 + $0x20] sm:$0xff] }
  0xf7   : > { %1794 = vmatpush1.bf16.msra.mxu0 %v4948_v36  ;;  %1837 = vmatpush1.bf16.msra.mxu1 %v4950_v43  ;;  %v595_v32 = vld [vmem:[#allocation7 + $0x2b0] sm:$0xff]  ;;  %v4931_v35 = vcombine.high %v560_v29, %v572_v30  ;;  %v4930_v41 = vcombine.low %v560_v29, %v572_v30  ;;  %v608_v42 = vld [vmem:[#allocation7 + $0x318] sm:$0xff]  ;;  %v525_v8 = vld [vmem:[#allocation7 + $0x80] sm:$0xff] }
  0xf8   : > { %1795 = vmatprep.subr.bf16.mxu0 %v4973_v38  ;;  %1838 = vmatprep.subr.bf16.mxu1 %v4975_v45  ;;  %v4953_v36 = vcombine.high %v583_v31, %v595_v32  ;;  %v596_v38 = vld [vmem:[#allocation7 + $0x2b8] sm:$0xff]  ;;  %v607_v39 = vld [vmem:[#allocation7 + $0x310] sm:$0xff]  ;;  %v4952_v43 = vcombine.low %v583_v31, %v595_v32  ;;  %v514_v13 = vld [vmem:[#allocation7 + $0x28] sm:$0xff]  ;;  %v4884_v24 = vcombine.low %v513_v7, %v525_v8 }
  0xf9   : > { %v619_v40 = vld [vmem:[#allocation7 + $0x370] sm:$0xff]  ;;  %v620_v47 = vld [vmem:[#allocation7 + $0x378] sm:$0xff]  ;;  %v4954_v49 = vcombine.low %v584_v37, %v596_v38  ;;  %v526_v14 = vld [vmem:[#allocation7 + $0x88] sm:$0xff] }
  0xfa   : > { %v643_v45 = vld [vmem:[#allocation7 + $0x430] sm:$0xff]  ;;  %v4977_v48 = vcombine.high %v607_v39, %v619_v40  ;;  %v632_v50 = vld [vmem:[#allocation7 + $0x3d8] sm:$0xff]  ;;  %v4979_v55 = vcombine.high %v608_v42, %v620_v47  ;;  %v4978_v57 = vcombine.low %v608_v42, %v620_v47  ;;  %v538_v22 = vld [vmem:[#allocation7 + $0xe8] sm:$0xff]  ;;  %v4886_v29 = vcombine.low %v514_v13, %v526_v14 }
  0xfb   : > { %1796 = vmatpush1.bf16.msra.mxu0 %v4972_v44  ;;  %1839 = vmatpush1.bf16.msra.mxu1 %v4974_v51  ;;  %v631_v44 = vld [vmem:[#allocation7 + $0x3d0] sm:$0xff]  ;;  %v644_v51 = vld [vmem:[#allocation7 + $0x438] sm:$0xff]  ;;  %v550_v23 = vld [vmem:[#allocation7 + $0x148] sm:$0xff] }
  0xfc   : > { %1797 = vmatprep.subr.bf16.mxu0 %v4997_v46  ;;  %1840 = vmatprep.subr.bf16.mxu1 %v4999_v53  ;;  %v4955_v46 = vcombine.high %v584_v37, %v596_v38  ;;  %v655_v53 = vld [vmem:[#allocation7 + $0x490] sm:$0xff]  ;;  %v5001_v56 = vcombine.high %v631_v44, %v643_v45  ;;  %v656_v58 = vld [vmem:[#allocation7 + $0x498] sm:$0xff]  ;;  %v5003_v63 = vcombine.high %v632_v50, %v644_v51  ;;  %v562_v30 = vld [vmem:[#allocation7 + $0x1a8] sm:$0xff] }
  0xfd   : > { %v5002_v2 = vcombine.low %v632_v50, %v644_v51  ;;  %v680_v4 = vld [vmem:[#allocation7 + $0x558] sm:$0xff]  ;;  %v574_v31 = vld [vmem:[#allocation7 + $0x208] sm:$0xff]  ;;  %v4910_v37 = vcombine.low %v538_v22, %v550_v23  ;;  %v621_v42 = vld [vmem:[#allocation7 + $0x380] sm:$0xff] }
  0xfe   : > { %v586_v38 = vld [vmem:[#allocation7 + $0x268] sm:$0xff]  ;;  %v645_v50 = vld [vmem:[#allocation7 + $0x440] sm:$0xff] }
  0xff   : > { %1798 = vmatpush1.bf16.msra.mxu0 %v4996_v52  ;;  %1841 = vmatpush1.bf16.msra.mxu1 %v4998_v59  ;;  %v4976_v52 = vcombine.low %v607_v39, %v619_v40  ;;  %v668_v59 = vld [vmem:[#allocation7 + $0x4f8] sm:$0xff]  ;;  %v598_v39 = vld [vmem:[#allocation7 + $0x2c8] sm:$0xff] }
 0x100   : > { %1799 = vmatprep.subr.bf16.mxu0 %v5021_v54  ;;  %1842 = vmatprep.subr.bf16.mxu1 %v5023_v61  ;;  %v667_v54 = vld [vmem:[#allocation7 + $0x4f0] sm:$0xff]  ;;  %v5026_v12 = vcombine.low %v656_v58, %v668_v59  ;;  %v622_v47 = vld [vmem:[#allocation7 + $0x388] sm:$0xff]  ;;  %v4959_v51 = vcombine.high %v586_v38, %v598_v39 }
 0x101   : > { %v679_v61 = vld [vmem:[#allocation7 + $0x550] sm:$0xff]  ;;  %v5025_v1 = vcombine.high %v655_v53, %v667_v54 }
 0x103   : > { %1800 = vmatpush1.bf16.msra.mxu0 %v5020_v60  ;;  %1843 = vmatpush1.bf16.msra.mxu1 %v5022_v5  ;;  %v5000_v60 = vcombine.low %v631_v44, %v643_v45  ;;  %v692_v5 = vld [vmem:[#allocation7 + $0x5b8] sm:$0xff]  ;;  %v4934_v45 = vcombine.low %v562_v30, %v574_v31 }
 0x104   : > { %1801 = vmatprep.subr.bf16.mxu0 %v5045_v62  ;;  %1844 = vmatprep.subr.bf16.mxu1 %v5047_v9  ;;  %v691_v62 = vld [vmem:[#allocation7 + $0x5b0] sm:$0xff]  ;;  %v5027_v9 = vcombine.high %v656_v58, %v668_v59  ;;  %v5050_v21 = vcombine.low %v680_v4, %v692_v5  ;;  %v669_v58 = vld [vmem:[#allocation7 + $0x500] sm:$0xff] }
 0x105   : > { %v5048_v15 = vcombine.low %v679_v61, %v691_v62 }
 0x107   : > { %1802 = vmatpush1.bf16.msra.mxu0 %v5044_v6  ;;  %1845 = vmatpush1.bf16.msra.mxu1 %v5046_v17  ;;  %v5024_v6 = vcombine.low %v655_v53, %v667_v54  ;;  %v537_v17 = vld [vmem:[#allocation7 + $0xe0] sm:$0xff]  ;;  %v4958_v53 = vcombine.low %v586_v38, %v598_v39  ;;  %v634_v54 = vld [vmem:[#allocation7 + $0x3e8] sm:$0xff]  ;;  %v576_v38 = vld [vmem:[#allocation7 + $0x218] sm:$0xff] }
 0x108   : > { %1873 = vmatprep.subr.bf16.mxu0 %v4881_v11  ;;  %1916 = vmatprep.subr.bf16.mxu1 %v4883_v19  ;;  %v5049_v11 = vcombine.high %v679_v61, %v691_v62  ;;  %v5051_v19 = vcombine.high %v680_v4, %v692_v5  ;;  %v658_v62 = vld [vmem:[#allocation7 + $0x4a8] sm:$0xff]  ;;  %v693_v4 = vld [vmem:[#allocation7 + $0x5c0] sm:$0xff]  ;;  %v587_v39 = vld [vmem:[#allocation7 + $0x270] sm:$0xff] }
 0x10a   : > { %1820 = vmatmul.mubr.bf16.vlgmr.msra.gmra.mrb[0].mxu0 %v6471_v16  ;;  %1863 = vmatmul.mubr.bf16.vlgmr.msra.gmra.mrb[0].mxu1 %v6471_v16 }
 0x10b   : > { %1874 = vmatpush1.bf16.msra.mxu0 %v4880_v18  ;;  %1905 = vmatprep.mubr.bf16.mxu0 %v6116_v10  ;;  %v549_v18 = vld [vmem:[#allocation7 + $0x140] sm:$0xff] }
 0x10c   : > { %1875 = vmatprep.subr.bf16.mxu0 %v4905_v20  ;;  %1917 = vmatpush1.bf16.msra.mxu1 %v4882_v25  ;;  %v4885_v20 = vcombine.high %v513_v7, %v525_v8  ;;  %v561_v25 = vld [vmem:[#allocation7 + $0x1a0] sm:$0xff]  ;;  %v4908_v32 = vcombine.low %v537_v17, %v549_v18 }
 0x10d   : > { %1948 = vmatprep.mubr.bf16.mxu1 %v6116_v10  ;;  %1918 = vmatprep.subr.bf16.mxu1 %v4907_v27  ;;  %v4887_v27 = vcombine.high %v514_v13, %v526_v14  ;;  %v694_v13 = vld [vmem:[#allocation7 + $0x5c8] sm:$0xff]  ;;  %v515_v14 = vld [vmem:[#allocation7 + $0x30] sm:$0xff] }
 0x10f   : > { %1876 = vmatpush1.bf16.msra.mxu0 %v4904_v26  ;;  %v573_v26 = vld [vmem:[#allocation7 + $0x200] sm:$0xff] }
 0x110   : > { %1877 = vmatprep.subr.bf16.mxu0 %v4929_v28  ;;  %1919 = vmatpush1.bf16.msra.mxu1 %v4906_v33  ;;  %v4909_v28 = vcombine.high %v537_v17, %v549_v18  ;;  %v585_v33 = vld [vmem:[#allocation7 + $0x260] sm:$0xff]  ;;  %v4932_v40 = vcombine.low %v561_v25, %v573_v26 }
 0x111   : > { %1920 = vmatprep.subr.bf16.mxu1 %v4931_v35  ;;  %v4911_v35 = vcombine.high %v538_v22, %v550_v23  ;;  %v528_v22 = vld [vmem:[#allocation7 + $0x98] sm:$0xff]  ;;  %v539_v23 = vld [vmem:[#allocation7 + $0xf0] sm:$0xff] }
 0x113   : > { %1878 = vmatpush1.bf16.msra.mxu0 %v4928_v34  ;;  %v597_v34 = vld [vmem:[#allocation7 + $0x2c0] sm:$0xff] }
 0x114   : > { %1879 = vmatprep.subr.bf16.mxu0 %v4953_v36  ;;  %1921 = vmatpush1.bf16.msra.mxu1 %v4930_v41  ;;  %v4933_v36 = vcombine.high %v561_v25, %v573_v26  ;;  %v609_v41 = vld [vmem:[#allocation7 + $0x320] sm:$0xff]  ;;  %v4957_v44 = vcombine.high %v585_v33, %v597_v34 }
 0x115   : > { %1922 = vmatprep.subr.bf16.mxu1 %v4955_v46  ;;  %v610_v46 = vld [vmem:[#allocation7 + $0x328] sm:$0xff] }
 0x116   : > { %v4983_v59 = vcombine.high %v610_v46, %v622_v47  ;;  %v4982_v61 = vcombine.low %v610_v46, %v622_v47  ;;  %v600_v46 = vld [vmem:[#allocation7 + $0x2d8] sm:$0xff]  ;;  %v611_v47 = vld [vmem:[#allocation7 + $0x330] sm:$0xff] }
 0x117   : > { %1880 = vmatpush1.bf16.msra.mxu0 %v4952_v43  ;;  %v4935_v43 = vcombine.high %v562_v30, %v574_v31  ;;  %v552_v30 = vld [vmem:[#allocation7 + $0x158] sm:$0xff]  ;;  %v563_v31 = vld [vmem:[#allocation7 + $0x1b0] sm:$0xff] }
 0x118   : > { %1881 = vmatprep.subr.bf16.mxu0 %v4977_v48  ;;  %1923 = vmatpush1.bf16.msra.mxu1 %v4954_v49  ;;  %v4956_v48 = vcombine.low %v585_v33, %v597_v34  ;;  %v633_v49 = vld [vmem:[#allocation7 + $0x3e0] sm:$0xff] }
 0x119   : > { %1924 = vmatprep.subr.bf16.mxu1 %v4979_v55  ;;  %v646_v55 = vld [vmem:[#allocation7 + $0x448] sm:$0xff] }
 0x11a   : > { %v5007_v5 = vcombine.high %v634_v54, %v646_v55  ;;  %v5006_v7 = vcombine.low %v634_v54, %v646_v55  ;;  %v624_v54 = vld [vmem:[#allocation7 + $0x398] sm:$0xff]  ;;  %v635_v55 = vld [vmem:[#allocation7 + $0x3f0] sm:$0xff] }
 0x11b   : > { %1882 = vmatpush1.bf16.msra.mxu0 %v4976_v52  ;;  %v4981_v52 = vcombine.high %v609_v41, %v621_v42 }
 0x11c   : > { %1883 = vmatprep.subr.bf16.mxu0 %v5001_v56  ;;  %1925 = vmatpush1.bf16.msra.mxu1 %v4978_v57  ;;  %v4980_v56 = vcombine.low %v609_v41, %v621_v42  ;;  %v657_v57 = vld [vmem:[#allocation7 + $0x4a0] sm:$0xff] }
 0x11d   : > { %1926 = vmatprep.subr.bf16.mxu1 %v5003_v63  ;;  %v670_v63 = vld [vmem:[#allocation7 + $0x508] sm:$0xff]  ;;  %v5028_v8 = vcombine.low %v657_v57, %v669_v58 }
 0x11e   : > { %v5030_v17 = vcombine.low %v658_v62, %v670_v63 }
 0x11f   : > { %1884 = vmatpush1.bf16.msra.mxu0 %v5000_v60  ;;  %v5005_v60 = vcombine.high %v633_v49, %v645_v50 }
 0x120   : > { %1885 = vmatprep.subr.bf16.mxu0 %v5025_v1  ;;  %1927 = vmatpush1.bf16.msra.mxu1 %v5002_v2  ;;  %v5004_v1 = vcombine.low %v633_v49, %v645_v50  ;;  %v681_v2 = vld [vmem:[#allocation7 + $0x560] sm:$0xff] }
 0x121   : > { %1928 = vmatprep.subr.bf16.mxu1 %v5027_v9  ;;  %v5031_v9 = vcombine.high %v658_v62, %v670_v63  ;;  %v5052_v18 = vcombine.low %v681_v2, %v693_v4  ;;  %v648_v62 = vld [vmem:[#allocation7 + $0x458] sm:$0xff]  ;;  %v659_v63 = vld [vmem:[#allocation7 + $0x4b0] sm:$0xff] }
 0x123   : > { %1886 = vmatpush1.bf16.msra.mxu0 %v5024_v6  ;;  %v5029_v6 = vcombine.high %v657_v57, %v669_v58 }
 0x124   : > { %1887 = vmatprep.subr.bf16.mxu0 %v5049_v11  ;;  %1929 = vmatpush1.bf16.msra.mxu1 %v5026_v12  ;;  %v5053_v11 = vcombine.high %v681_v2, %v693_v4  ;;  %v682_v12 = vld [vmem:[#allocation7 + $0x568] sm:$0xff] }
 0x125   : > { %1930 = vmatprep.subr.bf16.mxu1 %v5051_v19  ;;  %v5055_v19 = vcombine.high %v682_v12, %v694_v13  ;;  %v5054_v25 = vcombine.low %v682_v12, %v694_v13 }
 0x127   : > { %1888 = vmatpush1.bf16.msra.mxu0 %v5048_v15  ;;  %v527_v15 = vld [vmem:[#allocation7 + $0x90] sm:$0xff] }
 0x128   : > { %1959 = vmatprep.subr.bf16.mxu0 %v4885_v20  ;;  %1931 = vmatpush1.bf16.msra.mxu1 %v5050_v21  ;;  %v4889_v20 = vcombine.high %v515_v14, %v527_v15  ;;  %v516_v21 = vld [vmem:[#allocation7 + $0x38] sm:$0xff]  ;;  %v4888_v26 = vcombine.low %v515_v14, %v527_v15 }
 0x129   : > { %2002 = vmatprep.subr.bf16.mxu1 %v4887_v27  ;;  %v4891_v27 = vcombine.high %v516_v21, %v528_v22  ;;  %v4890_v33 = vcombine.low %v516_v21, %v528_v22 }
 0x12a   : > { %1906 = vmatmul.mubr.bf16.vlgmr.msra.gmra.mrb[4].mxu0 %v6471_v16 }
 0x12b   : > { %1960 = vmatpush1.bf16.msra.mxu0 %v4884_v24  ;;  %1991 = vmatprep.mubr.bf16.mxu0 %v6116_v10  ;;  %v551_v24 = vld [vmem:[#allocation7 + $0x150] sm:$0xff] }
 0x12c   : > { %1961 = vmatprep.subr.bf16.mxu0 %v4909_v28  ;;  %1949 = vmatmul.mubr.bf16.vlgmr.msra.gmra.mrb[4].mxu1 %v6471_v16  ;;  %v4913_v28 = vcombine.high %v539_v23, %v551_v24  ;;  %v4912_v34 = vcombine.low %v539_v23, %v551_v24 }
 0x12d   : > { %2003 = vmatpush1.bf16.msra.mxu1 %v4886_v29  ;;  %2034 = vmatprep.mubr.bf16.mxu1 %v6116_v10  ;;  %v540_v29 = vld [vmem:[#allocation7 + $0xf8] sm:$0xff] }
 0x12e   : > { %2004 = vmatprep.subr.bf16.mxu1 %v4911_v35  ;;  %v4915_v35 = vcombine.high %v540_v29, %v552_v30  ;;  %v4914_v41 = vcombine.low %v540_v29, %v552_v30  ;;  %v565_v30 = vld [vmem:[#allocation7 + $0x1c0] sm:$0xff] }
 0x12f   : > { %1962 = vmatpush1.bf16.msra.mxu0 %v4908_v32  ;;  %v575_v32 = vld [vmem:[#allocation7 + $0x210] sm:$0xff] }
 0x130   : > { %1963 = vmatprep.subr.bf16.mxu0 %v4933_v36  ;;  %v4937_v36 = vcombine.high %v563_v31, %v575_v32  ;;  %v4936_v42 = vcombine.low %v563_v31, %v575_v32  ;;  %v577_v31 = vld [vmem:[#allocation7 + $0x220] sm:$0xff] }
 0x131   : > { %2005 = vmatpush1.bf16.msra.mxu1 %v4910_v37  ;;  %v564_v37 = vld [vmem:[#allocation7 + $0x1b8] sm:$0xff] }
 0x132   : > { %2006 = vmatprep.subr.bf16.mxu1 %v4935_v43  ;;  %v4939_v43 = vcombine.high %v564_v37, %v576_v38  ;;  %v4938_v49 = vcombine.low %v564_v37, %v576_v38  ;;  %v613_v38 = vld [vmem:[#allocation7 + $0x340] sm:$0xff] }
 0x133   : > { %1964 = vmatpush1.bf16.msra.mxu0 %v4932_v40  ;;  %v599_v40 = vld [vmem:[#allocation7 + $0x2d0] sm:$0xff] }
 0x134   : > { %1965 = vmatprep.subr.bf16.mxu0 %v4957_v44  ;;  %v4961_v44 = vcombine.high %v587_v39, %v599_v40  ;;  %v4960_v50 = vcombine.low %v587_v39, %v599_v40  ;;  %v625_v39 = vld [vmem:[#allocation7 + $0x3a0] sm:$0xff] }
 0x135   : > { %2007 = vmatpush1.bf16.msra.mxu1 %v4934_v45  ;;  %v588_v45 = vld [vmem:[#allocation7 + $0x278] sm:$0xff] }
 0x136   : > { %2008 = vmatprep.subr.bf16.mxu1 %v4959_v51  ;;  %v4963_v51 = vcombine.high %v588_v45, %v600_v46  ;;  %v4962_v57 = vcombine.low %v588_v45, %v600_v46  ;;  %v661_v46 = vld [vmem:[#allocation7 + $0x4c0] sm:$0xff] }
 0x137   : > { %1966 = vmatpush1.bf16.msra.mxu0 %v4956_v48  ;;  %v623_v48 = vld [vmem:[#allocation7 + $0x390] sm:$0xff] }
 0x138   : > { %1967 = vmatprep.subr.bf16.mxu0 %v4981_v52  ;;  %v4985_v52 = vcombine.high %v611_v47, %v623_v48  ;;  %v4984_v58 = vcombine.low %v611_v47, %v623_v48  ;;  %v673_v47 = vld [vmem:[#allocation7 + $0x520] sm:$0xff] }
 0x139   : > { %2009 = vmatpush1.bf16.msra.mxu1 %v4958_v53  ;;  %v612_v53 = vld [vmem:[#allocation7 + $0x338] sm:$0xff] }
 0x13a   : > { %2010 = vmatprep.subr.bf16.mxu1 %v4983_v59  ;;  %v4987_v59 = vcombine.high %v612_v53, %v624_v54  ;;  %v4986_v2 = vcombine.low %v612_v53, %v624_v54  ;;  %v519_v54 = vld [vmem:[#allocation7 + $0x50] sm:$0xff] }
 0x13b   : > { %1968 = vmatpush1.bf16.msra.mxu0 %v4980_v56  ;;  %v647_v56 = vld [vmem:[#allocation7 + $0x450] sm:$0xff] }
 0x13c   : > { %1969 = vmatprep.subr.bf16.mxu0 %v5005_v60  ;;  %v5009_v60 = vcombine.high %v635_v55, %v647_v56  ;;  %v5008_v4 = vcombine.low %v635_v55, %v647_v56  ;;  %v531_v55 = vld [vmem:[#allocation7 + $0xb0] sm:$0xff] }
 0x13d   : > { %2011 = vmatpush1.bf16.msra.mxu1 %v4982_v61  ;;  %v636_v61 = vld [vmem:[#allocation7 + $0x3f8] sm:$0xff] }
 0x13e   : > { %2012 = vmatprep.subr.bf16.mxu1 %v5007_v5  ;;  %v5011_v5 = vcombine.high %v636_v61, %v648_v62  ;;  %v5010_v12 = vcombine.low %v636_v61, %v648_v62  ;;  %v567_v62 = vld [vmem:[#allocation7 + $0x1d0] sm:$0xff] }
 0x13f   : > { %1970 = vmatpush1.bf16.msra.mxu0 %v5004_v1  ;;  %v671_v1 = vld [vmem:[#allocation7 + $0x510] sm:$0xff] }
 0x140   : > { %1971 = vmatprep.subr.bf16.mxu0 %v5029_v6  ;;  %v5033_v6 = vcombine.high %v659_v63, %v671_v1  ;;  %v5032_v13 = vcombine.low %v659_v63, %v671_v1  ;;  %v579_v63 = vld [vmem:[#allocation7 + $0x230] sm:$0xff] }
 0x141   : > { %2013 = vmatpush1.bf16.msra.mxu1 %v5006_v7  ;;  %v660_v7 = vld [vmem:[#allocation7 + $0x4b8] sm:$0xff] }
 0x142   : > { %2014 = vmatprep.subr.bf16.mxu1 %v5031_v9  ;;  %v683_v9 = vld [vmem:[#allocation7 + $0x570] sm:$0xff] }
 0x143   : > { %1972 = vmatpush1.bf16.msra.mxu0 %v5028_v8  ;;  %v672_v8 = vld [vmem:[#allocation7 + $0x518] sm:$0xff] }
 0x144   : > { %1973 = vmatprep.subr.bf16.mxu0 %v5053_v11  ;;  %v695_v11 = vld [vmem:[#allocation7 + $0x5d0] sm:$0xff]  ;;  %v5035_v14 = vcombine.high %v660_v7, %v672_v8  ;;  %v5034_v21 = vcombine.low %v660_v7, %v672_v8 }
 0x145   : > { %2015 = vmatpush1.bf16.msra.mxu1 %v5030_v17  ;;  %v5057_v15 = vcombine.high %v683_v9, %v695_v11  ;;  %v684_v17 = vld [vmem:[#allocation7 + $0x578] sm:$0xff]  ;;  %v5056_v22 = vcombine.low %v683_v9, %v695_v11  ;;  %v615_v8 = vld [vmem:[#allocation7 + $0x350] sm:$0xff] }
 0x146   : > { %2016 = vmatprep.subr.bf16.mxu1 %v5055_v19  ;;  %v517_v19 = vld [vmem:[#allocation7 + $0x40] sm:$0xff]  ;;  %v627_v9 = vld [vmem:[#allocation7 + $0x3b0] sm:$0xff] }
 0x147   : > { %1974 = vmatpush1.bf16.msra.mxu0 %v5052_v18  ;;  %v696_v18 = vld [vmem:[#allocation7 + $0x5d8] sm:$0xff] }
 0x148   : > { %2045 = vmatprep.subr.bf16.mxu0 %v4889_v20  ;;  %v529_v20 = vld [vmem:[#allocation7 + $0xa0] sm:$0xff]  ;;  %v5059_v23 = vcombine.high %v684_v17, %v696_v18 }
 0x149   : > { %2017 = vmatpush1.bf16.msra.mxu1 %v5054_v25  ;;  %v4893_v24 = vcombine.high %v517_v19, %v529_v20  ;;  %v541_v25 = vld [vmem:[#allocation7 + $0x100] sm:$0xff] }
 0x14a   : > { %1992 = vmatmul.mubr.bf16.vlgmr.msra.gmra.mrb[8].mxu0 %v6471_v16  ;;  %2088 = vmatprep.subr.bf16.mxu1 %v4891_v27  ;;  %v5058_v27 = vcombine.low %v684_v17, %v696_v18  ;;  %v663_v18 = vld [vmem:[#allocation7 + $0x4d0] sm:$0xff] }
 0x14b   : > { %2046 = vmatpush1.bf16.msra.mxu0 %v4888_v26  ;;  %2077 = vmatprep.mubr.bf16.mxu0 %v6116_v10  ;;  %v553_v26 = vld [vmem:[#allocation7 + $0x160] sm:$0xff] }
 0x14c   : > { %2047 = vmatprep.subr.bf16.mxu0 %v4913_v28  ;;  %2035 = vmatmul.mubr.bf16.vlgmr.msra.gmra.mrb[8].mxu1 %v6471_v16  ;;  %v4892_v28 = vcombine.low %v517_v19, %v529_v20  ;;  %v4917_v29 = vcombine.high %v541_v25, %v553_v26  ;;  %v4916_v32 = vcombine.low %v541_v25, %v553_v26  ;;  %v675_v19 = vld [vmem:[#allocation7 + $0x530] sm:$0xff] }
 0x14d   : > { %2089 = vmatpush1.bf16.msra.mxu1 %v4890_v33  ;;  %2120 = vmatprep.mubr.bf16.mxu1 %v6116_v10  ;;  %v4941_v33 = vcombine.high %v565_v30, %v577_v31 }
 0x14e   : > { %2090 = vmatprep.subr.bf16.mxu1 %v4915_v35  ;;  %v601_v35 = vld [vmem:[#allocation7 + $0x2e0] sm:$0xff] }
 0x14f   : > { %2048 = vmatpush1.bf16.msra.mxu0 %v4912_v34  ;;  %v589_v34 = vld [vmem:[#allocation7 + $0x280] sm:$0xff] }
 0x150   : > { %2049 = vmatprep.subr.bf16.mxu0 %v4937_v36  ;;  %v4940_v36 = vcombine.low %v565_v30, %v577_v31  ;;  %v4965_v37 = vcombine.high %v589_v34, %v601_v35  ;;  %v4964_v40 = vcombine.low %v589_v34, %v601_v35  ;;  %v6506_v30 = vld [vmem:[%s7140_s25] sm:$0xff] }
 0x151   : > { %2091 = vmatpush1.bf16.msra.mxu1 %v4914_v41  ;;  %v4989_v41 = vcombine.high %v613_v38, %v625_v39 }
 0x152   : > { %2092 = vmatprep.subr.bf16.mxu1 %v4939_v43  ;;  %v649_v43 = vld [vmem:[#allocation7 + $0x460] sm:$0xff] }
 0x153   : > { %2050 = vmatpush1.bf16.msra.mxu0 %v4936_v42  ;;  %v637_v42 = vld [vmem:[#allocation7 + $0x400] sm:$0xff] }
 0x154   : > { %2051 = vmatprep.subr.bf16.mxu0 %v4961_v44  ;;  %v4988_v44 = vcombine.low %v613_v38, %v625_v39  ;;  %v5013_v45 = vcombine.high %v637_v42, %v649_v43  ;;  %v5012_v48 = vcombine.low %v637_v42, %v649_v43 }
 0x155   : > { %2093 = vmatpush1.bf16.msra.mxu1 %v4938_v49  ;;  %v5037_v49 = vcombine.high %v661_v46, %v673_v47 }
 0x156   : > { %2094 = vmatprep.subr.bf16.mxu1 %v4963_v51  ;;  %v697_v51 = vld [vmem:[#allocation7 + $0x5e0] sm:$0xff] }
 0x157   : > { %2052 = vmatpush1.bf16.msra.mxu0 %v4960_v50  ;;  %v685_v50 = vld [vmem:[#allocation7 + $0x580] sm:$0xff] }
 0x158   : > { %2053 = vmatprep.subr.bf16.mxu0 %v4985_v52  ;;  %v5036_v52 = vcombine.low %v661_v46, %v673_v47  ;;  %v5061_v53 = vcombine.high %v685_v50, %v697_v51  ;;  %v5060_v56 = vcombine.low %v685_v50, %v697_v51 }
 0x159   : > { %2095 = vmatpush1.bf16.msra.mxu1 %v4962_v57  ;;  %v4897_v57 = vcombine.high %v519_v54, %v531_v55 }
 0x15a   : > { %2096 = vmatprep.subr.bf16.mxu1 %v4987_v59  ;;  %v555_v59 = vld [vmem:[#allocation7 + $0x170] sm:$0xff] }
 0x15b   : > { %2054 = vmatpush1.bf16.msra.mxu0 %v4984_v58  ;;  %v543_v58 = vld [vmem:[#allocation7 + $0x110] sm:$0xff] }
 0x15c   : > { %2055 = vmatprep.subr.bf16.mxu0 %v5009_v60  ;;  %v4896_v60 = vcombine.low %v519_v54, %v531_v55  ;;  %v4921_v61 = vcombine.high %v543_v58, %v555_v59  ;;  %v4920_v1 = vcombine.low %v543_v58, %v555_v59  ;;  %v518_v55 = vld [vmem:[#allocation7 + $0x48] sm:$0xff] }
 0x15d   : > { %2097 = vmatpush1.bf16.msra.mxu1 %v4986_v2  ;;  %v4945_v2 = vcombine.high %v567_v62, %v579_v63 }
 0x15e   : > { %2098 = vmatprep.subr.bf16.mxu1 %v5011_v5  ;;  %v603_v5 = vld [vmem:[#allocation7 + $0x2f0] sm:$0xff] }
 0x15f   : > { %2056 = vmatpush1.bf16.msra.mxu0 %v5008_v4  ;;  %v591_v4 = vld [vmem:[#allocation7 + $0x290] sm:$0xff] }
 0x160   : > { %2057 = vmatprep.subr.bf16.mxu0 %v5033_v6  ;;  %v4944_v6 = vcombine.low %v567_v62, %v579_v63  ;;  %v4969_v7 = vcombine.high %v591_v4, %v603_v5  ;;  %v4968_v11 = vcombine.low %v591_v4, %v603_v5 }
 0x161   : > { %2099 = vmatpush1.bf16.msra.mxu1 %v5010_v12  ;;  %v4993_v12 = vcombine.high %v615_v8, %v627_v9 }
 0x162   : > { %2100 = vmatprep.subr.bf16.mxu1 %v5035_v14  ;;  %v651_v14 = vld [vmem:[#allocation7 + $0x470] sm:$0xff] }
 0x163   : > { %2058 = vmatpush1.bf16.msra.mxu0 %v5032_v13  ;;  %v639_v13 = vld [vmem:[#allocation7 + $0x410] sm:$0xff] }
 0x164   : > { %2059 = vmatprep.subr.bf16.mxu0 %v5057_v15  ;;  %v4992_v15 = vcombine.low %v615_v8, %v627_v9  ;;  %v5017_v17 = vcombine.high %v639_v13, %v651_v14  ;;  %v5016_v20 = vcombine.low %v639_v13, %v651_v14  ;;  %v602_v8 = vld [vmem:[#allocation7 + $0x2e8] sm:$0xff] }
 0x165   : > { %2101 = vmatpush1.bf16.msra.mxu1 %v5034_v21  ;;  %v5041_v21 = vcombine.high %v663_v18, %v675_v19  ;;  %v626_v13 = vld [vmem:[#allocation7 + $0x3a8] sm:$0xff] }
 0x166   : > { %2102 = vmatprep.subr.bf16.mxu1 %v5059_v23  ;;  %v699_v23 = vld [vmem:[#allocation7 + $0x5f0] sm:$0xff] }
 0x167   : > { %2060 = vmatpush1.bf16.msra.mxu0 %v5056_v22  ;;  %v687_v22 = vld [vmem:[#allocation7 + $0x590] sm:$0xff] }
 0x168   : > { %2131 = vmatprep.subr.bf16.mxu0 %v4893_v24  ;;  %v5040_v24 = vcombine.low %v663_v18, %v675_v19  ;;  %v5065_v25 = vcombine.high %v687_v22, %v699_v23  ;;  %v5064_v26 = vcombine.low %v687_v22, %v699_v23  ;;  %v650_v18 = vld [vmem:[#allocation7 + $0x468] sm:$0xff] }
 0x169   : > { %2103 = vmatpush1.bf16.msra.mxu1 %v5058_v27  ;;  %v6117_v27 = vmov 0.0   ;;  %v674_v22 = vld [vmem:[#allocation7 + $0x528] sm:$0xff] }
 0x16a   : > { %2078 = vmatmul.mubr.bf16.vlgmr.msra.gmra.mrb[12].mxu0 %v6471_v16  ;;  %3920 = vst [vmem:[#allocation3] sm:$0xff] %v6117_v27  ;;  %3921 = vst [vmem:[#allocation3 + $0x8] sm:$0xff] %v6117_v27 }
 0x16b   : > { %2132 = vmatpush1.bf16.msra.mxu0 %v4892_v28  ;;  %2163 = vmatprep.mubr.bf16.mxu0 %v6116_v10  ;;  %v6498_v28 = vshrl.u32 %v496_v0, 7 }
 0x16c   : > { %2133 = vmatprep.subr.bf16.mxu0 %v4917_v29  ;;  %2121 = vmatmul.mubr.bf16.vlgmr.msra.gmra.mrb[12].mxu1 %v6471_v16 }
 0x16d   : > { %2206 = vmatprep.mubr.bf16.mxu1 %v6116_v10  ;;  %v6501_v29 = vsub.s32 0, %v6498_v28  ;;  %v6509_v31 = vsub.s32 1, %v6498_v28  ;;  %v6517_v34 = vsub.s32 3, %v6498_v28  ;;  %v6550_v23 = vsub.s32 4, %v6498_v28 }
 0x16f   : > { %2134 = vmatpush1.bf16.msra.mxu0 %v4916_v32  ;;  %v6512_v32 = vsub.s32 2, %v6498_v28 }
 0x170   : > { %2135 = vmatprep.subr.bf16.mxu0 %v4941_v33  ;;  %v710_v33 = vrot.slane %v6506_v30, %v6501_v29 }
 0x173   : > { %2136 = vmatpush1.bf16.msra.mxu0 %v4940_v36  ;;  %v714_v36 = vrot.slane %v6506_v30, %v6509_v31 }
 0x174   : > { %2137 = vmatprep.subr.bf16.mxu0 %v4965_v37  ;;  %v718_v37 = vrot.slane %v6506_v30, %v6512_v32 }
 0x177   : > { %2138 = vmatpush1.bf16.msra.mxu0 %v4964_v40  ;;  %v722_v40 = vrot.slane %v6506_v30, %v6517_v34 }
 0x178   : > { %2139 = vmatprep.subr.bf16.mxu0 %v4989_v41 }
 0x17b   : > { %2140 = vmatpush1.bf16.msra.mxu0 %v4988_v44 }
 0x17c   : > { %2141 = vmatprep.subr.bf16.mxu0 %v5013_v45 }
 0x17f   : > { %2142 = vmatpush1.bf16.msra.mxu0 %v5012_v48 }
 0x180   : > { %2143 = vmatprep.subr.bf16.mxu0 %v5037_v49 }
 0x183   : > { %2144 = vmatpush1.bf16.msra.mxu0 %v5036_v52 }
 0x184   : > { %2145 = vmatprep.subr.bf16.mxu0 %v5061_v53 }
 0x187   : > { %2146 = vmatpush1.bf16.msra.mxu0 %v5060_v56  ;;  %v530_v56 = vld [vmem:[#allocation7 + $0xa8] sm:$0xff] }
 0x188   : > { %2217 = vmatprep.subr.bf16.mxu0 %v4897_v57  ;;  %v542_v57 = vld [vmem:[#allocation7 + $0x108] sm:$0xff]  ;;  %v4894_v59 = vcombine.low %v518_v55, %v530_v56 }
 0x18a   : > { %2164 = vmatmul.mubr.bf16.vlgmr.msra.gmra.mrb[16].mxu0 %v6471_v16 }
 0x18b   : > { %2218 = vmatpush1.bf16.msra.mxu0 %v4896_v60  ;;  %2249 = vmatprep.mubr.bf16.mxu0 %v6116_v10  ;;  %v4895_v60 = vcombine.high %v518_v55, %v530_v56 }
 0x18c   : > { %2219 = vmatprep.subr.bf16.mxu0 %v4921_v61  ;;  %v554_v61 = vld [vmem:[#allocation7 + $0x168] sm:$0xff] }
 0x18d   : > { %v4919_v63 = vcombine.high %v542_v57, %v554_v61  ;;  %2174 = vmatprep.subr.bf16.mxu1 %v4895_v60  ;;  %v4918_v5 = vcombine.low %v542_v57, %v554_v61 }
 0x18e   : > { %2175 = vmatpush1.bf16.msra.mxu1 %v4894_v59 }
 0x18f   : > { %2220 = vmatpush1.bf16.msra.mxu0 %v4920_v1  ;;  %v566_v1 = vld [vmem:[#allocation7 + $0x1c8] sm:$0xff]  ;;  %2176 = vmatprep.subr.bf16.mxu1 %v4919_v63 }
 0x190   : > { %2221 = vmatprep.subr.bf16.mxu0 %v4945_v2  ;;  %v578_v2 = vld [vmem:[#allocation7 + $0x228] sm:$0xff] }
 0x191   : > { %v4942_v9 = vcombine.low %v566_v1, %v578_v2 }
 0x192   : > { %2177 = vmatpush1.bf16.msra.mxu1 %v4918_v5 }
 0x193   : > { %2222 = vmatpush1.bf16.msra.mxu0 %v4944_v6  ;;  %v4943_v6 = vcombine.high %v566_v1, %v578_v2 }
 0x194   : > { %2223 = vmatprep.subr.bf16.mxu0 %v4969_v7  ;;  %v590_v7 = vld [vmem:[#allocation7 + $0x288] sm:$0xff] }
 0x195   : > { %2178 = vmatprep.subr.bf16.mxu1 %v4943_v6  ;;  %v4966_v14 = vcombine.low %v590_v7, %v602_v8 }
 0x196   : > { %2179 = vmatpush1.bf16.msra.mxu1 %v4942_v9  ;;  %v556_v9 = vld [vmem:[#allocation7 + $0x178] sm:$0xff] }
 0x197   : > { %2224 = vmatpush1.bf16.msra.mxu0 %v4968_v11  ;;  %v4967_v11 = vcombine.high %v590_v7, %v602_v8  ;;  %v544_v8 = vld [vmem:[#allocation7 + $0x118] sm:$0xff] }
 0x198   : > { %2225 = vmatprep.subr.bf16.mxu0 %v4993_v12  ;;  %v614_v12 = vld [vmem:[#allocation7 + $0x348] sm:$0xff] }
 0x199   : > { %2180 = vmatprep.subr.bf16.mxu1 %v4967_v11  ;;  %v4990_v19 = vcombine.low %v614_v12, %v626_v13 }
 0x19a   : > { %2181 = vmatpush1.bf16.msra.mxu1 %v4966_v14 }
 0x19b   : > { %2226 = vmatpush1.bf16.msra.mxu0 %v4992_v15  ;;  %v4991_v15 = vcombine.high %v614_v12, %v626_v13 }
 0x19c   : > { %2227 = vmatprep.subr.bf16.mxu0 %v5017_v17  ;;  %v638_v17 = vld [vmem:[#allocation7 + $0x408] sm:$0xff] }
 0x19d   : > { %2182 = vmatprep.subr.bf16.mxu1 %v4991_v15 }
 0x19e   : > { %2183 = vmatpush1.bf16.msra.mxu1 %v4990_v19  ;;  %v4923_v19 = vcombine.high %v544_v8, %v556_v9 }
 0x19f   : > { %2228 = vmatpush1.bf16.msra.mxu0 %v5016_v20  ;;  %v5015_v20 = vcombine.high %v638_v17, %v650_v18 }
 0x1a0   : > { %2229 = vmatprep.subr.bf16.mxu0 %v5041_v21  ;;  %v662_v21 = vld [vmem:[#allocation7 + $0x4c8] sm:$0xff] }
 0x1a1   : > { %2184 = vmatprep.subr.bf16.mxu1 %v5015_v20 }
 0x1a3   : > { %2230 = vmatpush1.bf16.msra.mxu0 %v5040_v24  ;;  %v5014_v24 = vcombine.low %v638_v17, %v650_v18 }
 0x1a4   : > { %2231 = vmatprep.subr.bf16.mxu0 %v5065_v25  ;;  %v5039_v25 = vcombine.high %v662_v21, %v674_v22 }
 0x1a5   : > { %2185 = vmatpush1.bf16.msra.mxu1 %v5014_v24 }
 0x1a6   : > { %2186 = vmatprep.subr.bf16.mxu1 %v5039_v25  ;;  %v4922_v25 = vcombine.low %v544_v8, %v556_v9  ;;  %v700_v8 = vld [vmem:[#allocation7 + $0x5f8] sm:$0xff] }
 0x1a7   : > { %2232 = vmatpush1.bf16.msra.mxu0 %v5064_v26  ;;  %v6553_v26 = vsub.s32 5, %v6498_v28 }
 0x1a8   : > { %5383 = vmatprep.subr.bf16.mxu0 %v6117_v27 }
 0x1aa   : > { %2250 = vmatmul.mubr.bf16.vlgmr.msra.gmra.mrb[20].mxu0 %v6471_v16 }
 0x1ab   : > { %5385 = vmatprep.mubr.msk.bf16.mxu0 %vm6118_vm1, %v6117_v27 }
 0x1dd   : > { %v1821_v35 = vpop.f32.mrb[0].mxu0  ;;  %v1864_v44 = vpop.f32.mrb[0].mxu1 }
 0x1de   : > { %v6523_v38 = vadd.f32 %v1821_v35, %v710_v33  ;;  %v1823_v39 = vpop.f32.mrb[1].mxu0  ;;  %v6533_v47 = vadd.f32 %v1864_v44, %v718_v37  ;;  %v1866_v48 = vpop.f32.mrb[1].mxu1  ;;  %v686_v35 = vld [vmem:[#allocation7 + $0x588] sm:$0xff]  ;;  %v730_v44 = vrot.slane %v6506_v30, %v6553_v26 }
 0x1df   : > { %v1825_v41 = vpop.f32.mrb[2].mxu0  ;;  %v6529_v45 = vadd.f32 %v1823_v39, %v714_v36  ;;  %v6537_v50 = vadd.f32 %v1866_v48, %v722_v40  ;;  %v1868_v51 = vpop.f32.mrb[2].mxu1  ;;  %v6561_v39 = vsub.s32 7, %v6498_v28 }
 0x1e0   : > { %v6527_v42 = vadd.f32 %v1825_v41, %v710_v33  ;;  %v1827_v43 = vpop.f32.mrb[3].mxu0  ;;  %v6541_v53 = vadd.f32 %v1868_v51, %v718_v37  ;;  %v1870_v54 = vpop.f32.mrb[3].mxu1  ;;  %v6556_v33 = vsub.s32 6, %v6498_v28  ;;  %v726_v37 = vrot.slane %v6506_v30, %v6550_v23  ;;  %v520_v51 = vld [vmem:[#allocation7 + $0x58] sm:$0xff] }
 0x1e1   : > { %v6531_v46 = vadd.f32 %v1827_v43, %v714_v36  ;;  %v6543_v58 = vadd.f32 %v1870_v54, %v722_v40  ;;  %v698_v36 = vld [vmem:[#allocation7 + $0x5e8] sm:$0xff]  ;;  %v5038_v40 = vcombine.low %v662_v21, %v674_v22  ;;  %v532_v54 = vld [vmem:[#allocation7 + $0xb8] sm:$0xff]  ;;  %v738_v28 = vrot.slane %v6506_v30, %v6561_v39 }
 0x1e2   : > { %v2303_v49 = vpack.c.bf16 %v6527_v42, %v6523_v38  ;;  %v2526_v62 = vpack.c.bf16 %v6541_v53, %v6533_v47  ;;  %v5063_v41 = vcombine.high %v686_v35, %v698_v36  ;;  %v734_v48 = vrot.slane %v6506_v30, %v6556_v33  ;;  %v568_v21 = vld [vmem:[#allocation7 + $0x1d8] sm:$0xff] }
 0x1e3   : > { %v2415_v52 = vpack.c.bf16 %v6531_v46, %v6529_v45  ;;  %v2637_v4 = vpack.c.bf16 %v6543_v58, %v6537_v50  ;;  %2187 = vmatpush1.bf16.msra.mxu1 %v5038_v40  ;;  %v5062_v59 = vcombine.low %v686_v35, %v698_v36  ;;  %v4899_v1 = vcombine.high %v520_v51, %v532_v54  ;;  %v580_v22 = vld [vmem:[#allocation7 + $0x238] sm:$0xff]  ;;  %v6650_v50 = vld [vmem:[%s7140_s25 + $0x10] sm:$0xff] }
 0x1e4   : > { %2188 = vmatprep.subr.bf16.mxu1 %v5063_v41  ;;  %v4898_v17 = vcombine.low %v520_v51, %v532_v54  ;;  %v4947_v35 = vcombine.high %v568_v21, %v580_v22  ;;  %v592_v36 = vld [vmem:[#allocation7 + $0x298] sm:$0xff]  ;;  %v4946_v40 = vcombine.low %v568_v21, %v580_v22  ;;  %v774_v58 = vrot.slane %v6650_v50, %v6501_v29 }
 0x1e5   : > { %v640_v54 = vld [vmem:[#allocation7 + $0x418] sm:$0xff] }
 0x1e7   : > { %2189 = vmatpush1.bf16.msra.mxu1 %v5062_v59  ;;  %v676_v59 = vld [vmem:[#allocation7 + $0x538] sm:$0xff] }
 0x1e8   : > { %2260 = vmatprep.subr.bf16.mxu1 %v4899_v1  ;;  %v702_v1 = vld [vmem:[%s7140_s25 + $0x8] sm:$0xff] }
 0x1e9   : > { %v750_v21 = vrot.slane %v702_v1, %v6512_v32  ;;  %v762_v38 = vrot.slane %v702_v1, %v6553_v26  ;;  %v766_v45 = vrot.slane %v702_v1, %v6556_v33 }
 0x1ea   : > { %2207 = vmatmul.mubr.bf16.vlgmr.msra.gmra.mrb[16].mxu1 %v6471_v16 }
 0x1eb   : > { %2261 = vmatpush1.bf16.msra.mxu1 %v4898_v17  ;;  %2292 = vmatprep.mubr.bf16.mxu1 %v6116_v10 }
 0x1ec   : > { %2262 = vmatprep.subr.bf16.mxu1 %v4923_v19  ;;  %v746_v19 = vrot.slane %v702_v1, %v6509_v31 }
 0x1ef   : > { %2263 = vmatpush1.bf16.msra.mxu1 %v4922_v25  ;;  %v754_v25 = vrot.slane %v702_v1, %v6517_v34 }
 0x1f0   : > { %2264 = vmatprep.subr.bf16.mxu1 %v4947_v35 }
 0x1f3   : > { %2265 = vmatpush1.bf16.msra.mxu1 %v4946_v40 }
 0x1fd   : > { %v1907_v43 = vpop.f32.mrb[4].mxu0 }
 0x1fe   : > { %v6567_v55 = vadd.f32 %v1907_v43, %v726_v37  ;;  %v1909_v56 = vpop.f32.mrb[5].mxu0  ;;  %v616_v43 = vld [vmem:[#allocation7 + $0x358] sm:$0xff] }
 0x1ff   : > { %v1911_v57 = vpop.f32.mrb[6].mxu0  ;;  %v1950_v63 = vpop.f32.mrb[4].mxu1  ;;  %v6573_v2 = vadd.f32 %v1909_v56, %v730_v44  ;;  %v652_v56 = vld [vmem:[#allocation7 + $0x478] sm:$0xff] }
 0x200   : > { %v6571_v60 = vadd.f32 %v1911_v57, %v726_v37  ;;  %v1913_v61 = vpop.f32.mrb[7].mxu0  ;;  %v6577_v6 = vadd.f32 %v1950_v63, %v734_v48  ;;  %v1952_v7 = vpop.f32.mrb[5].mxu1  ;;  %v604_v37 = vld [vmem:[#allocation7 + $0x2f8] sm:$0xff]  ;;  %v5019_v10 = vcombine.high %v640_v54, %v652_v56 }
 0x201   : > { %v6575_v5 = vadd.f32 %v1913_v61, %v730_v44  ;;  %v6581_v11 = vadd.f32 %v1952_v7, %v738_v28  ;;  %v1954_v12 = vpop.f32.mrb[6].mxu1  ;;  %v4971_v41 = vcombine.high %v592_v36, %v604_v37  ;;  %v628_v44 = vld [vmem:[#allocation7 + $0x3b8] sm:$0xff]  ;;  %v5018_v61 = vcombine.low %v640_v54, %v652_v56 }
 0x202   : > { %v2748_v30 = vpack.c.bf16 %v6571_v60, %v6567_v55  ;;  %v6585_v14 = vadd.f32 %v1954_v12, %v734_v48  ;;  %v1956_v15 = vpop.f32.mrb[7].mxu1  ;;  %v4970_v48 = vcombine.low %v592_v36, %v604_v37  ;;  %v4995_v51 = vcombine.high %v616_v43, %v628_v44  ;;  %v664_v57 = vld [vmem:[#allocation7 + $0x4d8] sm:$0xff] }
 0x203   : > { %v2859_v13 = vpack.c.bf16 %v6575_v5, %v6573_v2  ;;  %v6587_v18 = vadd.f32 %v1956_v15, %v738_v28  ;;  %2266 = vmatprep.subr.bf16.mxu1 %v4971_v41  ;;  %v4994_v28 = vcombine.low %v616_v43, %v628_v44  ;;  %v5043_v63 = vcombine.high %v664_v57, %v676_v59  ;;  %v688_v7 = vld [vmem:[#allocation7 + $0x598] sm:$0xff] }
 0x204   : > { %v2970_v20 = vpack.c.bf16 %v6585_v14, %v6577_v6  ;;  %2267 = vmatpush1.bf16.msra.mxu1 %v4970_v48  ;;  %v5042_v9 = vcombine.low %v664_v57, %v676_v59  ;;  %v742_v12 = vrot.slane %v702_v1, %v6501_v29  ;;  %v5067_v15 = vcombine.high %v688_v7, %v700_v8 }
 0x205   : > { %v3081_v24 = vpack.c.bf16 %v6587_v18, %v6581_v11  ;;  %2268 = vmatprep.subr.bf16.mxu1 %v4995_v51  ;;  %v5066_v36 = vcombine.low %v688_v7, %v700_v8  ;;  %v790_v14 = vrot.slane %v6650_v50, %v6550_v23 }
 0x208   : > { %2269 = vmatpush1.bf16.msra.mxu1 %v4994_v28 }
 0x209   : > { %2270 = vmatprep.subr.bf16.mxu1 %v5019_v10 }
 0x20c   : > { %2271 = vmatpush1.bf16.msra.mxu1 %v5018_v61 }
 0x20d   : > { %2272 = vmatprep.subr.bf16.mxu1 %v5043_v63 }
 0x210   : > { %2273 = vmatpush1.bf16.msra.mxu1 %v5042_v9 }
 0x211   : > { %2274 = vmatprep.subr.bf16.mxu1 %v5067_v15 }
 0x214   : > { %2275 = vmatpush1.bf16.msra.mxu1 %v5066_v36 }
 0x215   : > { %5389 = vmatprep.subr.bf16.mxu1 %v6117_v27 }
 0x217   : > { %2293 = vmatmul.mubr.bf16.vlgmr.msra.gmra.mrb[20].mxu1 %v6471_v16  ;;  %v758_v16 = vrot.slane %v702_v1, %v6550_v23 }
 0x218   : > { %5391 = vmatprep.mubr.msk.bf16.mxu1 %vm6118_vm1, %v6117_v27 }
 0x21d   : > { %v1993_v17 = vpop.f32.mrb[8].mxu0 }
 0x21e   : > { %v1995_v22 = vpop.f32.mrb[9].mxu0  ;;  %v1994_v37 = vadd.f32 %v1993_v17, %v742_v12 }
 0x21f   : > { %v1997_v35 = vpop.f32.mrb[10].mxu0  ;;  %v2036_v43 = vpop.f32.mrb[8].mxu1  ;;  %v1996_v44 = vadd.f32 %v1995_v22, %v746_v19 }
 0x220   : > { %v1998_v40 = vadd.f32 %v1997_v35, %v742_v12  ;;  %v1999_v41 = vpop.f32.mrb[11].mxu0  ;;  %v2037_v51 = vadd.f32 %v2036_v43, %v750_v21  ;;  %v2038_v54 = vpop.f32.mrb[9].mxu1 }
 0x221   : > { %v2000_v48 = vadd.f32 %v1999_v41, %v746_v19  ;;  %v2039_v28 = vadd.f32 %v2038_v54, %v754_v25  ;;  %v2040_v10 = vpop.f32.mrb[10].mxu1 }
 0x222   : > { %v2304_v56 = vpack.c.bf16 %v1998_v40, %v1994_v37  ;;  %v2041_v59 = vadd.f32 %v2040_v10, %v750_v21  ;;  %v2042_v61 = vpop.f32.mrb[11].mxu1 }
 0x223   : > { %v2416_v57 = vpack.c.bf16 %v2000_v48, %v1996_v44  ;;  %v2043_v63 = vadd.f32 %v2042_v61, %v754_v25 }
 0x224   : > { %5384 = vmatpush3.bf16.xpose.msra.mxu0 %v2304_v56  ;;  %v2527_v7 = vpack.c.bf16 %v2041_v59, %v2037_v51 }
 0x225   : > { %5395 = vmatprep.subr.bf16.mxu0 %v6117_v27  ;;  %v2638_v8 = vpack.c.bf16 %v2043_v63, %v2039_v28 }
 0x22b   : > { %5386 = vmatmul.mubr.bf16.vlgmr.msra.gmra.mrb[24].mxu0 %v2303_v49 }
 0x22c   : > { %5396 = vmatpush3.bf16.xpose.msra.mxu0 %v2416_v57  ;;  %5397 = vmatprep.mubr.msk.bf16.mxu0 %vm6118_vm1, %v6117_v27 }
 0x22d   : > { %5407 = vmatprep.subr.bf16.mxu0 %v6117_v27 }
 0x233   : > { %5398 = vmatmul.mubr.bf16.vlgmr.msra.gmra.mrb[28].mxu0 %v2415_v52  ;;  %v770_v52 = vrot.slane %v702_v1, %v6561_v39 }
 0x234   : > { %5408 = vmatpush3.bf16.xpose.msra.mxu0 %v2527_v7  ;;  %5409 = vmatprep.mubr.msk.bf16.mxu0 %vm6118_vm1, %v6117_v27 }
 0x235   : > { %5419 = vmatprep.subr.bf16.mxu0 %v6117_v27 }
 0x23b   : > { %5410 = vmatmul.mubr.bf16.vlgmr.msra.gmra.mrb[32].mxu0 %v2526_v62 }
 0x23c   : > { %5420 = vmatpush3.bf16.xpose.msra.mxu0 %v2638_v8  ;;  %5421 = vmatprep.mubr.msk.bf16.mxu0 %vm6118_vm1, %v6117_v27 }
 0x23d   : > { %v2079_v42 = vpop.f32.mrb[12].mxu0  ;;  %5431 = vmatprep.subr.bf16.mxu0 %v6117_v27 }
 0x23e   : > { %v2080_v46 = vadd.f32 %v2079_v42, %v758_v16  ;;  %v2081_v49 = vpop.f32.mrb[13].mxu0 }
 0x23f   : > { %v2082_v9 = vadd.f32 %v2081_v49, %v762_v38  ;;  %v2083_v12 = vpop.f32.mrb[14].mxu0  ;;  %v2122_v53 = vpop.f32.mrb[12].mxu1 }
 0x240   : > { %v2084_v15 = vadd.f32 %v2083_v12, %v758_v16  ;;  %v2085_v47 = vpop.f32.mrb[15].mxu0  ;;  %v2123_v17 = vadd.f32 %v2122_v53, %v766_v45  ;;  %v2124_v19 = vpop.f32.mrb[13].mxu1 }
 0x241   : > { %v2086_v62 = vadd.f32 %v2085_v47, %v762_v38  ;;  %v2125_v22 = vadd.f32 %v2124_v19, %v770_v52  ;;  %v2126_v25 = vpop.f32.mrb[14].mxu1 }
 0x242   : > { %v2749_v21 = vpack.c.bf16 %v2084_v15, %v2080_v46  ;;  %v2127_v36 = vadd.f32 %v2126_v25, %v766_v45  ;;  %v2128_v37 = vpop.f32.mrb[15].mxu1 }
 0x243   : > { %v2860_v35 = vpack.c.bf16 %v2086_v62, %v2082_v9  ;;  %5422 = vmatmul.mubr.bf16.vlgmr.msra.gmra.mrb[36].mxu0 %v2637_v4  ;;  %v2129_v1 = vadd.f32 %v2128_v37, %v770_v52  ;;  %v778_v4 = vrot.slane %v6650_v50, %v6509_v31 }
 0x244   : > { %5432 = vmatpush3.bf16.xpose.msra.mxu0 %v2749_v21  ;;  %5433 = vmatprep.mubr.msk.bf16.mxu0 %vm6118_vm1, %v6117_v27  ;;  %v2971_v40 = vpack.c.bf16 %v2127_v36, %v2123_v17 }
 0x245   : > { %5443 = vmatprep.subr.bf16.mxu0 %v6117_v27  ;;  %v3082_v41 = vpack.c.bf16 %v2129_v1, %v2125_v22 }
 0x24b   : > { %5434 = vmatmul.mubr.bf16.vlgmr.msra.gmra.mrb[40].mxu0 %v2748_v30 }
 0x24c   : > { %5444 = vmatpush3.bf16.xpose.msra.mxu0 %v2860_v35  ;;  %5445 = vmatprep.mubr.msk.bf16.mxu0 %vm6118_vm1, %v6117_v27 }
 0x24d   : > { %5455 = vmatprep.subr.bf16.mxu0 %v6117_v27 }
 0x253   : > { %5446 = vmatmul.mubr.bf16.vlgmr.msra.gmra.mrb[44].mxu0 %v2859_v13 }
 0x254   : > { %5456 = vmatpush3.bf16.xpose.msra.mxu0 %v2971_v40  ;;  %5457 = vmatprep.mubr.msk.bf16.mxu0 %vm6118_vm1, %v6117_v27 }
 0x255   : > { %5467 = vmatprep.subr.bf16.mxu0 %v6117_v27 }
 0x25b   : > { %5458 = vmatmul.mubr.bf16.vlgmr.msra.gmra.mrb[48].mxu0 %v2970_v20  ;;  %v794_v20 = vrot.slane %v6650_v50, %v6553_v26 }
 0x25c   : > { %5468 = vmatpush3.bf16.xpose.msra.mxu0 %v3082_v41  ;;  %5469 = vmatprep.mubr.msk.bf16.mxu0 %vm6118_vm1, %v6117_v27 }
 0x25d   : > { %v2165_v55 = vpop.f32.mrb[16].mxu0 }
 0x25e   : > { %v2166_v60 = vadd.f32 %v2165_v55, %v774_v58  ;;  %v2167_v2 = vpop.f32.mrb[17].mxu0 }
 0x25f   : > { %v6661_v5 = vadd.f32 %v2167_v2, %v778_v4  ;;  %v2169_v30 = vpop.f32.mrb[18].mxu0 }
 0x260   : > { %v2170_v13 = vadd.f32 %v2169_v30, %v774_v58  ;;  %v2171_v43 = vpop.f32.mrb[19].mxu0 }
 0x261   : > { %v6663_v44 = vadd.f32 %v2171_v43, %v778_v4 }
 0x262   : > { %v2305_v48 = vpack.c.bf16 %v2170_v13, %v2166_v60 }
 0x263   : > { %5470 = vmatmul.mubr.bf16.vlgmr.msra.gmra.mrb[52].mxu0 %v3081_v24  ;;  %v2417_v6 = vpack.c.bf16 %v6663_v44, %v6661_v5 }
 0x264   : > { %5390 = vmatpush3.bf16.msra.mxu1 %v2305_v48 }
 0x265   : > { %5401 = vmatprep.subr.bf16.mxu1 %v6117_v27 }
 0x27d   : > { %v2251_v51 = vpop.f32.mrb[20].mxu0 }
 0x27e   : > { %v6675_v54 = vadd.f32 %v2251_v51, %v790_v14  ;;  %v2253_v56 = vpop.f32.mrb[21].mxu0 }
 0x27f   : > { %v6677_v28 = vadd.f32 %v2253_v56, %v794_v20  ;;  %v2255_v11 = vpop.f32.mrb[22].mxu0 }
 0x280   : > { %v6679_v18 = vadd.f32 %v2255_v11, %v790_v14  ;;  %v2257_v24 = vpop.f32.mrb[23].mxu0 }
 0x281   : > { %v6681_v10 = vadd.f32 %v2257_v24, %v794_v20 }
 0x282   : > { %v2750_v27 = vpack.c.bf16 %v6679_v18, %v6675_v54 }
 0x283   : > { %v2861_v23 = vpack.c.bf16 %v6681_v10, %v6677_v28 }
 0x2fe   : > { %v6687_v26 = vpop.f32.mrb[24].mxu0 }
 0x2ff   : > { %v5387_v57 = vpop.f32.mrb[25].mxu0  ;;  %v2348_v59 = vsel %vm2347_vm2, %v6687_v26, -inf }
 0x300   : > { %2349 = vmax.xlane.f32.xlu0 %v2348_v59  ;;  %v6691_v61 = vpop.f32.mrb[26].mxu0 }
 0x301   : > { %v5388_v63 = vpop.f32.mrb[27].mxu0  ;;  %v2351_v7 = vsel %vm2347_vm2, %v6691_v61, -inf }
 0x304   : > { %2352 = vmax.xlane.f32.xlu0 %v2351_v7 }
 0x306   : > { %v6695_v8 = vpop.f32.mrb[28].mxu0 }
 0x307   : > { %v5399_v16 = vpop.f32.mrb[29].mxu0  ;;  %v2459_v38 = vsel %vm2347_vm2, %v6695_v8, -inf }
 0x308   : > { %2460 = vmax.xlane.f32.xlu1 %v2459_v38  ;;  %v6699_v42 = vpop.f32.mrb[30].mxu0 }
 0x309   : > { %v5400_v45 = vpop.f32.mrb[31].mxu0  ;;  %v2462_v46 = vsel %vm2347_vm2, %v6699_v42, -inf }
 0x30c   : > { %2463 = vmax.xlane.f32.xlu1 %v2462_v46 }
 0x30e   : > { %v6703_v49 = vpop.f32.mrb[32].mxu0 }
 0x30f   : > { %v5411_v52 = vpop.f32.mrb[33].mxu0  ;;  %v2570_v9 = vsel %vm2347_vm2, %v6703_v49, -inf }
 0x310   : > { %2571 = vmax.xlane.f32.xlu0 %v2570_v9  ;;  %v6707_v12 = vpop.f32.mrb[34].mxu0 }
 0x311   : > { %v5412_v15 = vpop.f32.mrb[35].mxu0  ;;  %v2573_v47 = vsel %vm2347_vm2, %v6707_v12, -inf }
 0x312   : > { %2574 = vmax.xlane.f32.xlu1 %v2573_v47 }
 0x316   : > { %v6711_v53 = vpop.f32.mrb[36].mxu0 }
 0x317   : > { %v5423_v62 = vpop.f32.mrb[37].mxu0  ;;  %v2681_v17 = vsel %vm2347_vm2, %v6711_v53, -inf }
 0x318   : > { %2682 = vmax.xlane.f32.xlu0 %v2681_v17  ;;  %v6715_v19 = vpop.f32.mrb[38].mxu0 }
 0x319   : > { %v5424_v21 = vpop.f32.mrb[39].mxu0  ;;  %v2684_v22 = vsel %vm2347_vm2, %v6715_v19, -inf }
 0x31a   : > { %2685 = vmax.xlane.f32.xlu1 %v2684_v22 }
 0x31e   : > { %v6719_v25 = vpop.f32.mrb[40].mxu0 }
 0x31f   : > { %v5435_v35 = vpop.f32.mrb[41].mxu0  ;;  %v2792_v36 = vsel %vm2347_vm2, %v6719_v25, -inf }
 0x320   : > { %2793 = vmax.xlane.f32.xlu0 %v2792_v36  ;;  %v6723_v37 = vpop.f32.mrb[42].mxu0 }
 0x321   : > { %v5436_v1 = vpop.f32.mrb[43].mxu0  ;;  %v2795_v40 = vsel %vm2347_vm2, %v6723_v37, -inf }
 0x322   : > { %2796 = vmax.xlane.f32.xlu1 %v2795_v40 }
 0x326   : > { %v6727_v41 = vpop.f32.mrb[44].mxu0 }
 0x327   : > { %v5447_v58 = vpop.f32.mrb[45].mxu0  ;;  %v2903_v4 = vsel %vm2347_vm2, %v6727_v41, -inf }
 0x328   : > { %2904 = vmax.xlane.f32.xlu0 %v2903_v4  ;;  %v6731_v55 = vpop.f32.mrb[46].mxu0 }
 0x329   : > { %v5448_v60 = vpop.f32.mrb[47].mxu0  ;;  %v2906_v2 = vsel %vm2347_vm2, %v6731_v55, -inf }
 0x32a   : > { %2907 = vmax.xlane.f32.xlu1 %v2906_v2 }
 0x32e   : > { %v6735_v30 = vpop.f32.mrb[48].mxu0 }
 0x32f   : > { %v5459_v13 = vpop.f32.mrb[49].mxu0  ;;  %v3014_v43 = vsel %vm2347_vm2, %v6735_v30, -inf }
 0x330   : > { %3015 = vmax.xlane.f32.xlu0 %v3014_v43  ;;  %v6739_v48 = vpop.f32.mrb[50].mxu0 }
 0x331   : > { %v5460_v14 = vpop.f32.mrb[51].mxu0  ;;  %v3017_v20 = vsel %vm2347_vm2, %v6739_v48, -inf }
 0x332   : > { %3018 = vmax.xlane.f32.xlu1 %v3017_v20 }
 0x336   : > { %v6743_v51 = vpop.f32.mrb[52].mxu0 }
 0x337   : > { %v5471_v56 = vpop.f32.mrb[53].mxu0  ;;  %v3125_v11 = vsel %vm2347_vm2, %v6743_v51, -inf }
 0x338   : > { %3126 = vmax.xlane.f32.xlu0 %v3125_v11  ;;  %v6747_v24 = vpop.f32.mrb[54].mxu0 }
 0x339   : > { %v5472_v57 = vpop.f32.mrb[55].mxu0  ;;  %v3128_v59 = vsel %vm2347_vm2, %v6747_v24, -inf }
 0x33a   : > { %3129 = vmax.xlane.f32.xlu1 %v3128_v59 }
 0x38d   : > { %v2350_v63 = vpop.xlane.xlu0 %2349 }
 0x38e   : > { %v2354_v7 = vsub.f32 %v6687_v26, %v2350_v63 }
 0x390   : > { %v2356_v16 = vmul.f32 1.442695, %v2354_v7 }
 0x391   : > { %v2353_v38 = vpop.xlane.xlu0 %2352 }
 0x392   : > { %5662 = vpow2.f32 %v2356_v16  ;;  %v2355_v45 = vsub.f32 %v6691_v61, %v2353_v38 }
 0x394   : > { %v2358_v46 = vmul.f32 1.442695, %v2355_v45 }
 0x395   : > { %v2461_v52 = vpop.xlane.xlu1 %2460 }
 0x396   : > { %5664 = vpow2.f32 %v2358_v46  ;;  %v2465_v9 = vsub.f32 %v6695_v8, %v2461_v52 }
 0x398   : > { %v2467_v15 = vmul.f32 1.442695, %v2465_v9 }
 0x399   : > { %v2464_v47 = vpop.xlane.xlu1 %2463 }
 0x39a   : > { %5666 = vpow2.f32 %v2467_v15  ;;  %v2466_v62 = vsub.f32 %v6699_v42, %v2464_v47 }
 0x39c   : > { %v6755_v17 = vpop.eup %5662  ;;  %v2469_v21 = vmul.f32 1.442695, %v2466_v62 }
 0x39d   : > { %v2572_v22 = vpop.xlane.xlu0 %2571  ;;  %v2360_v26 = vsel %vm2347_vm2, %v6755_v17, 0.0 }
 0x39e   : > { %5668 = vpow2.f32 %v2469_v21  ;;  %v2576_v61 = vsub.f32 %v6703_v49, %v2572_v22  ;;  %2361 = vadd.xlane.f32.xlu0 %v2360_v26 }
 0x39f   : > { %v2575_v35 = vpop.xlane.xlu1 %2574 }
 0x3a0   : > { %v6760_v36 = vpop.eup %5664  ;;  %v2578_v8 = vmul.f32 1.442695, %v2576_v61  ;;  %v2577_v1 = vsub.f32 %v6707_v12, %v2575_v35 }
 0x3a1   : > { %v2363_v42 = vsel %vm2347_vm2, %v6760_v36, 0.0 }
 0x3a2   : > { %5670 = vpow2.f32 %v2578_v8  ;;  %v2580_v40 = vmul.f32 1.442695, %v2577_v1  ;;  %2364 = vadd.xlane.f32.xlu1 %v2363_v42 }
 0x3a4   : > { %v6765_v58 = vpop.eup %5666  ;;  %5672 = vpow2.f32 %v2580_v40 }
 0x3a5   : > { %v2683_v4 = vpop.xlane.xlu0 %2682  ;;  %v2471_v49 = vsel %vm2347_vm2, %v6765_v58, 0.0 }
 0x3a6   : > { %v2687_v60 = vsub.f32 %v6711_v53, %v2683_v4  ;;  %2472 = vadd.xlane.f32.xlu0 %v2471_v49  ;;  %v2208_v4 = vpop.f32.mrb[16].mxu1 }
 0x3a7   : > { %v2686_v2 = vpop.xlane.xlu1 %2685  ;;  %v2210_v49 = vpop.f32.mrb[17].mxu1 }
 0x3a8   : > { %v6770_v13 = vpop.eup %5668  ;;  %v2689_v12 = vmul.f32 1.442695, %v2687_v60  ;;  %v2688_v43 = vsub.f32 %v6715_v19, %v2686_v2  ;;  %v782_v2 = vrot.slane %v6650_v50, %v6512_v32 }
 0x3a9   : > { %v2474_v14 = vsel %vm2347_vm2, %v6770_v13, 0.0 }
 0x3aa   : > { %5674 = vpow2.f32 %v2689_v12  ;;  %v2691_v20 = vmul.f32 1.442695, %v2688_v43  ;;  %2475 = vadd.xlane.f32.xlu1 %v2474_v14  ;;  %v2212_v14 = vpop.f32.mrb[18].mxu1 }
 0x3ac   : > { %v6775_v56 = vpop.eup %5670  ;;  %5676 = vpow2.f32 %v2691_v20 }
 0x3ad   : > { %v2794_v11 = vpop.xlane.xlu0 %2793  ;;  %v2582_v53 = vsel %vm2347_vm2, %v6775_v56, 0.0 }
 0x3ae   : > { %v6779_v57 = vpop.eup %5672  ;;  %v2798_v59 = vsub.f32 %v6719_v25, %v2794_v11  ;;  %2583 = vadd.xlane.f32.xlu0 %v2582_v53  ;;  %v6816_v11 = vadd.f32 %v2208_v4, %v782_v2 }
 0x3af   : > { %v2797_v63 = vpop.xlane.xlu1 %2796  ;;  %v2585_v19 = vsel %vm2347_vm2, %v6779_v57, 0.0 }
 0x3b0   : > { %v2800_v7 = vmul.f32 1.442695, %v2798_v59  ;;  %v2799_v16 = vsub.f32 %v6723_v37, %v2797_v63  ;;  %2586 = vadd.xlane.f32.xlu1 %v2585_v19  ;;  %v2214_v59 = vpop.f32.mrb[19].mxu1 }
 0x3b2   : > { %5678 = vpow2.f32 %v2800_v7  ;;  %v2802_v38 = vmul.f32 1.442695, %v2799_v16 }
 0x3b4   : > { %v6785_v45 = vpop.eup %5674  ;;  %5680 = vpow2.f32 %v2802_v38 }
 0x3b5   : > { %v2905_v46 = vpop.xlane.xlu0 %2904  ;;  %v2693_v52 = vsel %vm2347_vm2, %v6785_v45, 0.0 }
 0x3b6   : > { %v6789_v9 = vpop.eup %5676  ;;  %v2909_v25 = vsub.f32 %v6727_v41, %v2905_v46  ;;  %2694 = vadd.xlane.f32.xlu0 %v2693_v52 }
 0x3b7   : > { %v2908_v15 = vpop.xlane.xlu1 %2907  ;;  %v2696_v47 = vsel %vm2347_vm2, %v6789_v9, 0.0 }
 0x3b8   : > { %v2911_v37 = vmul.f32 1.442695, %v2909_v25  ;;  %v2910_v62 = vsub.f32 %v6731_v55, %v2908_v15  ;;  %2697 = vadd.xlane.f32.xlu1 %v2696_v47 }
 0x3ba   : > { %5682 = vpow2.f32 %v2911_v37  ;;  %v2913_v21 = vmul.f32 1.442695, %v2910_v62 }
 0x3bc   : > { %v6795_v22 = vpop.eup %5678  ;;  %5684 = vpow2.f32 %v2913_v21 }
 0x3bd   : > { %v3016_v26 = vpop.xlane.xlu0 %3015  ;;  %v2804_v61 = vsel %vm2347_vm2, %v6795_v22, 0.0 }
 0x3be   : > { %v6799_v35 = vpop.eup %5680  ;;  %v3020_v41 = vsub.f32 %v6735_v30, %v3016_v26  ;;  %2805 = vadd.xlane.f32.xlu0 %v2804_v61  ;;  %v786_v30 = vrot.slane %v6650_v50, %v6517_v34  ;;  %v6822_v34 = vadd.f32 %v2212_v14, %v782_v2  ;;  %v2294_v61 = vpop.f32.mrb[20].mxu1  ;;  %v5600_v14 = vld [vmem:[#allocation9 + $0x48] sm:$0xff]  }
 0x3bf   : > { %v3019_v8 = vpop.xlane.xlu1 %3018  ;;  %v2807_v1 = vsel %vm2347_vm2, %v6799_v35, 0.0 }
 0x3c0   : > { %v3022_v55 = vmul.f32 1.442695, %v3020_v41  ;;  %v3021_v42 = vsub.f32 %v6739_v48, %v3019_v8  ;;  %2808 = vadd.xlane.f32.xlu1 %v2807_v1  ;;  %v6818_v53 = vadd.f32 %v2210_v49, %v786_v30  ;;  %v6824_v7 = vadd.f32 %v2214_v59, %v786_v30  ;;  %v2296_v41 = vpop.f32.mrb[21].mxu1  ;;  %v5604_v59 = vld [vmem:[#allocation9 + $0x58] sm:$0xff]  }
 0x3c1   : > { %v798_v8 = vrot.slane %v6650_v50, %v6556_v33  ;;  %v802_v1 = vrot.slane %v6650_v50, %v6561_v39  ;;  %v5598_v33 = vld [vmem:[#allocation9 + $0x40] sm:$0xff]   ;;  %v5601_v39 = vld [vmem:[#allocation9 + $0x8] sm:$0xff]   ;;  %v5602_v50 = vld [vmem:[#allocation9 + $0x50] sm:$0xff]  }
 0x3c2   : > { %5686 = vpow2.f32 %v3022_v55  ;;  %v3024_v40 = vmul.f32 1.442695, %v3021_v42  ;;  %v2639_v46 = vpack.c.bf16 %v6824_v7, %v6818_v53  ;;  %v2298_v55 = vpop.f32.mrb[22].mxu1  ;;  %5248 = vmatprep.subr.bf16.mxu0 %v5598_v33  ;;  %v6869_v33 = vld [vmem:[#allocation3] sm:$0xff] }
 0x3c3   : > { %v2300_v42 = vpop.f32.mrb[23].mxu1  ;;  %v6853_v4 = vadd.f32 %v2296_v41, %v802_v1  ;;  %v6855_v49 = vadd.f32 %v2298_v55, %v798_v8 }
 0x3c4   : > { %v6805_v60 = vpop.eup %5682  ;;  %5688 = vpow2.f32 %v3024_v40  ;;  %v6851_v40 = vadd.f32 %v2294_v61, %v798_v8  ;;  %v6857_v2 = vadd.f32 %v2300_v42, %v802_v1 }
 0x3c5   : > { %v3127_v12 = vpop.xlane.xlu0 %3126  ;;  %v2915_v43 = vsel %vm2347_vm2, %v6805_v60, 0.0 }
 0x3c6   : > { %v6813_v48 = vpop.eup %5684  ;;  %v3131_v20 = vsub.f32 %v6743_v51, %v3127_v12  ;;  %2916 = vadd.xlane.f32.xlu0 %v2915_v43  ;;  %v2528_v51 = vpack.c.bf16 %v6822_v34, %v6816_v11  ;;  %v2972_v30 = vpack.c.bf16 %v6855_v49, %v6851_v40  ;;  %v3083_v12 = vpack.c.bf16 %v6857_v2, %v6853_v4  ;;  %v5599_v43 = vld [vmem:[#allocation9] sm:$0xff]   ;;  %v5614_v4 = vld [vmem:[#allocation9 + $0x70] sm:$0xff]  }
 0x3c7   : > { %v3130_v63 = vpop.xlane.xlu1 %3129  ;;  %v2918_v19 = vsel %vm2347_vm2, %v6813_v48, 0.0  ;;  %5249 = vmatpush3.bf16.msra.mxu0 %v5599_v43  ;;  %v5609_v49 = vld [vmem:[#allocation9 + $0x80] sm:$0xff]   ;;  %v5615_v2 = vld [vmem:[#allocation9 + $0xd0] sm:$0xff]  }
 0x3c8   : > { %v3133_v16 = vmul.f32 1.442695, %v3131_v20  ;;  %v3132_v38 = vsub.f32 %v6747_v24, %v3130_v63  ;;  %2919 = vadd.xlane.f32.xlu1 %v2918_v19  ;;  %5250 = vmatprep.subr.bf16.mxu0 %v5600_v14  ;;  %v5603_v20 = vld [vmem:[#allocation9 + $0x10] sm:$0xff]   ;;  %v5605_v63 = vld [vmem:[#allocation9 + $0x18] sm:$0xff]   ;;  %v5606_v19 = vld [vmem:[#allocation9 + $0x60] sm:$0xff]  }
 0x3ca   : > { %5690 = vpow2.f32 %v3133_v16  ;;  %v3135_v52 = vmul.f32 1.442695, %v3132_v38  ;;  %v5608_v16 = vld [vmem:[#allocation9 + $0x20] sm:$0xff]  }
 0x3cb   : > { %5251 = vmatpush3.bf16.msra.mxu0 %v5601_v39 }
 0x3cc   : > { %v6831_v25 = vpop.eup %5686  ;;  %5692 = vpow2.f32 %v3135_v52  ;;  %5252 = vmatprep.subr.bf16.mxu0 %v5602_v50 }
 0x3cd   : > { %v3026_v15 = vsel %vm2347_vm2, %v6831_v25, 0.0 }
 0x3ce   : > { %v6835_v47 = vpop.eup %5688  ;;  %3027 = vadd.xlane.f32.xlu0 %v3026_v15 }
 0x3cf   : > { %v3029_v24 = vsel %vm2347_vm2, %v6835_v47, 0.0  ;;  %5253 = vmatpush3.bf16.msra.mxu0 %v5603_v20 }
 0x3d0   : > { %3030 = vadd.xlane.f32.xlu1 %v3029_v24  ;;  %5254 = vmatprep.subr.bf16.mxu0 %v5604_v59 }
 0x3d3   : > { %5255 = vmatpush3.bf16.msra.mxu0 %v5605_v63 }
 0x3d4   : > { %v6839_v37 = vpop.eup %5690  ;;  %5256 = vmatprep.subr.bf16.mxu0 %v5606_v19 }
 0x3d5   : > { %v3137_v62 = vsel %vm2347_vm2, %v6839_v37, 0.0 }
 0x3d6   : > { %v6843_v21 = vpop.eup %5692  ;;  %3138 = vadd.xlane.f32.xlu0 %v3137_v62 }
 0x3d7   : > { %v3140_v26 = vsel %vm2347_vm2, %v6843_v21, 0.0  ;;  %5257 = vmatpush3.bf16.msra.mxu0 %v5608_v16 }
 0x3d8   : > { %3141 = vadd.xlane.f32.xlu1 %v3140_v26 }
 0x42b   : > { %v2362_v38 = vpop.xlane.xlu0 %2361 }
 0x42c   : > { %5694 = vrcp.f32 %v2362_v38 }
 0x42f   : > { %v2365_v52 = vpop.xlane.xlu1 %2364 }
 0x430   : > { %5696 = vrcp.f32 %v2365_v52 }
 0x433   : > { %v2473_v15 = vpop.xlane.xlu0 %2472 }
 0x434   : > { %5698 = vrcp.f32 %v2473_v15 }
 0x436   : > { %v5695_v62 = vpop.eup %5694 }
 0x437   : > { %v2476_v24 = vpop.xlane.xlu1 %2475  ;;  %v2368_v61 = vmul.f32 %v5695_v62, %v6755_v17 }
 0x438   : > { %5700 = vrcp.f32 %v2476_v24 }
 0x43a   : > { %v5697_v26 = vpop.eup %5696 }
 0x43b   : > { %v2369_v41 = vmul.f32 %v5697_v26, %v6760_v36  ;;  %v2584_v8 = vpop.xlane.xlu0 %2583 }
 0x43c   : > { %5702 = vrcp.f32 %v2584_v8  ;;  %v5613_v8 = vld [vmem:[#allocation9 + $0x88] sm:$0xff]  }
 0x43d   : > { %v2587_v1 = vpop.xlane.xlu1 %2586  ;;  %v2370_v55 = vpack.c.bf16 %v2369_v41, %v2368_v61  ;;  %v5611_v61 = vld [vmem:[#allocation9 + $0xc8] sm:$0xff]  }
 0x43e   : > { %5704 = vrcp.f32 %v2587_v1  ;;  %v5699_v42 = vpop.eup %5698  ;;  %v5612_v41 = vld [vmem:[#allocation9 + $0x28] sm:$0xff]   ;;  %v5619_v1 = vld [vmem:[#allocation9 + $0xd8] sm:$0xff]  }
 0x43f   : > { %5392 = vmatmul.mubr.msk.bf16.vlgmr.msra.gmra.mrb[24].mxu1 %vm2347_vm2, %v2370_v55  ;;  %v2479_v36 = vmul.f32 %v5699_v42, %v6765_v58  ;;  %v5620_v55 = vld [vmem:[#allocation9 + $0x38] sm:$0xff]  }
 0x440   : > { %5402 = vmatpush3.bf16.msra.mxu1 %v2417_v6  ;;  %5403 = vmatprep.mubr.msk.bf16.mxu1 %vm6118_vm1, %v6869_v33  ;;  %v5621_v42 = vld [vmem:[#allocation9 + $0x98] sm:$0xff]  }
 0x441   : > { %5413 = vmatprep.subr.bf16.mxu1 %v6869_v33 }
 0x442   : > { %v5701_v17 = vpop.eup %5700 }
 0x443   : > { %v2480_v43 = vmul.f32 %v5701_v17, %v6770_v13  ;;  %v2695_v14 = vpop.xlane.xlu0 %2694  ;;  %v5623_v17 = vld [vmem:[#allocation9 + $0x140] sm:$0xff]  }
 0x444   : > { %5706 = vrcp.f32 %v2695_v14  ;;  %v5628_v14 = vld [vmem:[#allocation9 + $0xa8] sm:$0xff]  }
 0x445   : > { %v2698_v39 = vpop.xlane.xlu1 %2697  ;;  %v2481_v50 = vpack.c.bf16 %v2480_v43, %v2479_v36  ;;  %v5624_v36 = vld [vmem:[#allocation9 + $0xa0] sm:$0xff]   ;;  %v5626_v43 = vld [vmem:[#allocation9 + $0xe8] sm:$0xff]  }
 0x446   : > { %5708 = vrcp.f32 %v2698_v39  ;;  %v5703_v20 = vpop.eup %5702  ;;  %v5630_v39 = vld [vmem:[#allocation9 + $0xf0] sm:$0xff]  }
 0x447   : > { %5404 = vmatmul.mubr.msk.bf16.vlgmr.msra.gmra.mrb[28].mxu1 %vm2347_vm2, %v2481_v50  ;;  %v2590_v6 = vmul.f32 %v5703_v20, %v6775_v56  ;;  %v5632_v50 = vld [vmem:[#allocation9 + $0xb0] sm:$0xff]   ;;  %v5634_v20 = vld [vmem:[#allocation9 + $0xf8] sm:$0xff]  }
 0x448   : > { %v5705_v5 = vpop.eup %5704  ;;  %5414 = vmatpush3.bf16.msra.mxu1 %v2528_v51  ;;  %5415 = vmatprep.mubr.msk.bf16.mxu1 %vm6118_vm1, %v6869_v33 }
 0x449   : > { %v2591_v44 = vmul.f32 %v5705_v5, %v6779_v57  ;;  %5425 = vmatprep.subr.bf16.mxu1 %v6869_v33  ;;  %v5636_v5 = vld [vmem:[#allocation9 + $0xb8] sm:$0xff]  }
 0x44b   : > { %v2806_v58 = vpop.xlane.xlu0 %2805  ;;  %v2592_v59 = vpack.c.bf16 %v2591_v44, %v2590_v6  ;;  %v5639_v44 = vld [vmem:[#allocation9 + $0x1c0] sm:$0xff]  }
 0x44c   : > { %5710 = vrcp.f32 %v2806_v58 }
 0x44d   : > { %v2809_v13 = vpop.xlane.xlu1 %2808 }
 0x44e   : > { %5712 = vrcp.f32 %v2809_v13  ;;  %v5707_v63 = vpop.eup %5706 }
 0x44f   : > { %5416 = vmatmul.mubr.msk.bf16.vlgmr.msra.gmra.mrb[32].mxu1 %vm2347_vm2, %v2592_v59  ;;  %v2701_v56 = vmul.f32 %v5707_v63, %v6785_v45 }
 0x450   : > { %v5709_v19 = vpop.eup %5708  ;;  %5426 = vmatpush3.bf16.msra.mxu1 %v2639_v46  ;;  %5427 = vmatprep.mubr.msk.bf16.mxu1 %vm6118_vm1, %v6869_v33 }
 0x451   : > { %v2702_v57 = vmul.f32 %v5709_v19, %v6789_v9  ;;  %5437 = vmatprep.subr.bf16.mxu1 %v6869_v33 }
 0x453   : > { %v2917_v11 = vpop.xlane.xlu0 %2916  ;;  %v2703_v51 = vpack.c.bf16 %v2702_v57, %v2701_v56 }
 0x454   : > { %5714 = vrcp.f32 %v2917_v11 }
 0x455   : > { %v2920_v34 = vpop.xlane.xlu1 %2919 }
 0x456   : > { %5716 = vrcp.f32 %v2920_v34  ;;  %v5711_v16 = vpop.eup %5710 }
 0x457   : > { %5428 = vmatmul.mubr.msk.bf16.vlgmr.msra.gmra.mrb[36].mxu1 %vm2347_vm2, %v2703_v51  ;;  %v2812_v45 = vmul.f32 %v5711_v16, %v6795_v22  ;;  %v5625_v51 = vld [vmem:[#allocation9 + $0x100] sm:$0xff]   ;;  %v5627_v16 = vld [vmem:[#allocation9 + $0x148] sm:$0xff]  }
 0x458   : > { %v5713_v38 = vpop.eup %5712  ;;  %5438 = vmatpush3.bf16.msra.mxu1 %v2750_v27  ;;  %5439 = vmatprep.mubr.msk.bf16.mxu1 %vm6118_vm1, %v6869_v33 }
 0x459   : > { %v2813_v9 = vmul.f32 %v5713_v38, %v6799_v35  ;;  %5449 = vmatprep.subr.bf16.mxu1 %v6869_v33  ;;  %v5629_v38 = vld [vmem:[#allocation9 + $0x108] sm:$0xff]  }
 0x45b   : > { %v3028_v53 = vpop.xlane.xlu0 %3027  ;;  %v2814_v46 = vpack.c.bf16 %v2813_v9, %v2812_v45  ;;  %v5631_v45 = vld [vmem:[#allocation9 + $0x150] sm:$0xff]  }
 0x45c   : > { %5718 = vrcp.f32 %v3028_v53 }
 0x45d   : > { %v3031_v7 = vpop.xlane.xlu1 %3030 }
 0x45e   : > { %5720 = vrcp.f32 %v3031_v7  ;;  %v5715_v52 = vpop.eup %5714 }
 0x45f   : > { %5440 = vmatmul.mubr.msk.bf16.vlgmr.msra.gmra.mrb[40].mxu1 %vm2347_vm2, %v2814_v46  ;;  %v2923_v18 = vmul.f32 %v5715_v52, %v6805_v60  ;;  %v5607_v60 = vld [vmem:[#allocation9 + $0xc0] sm:$0xff]  }
 0x460   : > { %v5717_v15 = vpop.eup %5716  ;;  %5450 = vmatpush3.bf16.msra.mxu1 %v2861_v23  ;;  %5451 = vmatprep.mubr.msk.bf16.mxu1 %vm6118_vm1, %v6869_v33 }
 0x461   : > { %v2924_v54 = vmul.f32 %v5717_v15, %v6813_v48  ;;  %5461 = vmatprep.subr.bf16.mxu1 %v6869_v33  ;;  %v5633_v15 = vld [vmem:[#allocation9 + $0x110] sm:$0xff]  }
 0x463   : > { %v3139_v27 = vpop.xlane.xlu0 %3138  ;;  %v2925_v35 = vpack.c.bf16 %v2924_v54, %v2923_v18  ;;  %v5635_v54 = vld [vmem:[#allocation9 + $0x158] sm:$0xff]  }
 0x464   : > { %5722 = vrcp.f32 %v3139_v27  ;;  %v5637_v18 = vld [vmem:[#allocation9 + $0x118] sm:$0xff]  }
 0x465   : > { %v3142_v22 = vpop.xlane.xlu1 %3141 }
 0x466   : > { %5724 = vrcp.f32 %v3142_v22  ;;  %v5719_v24 = vpop.eup %5718  ;;  %v5638_v22 = vld [vmem:[#allocation9 + $0x160] sm:$0xff]  }
 0x467   : > { %5452 = vmatmul.mubr.msk.bf16.vlgmr.msra.gmra.mrb[44].mxu1 %vm2347_vm2, %v2925_v35  ;;  %v3034_v10 = vmul.f32 %v5719_v24, %v6831_v25 }
 0x468   : > { %v5721_v62 = vpop.eup %5720  ;;  %5462 = vmatpush3.bf16.msra.mxu1 %v2972_v30  ;;  %5463 = vmatprep.mubr.msk.bf16.mxu1 %vm6118_vm1, %v6869_v33  ;;  %v5610_v30 = vld [vmem:[#allocation9 + $0x68] sm:$0xff]  }
 0x469   : > { %v3035_v28 = vmul.f32 %v5721_v62, %v6835_v47  ;;  %5473 = vmatprep.subr.bf16.mxu1 %v6869_v33  ;;  %5258 = vmatprep.subr.bf16.mxu0 %v5610_v30 }
 0x46a   : > { %5259 = vmatpush3.bf16.msra.mxu0 %v5612_v41 }
 0x46b   : > { %v3036_v23 = vpack.c.bf16 %v3035_v28, %v3034_v10  ;;  %5260 = vmatprep.subr.bf16.mxu0 %v5614_v4  ;;  %v5640_v10 = vld [vmem:[#allocation9 + $0x120] sm:$0xff]   ;;  %v5648_v4 = vld [vmem:[#allocation9 + $0x130] sm:$0xff]  }
 0x46e   : > { %v5723_v48 = vpop.eup %5722 }
 0x46f   : > { %5464 = vmatmul.mubr.msk.bf16.vlgmr.msra.gmra.mrb[48].mxu1 %vm2347_vm2, %v3036_v23  ;;  %v3145_v47 = vmul.f32 %v5723_v48, %v6839_v37  ;;  %v5618_v37 = vld [vmem:[#allocation9 + $0x78] sm:$0xff]   ;;  %v5641_v23 = vld [vmem:[#allocation9 + $0x180] sm:$0xff]   ;;  %v5643_v48 = vld [vmem:[#allocation9 + $0x1c8] sm:$0xff]  }
 0x470   : > { %v5725_v26 = vpop.eup %5724  ;;  %5474 = vmatpush3.bf16.msra.mxu1 %v3083_v12  ;;  %5475 = vmatprep.mubr.msk.bf16.mxu1 %vm6118_vm1, %v6869_v33  ;;  %v5616_v12 = vld [vmem:[#allocation9 + $0x30] sm:$0xff]   ;;  %v5622_v33 = vld [vmem:[#allocation9 + $0xe0] sm:$0xff]  }
 0x471   : > { %v3146_v40 = vmul.f32 %v5725_v26, %v6843_v21  ;;  %5270 = vmatprep.subr.bf16.mxu1 %v5607_v60  ;;  %v5617_v21 = vld [vmem:[#allocation9 + $0x90] sm:$0xff]   ;;  %5261 = vmatpush3.bf16.msra.mxu0 %v5616_v12  ;;  %v5642_v60 = vld [vmem:[#allocation9 + $0x168] sm:$0xff]   ;;  %v5650_v12 = vld [vmem:[#allocation9 + $0x178] sm:$0xff]  }
 0x472   : > { %5262 = vmatprep.subr.bf16.mxu0 %v5618_v37  ;;  %v5644_v26 = vld [vmem:[#allocation9 + $0x128] sm:$0xff]   ;;  %v5652_v37 = vld [vmem:[#allocation9 + $0x138] sm:$0xff]  }
 0x473   : > { %v3147_v25 = vpack.c.bf16 %v3146_v40, %v3145_v47  ;;  %v5645_v40 = vld [vmem:[#allocation9 + $0x188] sm:$0xff]  }
 0x475   : > { %5263 = vmatpush3.bf16.msra.mxu0 %v5620_v55 }
 0x476   : > { %5292 = vmatprep.subr.bf16.mxu0 %v5623_v17 }
 0x477   : > { %5476 = vmatmul.mubr.msk.bf16.vlgmr.msra.gmra.mrb[52].mxu1 %vm2347_vm2, %v3147_v25  ;;  %v5647_v25 = vld [vmem:[#allocation9 + $0x1d0] sm:$0xff]  }
 0x478   : > { %5271 = vmatpush3.bf16.msra.mxu1 %v5609_v49  ;;  %v5646_v49 = vld [vmem:[#allocation9 + $0x170] sm:$0xff]  }
 0x479   : > { %5272 = vmatprep.subr.bf16.mxu1 %v5611_v61 }
 0x47c   : > { %5273 = vmatpush3.bf16.msra.mxu1 %v5613_v8 }
 0x47d   : > { %5274 = vmatprep.subr.bf16.mxu1 %v5615_v2  ;;  %v5649_v2 = vld [vmem:[#allocation9 + $0x190] sm:$0xff]  }
 0x480   : > { %5275 = vmatpush3.bf16.msra.mxu1 %v5617_v21  ;;  %v5651_v21 = vld [vmem:[#allocation9 + $0x1d8] sm:$0xff]  }
 0x481   : > { %5276 = vmatprep.subr.bf16.mxu1 %v5619_v1  ;;  %v5653_v1 = vld [vmem:[#allocation9 + $0x198] sm:$0xff]  }
 0x484   : > { %5277 = vmatpush3.bf16.msra.mxu1 %v5621_v42  ;;  %v5654_v42 = vld [vmem:[#allocation9 + $0x1e0] sm:$0xff]  }
 0x485   : > { %5278 = vmatprep.subr.bf16.mxu1 %v5622_v33 }
 0x488   : > { %5279 = vmatpush3.bf16.msra.mxu1 %v5624_v36 }
 0x489   : > { %5280 = vmatprep.subr.bf16.mxu1 %v5626_v43 }
 0x48c   : > { %5281 = vmatpush3.bf16.msra.mxu1 %v5628_v14  ;;  %v5655_v14 = vld [vmem:[#allocation9 + $0x1a0] sm:$0xff]  }
 0x48d   : > { %5282 = vmatprep.subr.bf16.mxu1 %v5630_v39  ;;  %v5656_v39 = vld [vmem:[#allocation9 + $0x1e8] sm:$0xff]  }
 0x490   : > { %5283 = vmatpush3.bf16.msra.mxu1 %v5632_v50  ;;  %v5657_v50 = vld [vmem:[#allocation9 + $0x1a8] sm:$0xff]  }
 0x491   : > { %5284 = vmatprep.subr.bf16.mxu1 %v5634_v20 }
 0x494   : > { %5285 = vmatpush3.bf16.msra.mxu1 %v5636_v5  ;;  %v5658_v5 = vld [vmem:[#allocation9 + $0x1f0] sm:$0xff]  }
 0x495   : > { %5314 = vmatprep.subr.bf16.mxu1 %v5639_v44 }
 0x512   : > { %v2408_v6 = vpop.f32.mrb[24].mxu1 }
 0x513   : > { %v5393_v58 = vpop.f32.mrb[25].mxu1 }
 0x514   : > { %v2411_v13 = vpop.f32.mrb[26].mxu1 }
 0x515   : > { %v3192_v59 = vpack.c.bf16 %v2411_v13, %v2408_v6  ;;  %v5394_v63 = vpop.f32.mrb[27].mxu1 }
 0x516   : > { %v5660_v63 = vld [vmem:[#allocation9 + $0x1f8] sm:$0xff]  }
 0x51a   : > { %v2519_v19 = vpop.f32.mrb[28].mxu1 }
 0x51b   : > { %v5405_v57 = vpop.f32.mrb[29].mxu1 }
 0x51c   : > { %v2522_v56 = vpop.f32.mrb[30].mxu1 }
 0x51d   : > { %v3193_v11 = vpack.c.bf16 %v2522_v56, %v2519_v19  ;;  %v5406_v34 = vpop.f32.mrb[31].mxu1  ;;  %v5661_v19 = vld [vmem:[#allocation9 + $0x1b8] sm:$0xff]  }
 0x51f   : > { %3748 = vmatprep.mubr.bf16.mxu0 %v3193_v11 }
 0x520   : > { %3749 = vmatmul.mubr.bf16.vlgmr.msra.gmra.mrb[56].mxu0 %v3192_v59  ;;  %v5659_v59 = vld [vmem:[#allocation9 + $0x1b0] sm:$0xff]  }
 0x521   : > { %5293 = vmatpush3.bf16.msra.mxu0 %v5625_v51 }
 0x522   : > { %v2630_v9 = vpop.f32.mrb[32].mxu1  ;;  %5294 = vmatprep.subr.bf16.mxu0 %v5627_v16 }
 0x523   : > { %v5417_v53 = vpop.f32.mrb[33].mxu1 }
 0x524   : > { %v2633_v7 = vpop.f32.mrb[34].mxu1 }
 0x525   : > { %v3194_v46 = vpack.c.bf16 %v2633_v7, %v2630_v9  ;;  %v5418_v52 = vpop.f32.mrb[35].mxu1  ;;  %5295 = vmatpush3.bf16.msra.mxu0 %v5629_v38 }
 0x526   : > { %5296 = vmatprep.subr.bf16.mxu0 %v5631_v45 }
 0x529   : > { %5297 = vmatpush3.bf16.msra.mxu0 %v5633_v15 }
 0x52a   : > { %v2741_v27 = vpop.f32.mrb[36].mxu1  ;;  %5298 = vmatprep.subr.bf16.mxu0 %v5635_v54 }
 0x52b   : > { %v5429_v35 = vpop.f32.mrb[37].mxu1 }
 0x52c   : > { %v2744_v24 = vpop.f32.mrb[38].mxu1 }
 0x52d   : > { %v3195_v62 = vpack.c.bf16 %v2744_v24, %v2741_v27  ;;  %v5430_v28 = vpop.f32.mrb[39].mxu1  ;;  %5299 = vmatpush3.bf16.msra.mxu0 %v5637_v18 }
 0x52e   : > { %5300 = vmatprep.subr.bf16.mxu0 %v5638_v22 }
 0x52f   : > { %3789 = vmatprep.mubr.bf16.mxu1 %v3195_v62 }
 0x530   : > { %3790 = vmatmul.mubr.bf16.vlgmr.msra.gmra.mrb[56].mxu1 %v3194_v46  ;;  %v508_v46 = vld [vmem:[#allocation10] sm:$0xff] }
 0x531   : > { %5301 = vmatpush3.bf16.msra.mxu0 %v5640_v10  ;;  %5315 = vmatpush3.bf16.msra.mxu1 %v5641_v23  ;;  %v3331_v52 = vrot.slane %v508_v46, %v6501_v29 }
 0x532   : > { %v2852_v47 = vpop.f32.mrb[40].mxu1  ;;  %5302 = vmatprep.subr.bf16.mxu0 %v5642_v60  ;;  %5316 = vmatprep.subr.bf16.mxu1 %v5643_v48 }
 0x533   : > { %v5441_v30 = vpop.f32.mrb[41].mxu1 }
 0x534   : > { %v2855_v61 = vpop.f32.mrb[42].mxu1 }
 0x535   : > { %v3196_v41 = vpack.c.bf16 %v2855_v61, %v2852_v47  ;;  %v5442_v8 = vpop.f32.mrb[43].mxu1  ;;  %5303 = vmatpush3.bf16.msra.mxu0 %v5644_v26  ;;  %5317 = vmatpush3.bf16.msra.mxu1 %v5645_v40 }
 0x536   : > { %5304 = vmatprep.subr.bf16.mxu0 %v5646_v49  ;;  %5318 = vmatprep.subr.bf16.mxu1 %v5647_v25 }
 0x539   : > { %5305 = vmatpush3.bf16.msra.mxu0 %v5648_v4  ;;  %5319 = vmatpush3.bf16.msra.mxu1 %v5649_v2 }
 0x53a   : > { %v2963_v55 = vpop.f32.mrb[44].mxu1  ;;  %5306 = vmatprep.subr.bf16.mxu0 %v5650_v12  ;;  %5320 = vmatprep.subr.bf16.mxu1 %v5651_v21  ;;  %v5731_v21 = vld [vmem:[#allocation4] sm:$0xff] }
 0x53b   : > { %v5453_v33 = vpop.f32.mrb[45].mxu1 }
 0x53c   : > { %v2966_v17 = vpop.f32.mrb[46].mxu1 }
 0x53d   : > { %v3197_v36 = vpack.c.bf16 %v2966_v17, %v2963_v55  ;;  %v5454_v43 = vpop.f32.mrb[47].mxu1  ;;  %5307 = vmatpush3.bf16.msra.mxu0 %v5652_v37  ;;  %5321 = vmatpush3.bf16.msra.mxu1 %v5653_v1  ;;  %v5732_v1 = vld [vmem:[#allocation4 + $0x8] sm:$0xff] }
 0x53e   : > { %5322 = vmatprep.subr.bf16.mxu1 %v5654_v42 }
 0x53f   : > { %3830 = vmatprep.mubr.bf16.mxu0 %v3197_v36 }
 0x540   : > { %3831 = vmatmul.mubr.bf16.vlgmr.msra.gmra.mrb[60].mxu0 %v3196_v41 }
 0x541   : > { %5323 = vmatpush3.bf16.msra.mxu1 %v5655_v14 }
 0x542   : > { %v3074_v20 = vpop.f32.mrb[48].mxu1  ;;  %5324 = vmatprep.subr.bf16.mxu1 %v5656_v39 }
 0x543   : > { %v5465_v44 = vpop.f32.mrb[49].mxu1 }
 0x544   : > { %v3077_v6 = vpop.f32.mrb[50].mxu1 }
 0x545   : > { %v3198_v58 = vpack.c.bf16 %v3077_v6, %v3074_v20  ;;  %v5466_v13 = vpop.f32.mrb[51].mxu1  ;;  %5325 = vmatpush3.bf16.msra.mxu1 %v5657_v50 }
 0x546   : > { %5326 = vmatprep.subr.bf16.mxu1 %v5658_v5 }
 0x549   : > { %5327 = vmatpush3.bf16.msra.mxu1 %v5659_v59 }
 0x54a   : > { %v3185_v57 = vpop.f32.mrb[52].mxu1  ;;  %5328 = vmatprep.subr.bf16.mxu1 %v5660_v63 }
 0x54b   : > { %v5477_v56 = vpop.f32.mrb[53].mxu1 }
 0x54c   : > { %v3188_v11 = vpop.f32.mrb[54].mxu1  ;;  %v3915_v56 = vrot.slane %v508_v46, %v6512_v32 }
 0x54d   : > { %v3199_v34 = vpack.c.bf16 %v3188_v11, %v3185_v57  ;;  %v5478_v51 = vpop.f32.mrb[55].mxu1  ;;  %5329 = vmatpush3.bf16.msra.mxu1 %v5661_v19  ;;  %v3909_v19 = vrot.slane %v508_v46, %v6509_v31 }
 0x54f   : > { %3871 = vmatprep.mubr.bf16.mxu1 %v3199_v34 }
 0x550   : > { %3872 = vmatmul.mubr.bf16.vlgmr.msra.gmra.mrb[60].mxu1 %v3198_v58 }
 0x5f3   : > { %v5264_v16 = vpop.f32.mrb[56].mxu0 }
 0x5f4   : > { %v5265_v38 = vpop.f32.mrb[57].mxu0 }
 0x5f5   : > { %v5266_v9 = vadd.f32 %v5265_v38, %v5264_v16  ;;  %v5267_v45 = vpop.f32.mrb[58].mxu0 }
 0x5f6   : > { %v5268_v53 = vpop.f32.mrb[59].mxu0 }
 0x5f7   : > { %v5269_v7 = vadd.f32 %v5268_v53, %v5267_v45  ;;  %v3751_v18 = vadd.f32 %v5266_v9, %v3331_v52 }
 0x5f9   : > { %v3754_v24 = vadd.f32 %v5269_v7, %v3331_v52 }
 0x603   : > { %v5286_v15 = vpop.f32.mrb[56].mxu1 }
 0x604   : > { %v5287_v54 = vpop.f32.mrb[57].mxu1 }
 0x605   : > { %v5288_v27 = vadd.f32 %v5287_v54, %v5286_v15  ;;  %v5289_v22 = vpop.f32.mrb[58].mxu1 }
 0x606   : > { %v5290_v35 = vpop.f32.mrb[59].mxu1 }
 0x607   : > { %v3792_v62 = vadd.f32 %v5288_v27, %v3751_v18  ;;  %v5291_v28 = vadd.f32 %v5290_v35, %v5289_v22 }
 0x609   : > { %v3795_v10 = vadd.f32 %v5291_v28, %v3754_v24 }
 0x613   : > { %v5308_v23 = vpop.f32.mrb[60].mxu0 }
 0x614   : > { %v5309_v60 = vpop.f32.mrb[61].mxu0 }
 0x615   : > { %v5310_v48 = vadd.f32 %v5309_v60, %v5308_v23  ;;  %v5311_v26 = vpop.f32.mrb[62].mxu0 }
 0x616   : > { %v5312_v40 = vpop.f32.mrb[63].mxu0 }
 0x617   : > { %v3833_v47 = vadd.f32 %v5310_v48, %v3792_v62  ;;  %v5313_v49 = vadd.f32 %v5312_v40, %v5311_v26 }
 0x619   : > { %v3836_v25 = vadd.f32 %v5313_v49, %v3795_v10 }
 0x623   : > { %v5330_v30 = vpop.f32.mrb[60].mxu1 }
 0x624   : > { %v5331_v29 = vpop.f32.mrb[61].mxu1 }
 0x625   : > { %v5332_v61 = vadd.f32 %v5331_v29, %v5330_v30  ;;  %v5333_v41 = vpop.f32.mrb[62].mxu1 }
 0x626   : > { %v5334_v8 = vpop.f32.mrb[63].mxu1 }
 0x627   : > { %v3874_v4 = vadd.f32 %v5332_v61, %v3833_v47  ;;  %v5335_v2 = vadd.f32 %v5334_v8, %v5333_v41 }
 0x629   : > { %v3877_v12 = vadd.f32 %v5335_v2, %v3836_v25  ;;  %v3880_v37 = vadd.f32 %v5731_v21, %v3874_v4 }
 0x62b   : > { %3882 = vadd.xlane.f32.xlu0 %v3880_v37  ;;  %v3881_v55 = vadd.f32 %v5732_v1, %v3877_v12 }
 0x62d   : > { %3884 = vadd.xlane.f32.xlu1 %v3881_v55 }
 0x6b8   : > { %v3883_v42 = vpop.xlane.xlu0 %3882 }
 0x6b9   : > { %v3886_v33 = vmul.f32 0.0625, %v3883_v42 }
 0x6ba   : > { %v3885_v17 = vpop.xlane.xlu1 %3884 }
 0x6bb   : > { %v3888_v36 = vsub.f32 %v3880_v37, %v3886_v33  ;;  %v3887_v43 = vmul.f32 0.0625, %v3885_v17 }
 0x6bd   : > { %v3890_v14 = vmul.f32 %v6462_v3, %v3888_v36  ;;  %v3889_v39 = vsub.f32 %v3881_v55, %v3887_v43 }
 0x6bf   : > { %v3891_v50 = vmul.f32 %v6462_v3, %v3889_v39  ;;  %v3892_v20 = vmul.f32 %v3890_v14, %v3890_v14 }
 0x6c1   : > { %3894 = vadd.xlane.f32.xlu0 %v3892_v20  ;;  %v3893_v5 = vmul.f32 %v3891_v50, %v3891_v50 }
 0x6c3   : > { %3896 = vadd.xlane.f32.xlu1 %v3893_v5 }
 0x74e   : > { %v3895_v44 = vpop.xlane.xlu0 %3894 }
 0x74f   : > { %v3898_v6 = vmul.f32 0.0625, %v3895_v44 }
 0x750   : > { %v3897_v58 = vpop.xlane.xlu1 %3896 }
 0x751   : > { %v3900_v13 = vadd.f32 1e-05, %v3898_v6  ;;  %v3899_v59 = vmul.f32 0.0625, %v3897_v58 }
 0x753   : > { %5726 = vrsqrt.f32 %v3900_v13  ;;  %v3901_v63 = vadd.f32 1e-05, %v3899_v59 }
 0x755   : > { %5728 = vrsqrt.f32 %v3901_v63 }
 0x75d   : > { %v5727_v57 = vpop.eup %5726 }
 0x75e   : > { %v3904_v11 = vmul.f32 %v5727_v57, %v3890_v14 }
 0x75f   : > { %v5729_v34 = vpop.eup %5728 }
 0x760   : > { %v3910_v51 = vmul.f32 %v3909_v19, %v3904_v11  ;;  %v3905_v16 = vmul.f32 %v5729_v34, %v3891_v50 }
 0x762   : > { %v3916_v38 = vadd.f32 %v3915_v56, %v3910_v51  ;;  %v3911_v9 = vmul.f32 %v3909_v19, %v3905_v16 }
 0x764   : > { %3918 = vst [vmem:[#allocation2] sm:$0xff] %v3916_v38  ;;  %v3917_v45 = vadd.f32 %v3915_v56, %v3911_v9 }
 0x766   : > { %3919 = vst [vmem:[#allocation2 + $0x8] sm:$0xff] %v3917_v45 }
 0x767 PF: > { %v5733_v31 = vld [vmem:[%s6453_s18 + $0x4] ss:$16 sps:$4 sm:$0xff]   ;;  %v5735_v32 = vld [vmem:[%s6453_s18 + $0xc] ss:$16 sps:$4 sm:$0xff]   ;;  %v6119_v53 = vmov 0   ;;  %p5204_p7 = scmp.ne.s32.totalorder %s6197_s17, 3 }
 0x768   : > { %4171 = vmatprep.mubr.bf16.mxu0 %v6119_v53  ;;  %4214 = vmatprep.mubr.bf16.mxu1 %v6119_v53  ;;  %v5737_v7 = vld [vmem:[%s6453_s18] ss:$16 sps:$4 sm:$0xff]   ;;  %v5738_v46 = vld [vmem:[%s6453_s18 + $0x8] ss:$16 sps:$4 sm:$0xff]   ;;  %v5739_v52 = vld [vmem:[%s6453_s18 + $0x24] ss:$16 sps:$4 sm:$0xff]  }
 0x769   : > { %4139 = vmatprep.subr.bf16.mxu0 %v5733_v31  ;;  %4182 = vmatprep.subr.bf16.mxu1 %v5735_v32  ;;  %v5741_v15 = vld [vmem:[%s6453_s18 + $0x2c] ss:$16 sps:$4 sm:$0xff]   ;;  %v5743_v54 = vld [vmem:[%s6453_s18 + $0x20] ss:$16 sps:$4 sm:$0xff]   ;;  %v5744_v18 = vld [vmem:[%s6453_s18 + $0x28] ss:$16 sps:$4 sm:$0xff]  }
 0x76a   : > { %4140 = vmatpush1.bf16.msra.mxu0 %v5737_v7  ;;  %4183 = vmatpush1.bf16.msra.mxu1 %v5738_v46  ;;  %v5745_v27 = vld [vmem:[%s6453_s18 + $0x44] ss:$16 sps:$4 sm:$0xff]   ;;  %v5747_v22 = vld [vmem:[%s6453_s18 + $0x4c] ss:$16 sps:$4 sm:$0xff]   ;;  %v5749_v35 = vld [vmem:[%s6453_s18 + $0x40] ss:$16 sps:$4 sm:$0xff]  }
 0x76b   : > { %4141 = vmatprep.subr.bf16.mxu0 %v5739_v52  ;;  %4184 = vmatprep.subr.bf16.mxu1 %v5741_v15  ;;  %v5750_v24 = vld [vmem:[%s6453_s18 + $0x48] ss:$16 sps:$4 sm:$0xff]   ;;  %v5751_v62 = vld [vmem:[%s6453_s18 + $0x64] ss:$16 sps:$4 sm:$0xff]   ;;  %v5753_v28 = vld [vmem:[%s6453_s18 + $0x6c] ss:$16 sps:$4 sm:$0xff]  }
 0x76c   : > { %v5755_v10 = vld [vmem:[%s6453_s18 + $0x60] ss:$16 sps:$4 sm:$0xff]   ;;  %v5756_v23 = vld [vmem:[%s6453_s18 + $0x68] ss:$16 sps:$4 sm:$0xff]   ;;  %v5757_v60 = vld [vmem:[%s6453_s18 + $0x84] ss:$16 sps:$4 sm:$0xff]  }
 0x76d   : > { %v5759_v48 = vld [vmem:[%s6453_s18 + $0x8c] ss:$16 sps:$4 sm:$0xff]   ;;  %v5761_v26 = vld [vmem:[%s6453_s18 + $0x80] ss:$16 sps:$4 sm:$0xff]   ;;  %v5762_v40 = vld [vmem:[%s6453_s18 + $0x88] ss:$16 sps:$4 sm:$0xff]  }
 0x76e   : > { %4142 = vmatpush1.bf16.msra.mxu0 %v5743_v54  ;;  %4185 = vmatpush1.bf16.msra.mxu1 %v5744_v18  ;;  %v5763_v47 = vld [vmem:[%s6453_s18 + $0xa4] ss:$16 sps:$4 sm:$0xff]   ;;  %v5765_v49 = vld [vmem:[%s6453_s18 + $0xac] ss:$16 sps:$4 sm:$0xff]   ;;  %v5767_v25 = vld [vmem:[%s6453_s18 + $0xa0] ss:$16 sps:$4 sm:$0xff]  }
 0x76f   : > { %4143 = vmatprep.subr.bf16.mxu0 %v5745_v27  ;;  %4186 = vmatprep.subr.bf16.mxu1 %v5747_v22  ;;  %v5768_v30 = vld [vmem:[%s6453_s18 + $0xa8] ss:$16 sps:$4 sm:$0xff]   ;;  %v5769_v29 = vld [vmem:[%s6453_s18 + $0xc4] ss:$16 sps:$4 sm:$0xff]   ;;  %v5771_v61 = vld [vmem:[%s6453_s18 + $0xcc] ss:$16 sps:$4 sm:$0xff]  }
 0x770   : > { %v5773_v41 = vld [vmem:[%s6453_s18 + $0xc0] ss:$16 sps:$4 sm:$0xff]   ;;  %v5774_v8 = vld [vmem:[%s6453_s18 + $0xc8] ss:$16 sps:$4 sm:$0xff]   ;;  %v5775_v4 = vld [vmem:[%s6453_s18 + $0xe4] ss:$16 sps:$4 sm:$0xff]  }
 0x771   : > { %v5777_v2 = vld [vmem:[%s6453_s18 + $0xec] ss:$16 sps:$4 sm:$0xff]   ;;  %v5779_v12 = vld [vmem:[%s6453_s18 + $0xe0] ss:$16 sps:$4 sm:$0xff]   ;;  %v5780_v21 = vld [vmem:[%s6453_s18 + $0xe8] ss:$16 sps:$4 sm:$0xff]  }
 0x772   : > { %4144 = vmatpush1.bf16.msra.mxu0 %v5749_v35  ;;  %4187 = vmatpush1.bf16.msra.mxu1 %v5750_v24  ;;  %v3922_v37 = vld [vmem:[#allocation2] sm:$0xff]  ;;  %v3923_v1 = vld [vmem:[#allocation2 + $0x8] sm:$0xff]  ;;  %v5789_v20 = vld [vmem:[%s6465_s29 + $0x50] sm:$0xff]   ;;  %v7000_v15 = vshrl.u32 %v496_v0, 7  ;;  %s7141_s11 = sld [smem:[#allocation27_spill]] (!%p5204_p7)  ;;  %vm4653_vm3 = vcmask (!%p5204_p7), 130048  }
 0x773   : > { %4145 = vmatprep.subr.bf16.mxu0 %v5751_v62  ;;  %4188 = vmatprep.subr.bf16.mxu1 %v5753_v28  ;;  %v5781_v55 = vld [vmem:[%s6465_s29 + $0x40] sm:$0xff]   ;;  %v3924_v17 = vpack.c.bf16 %v3923_v1, %v3922_v37  ;;  %v5785_v43 = vld [vmem:[%s6465_s29 + $0x48] sm:$0xff]   ;;  %v5790_v5 = vld [vmem:[%s6465_s29 + $0xd0] sm:$0xff]   ;;  %s7142_s24 = sld [smem:[#allocation28_spill]] (!%p5204_p7) }
 0x774   : > { %v5782_v42 = vld [vmem:[%s6465_s29 + $0xc0] sm:$0xff]   ;;  %v5786_v14 = vld [vmem:[%s6465_s29 + $0xc8] sm:$0xff]   ;;  %v5791_v44 = vld [vmem:[%s6465_s29 + $0x10] sm:$0xff]   ;;  %v3961_v54 = vsub.s32 0, %v7000_v15  ;;  %v3969_v18 = vsub.s32 2, %v7000_v15  ;;  %v3965_v22 = vsub.s32 1, %v7000_v15 }
 0x775   : > { %v5783_v33 = vld [vmem:[%s6465_s29] sm:$0xff]   ;;  %v5787_v39 = vld [vmem:[%s6465_s29 + $0x8] sm:$0xff]   ;;  %v5792_v6 = vld [vmem:[%s6465_s29 + $0x90] sm:$0xff]   ;;  %v3973_v35 = vsub.s32 3, %v7000_v15 }
 0x776   : > { %4146 = vmatpush1.bf16.msra.mxu0 %v5755_v10  ;;  %4189 = vmatpush1.bf16.msra.mxu1 %v5756_v23  ;;  %v5784_v36 = vld [vmem:[%s6465_s29 + $0x80] sm:$0xff]   ;;  %v5788_v50 = vld [vmem:[%s6465_s29 + $0x88] sm:$0xff]   ;;  %v5793_v58 = vld [vmem:[%s6465_s29 + $0x58] sm:$0xff]  }
 0x777   : > { %4147 = vmatprep.subr.bf16.mxu0 %v5757_v60  ;;  %4190 = vmatprep.subr.bf16.mxu1 %v5759_v48  ;;  %v5794_v13 = vld [vmem:[%s6465_s29 + $0xd8] sm:$0xff]   ;;  %v5797_v19 = vld [vmem:[%s6465_s29 + $0x60] sm:$0xff]   ;;  %v5801_v34 = vld [vmem:[%s6465_s29 + $0x68] sm:$0xff]  }
 0x778   : > { %v5795_v59 = vld [vmem:[%s6465_s29 + $0x18] sm:$0xff]   ;;  %v5798_v57 = vld [vmem:[%s6465_s29 + $0xe0] sm:$0xff]   ;;  %v5802_v51 = vld [vmem:[%s6465_s29 + $0xe8] sm:$0xff]  }
 0x779   : > { %v5796_v63 = vld [vmem:[%s6465_s29 + $0x98] sm:$0xff]   ;;  %v5799_v56 = vld [vmem:[%s6465_s29 + $0x20] sm:$0xff]   ;;  %v5803_v16 = vld [vmem:[%s6465_s29 + $0x28] sm:$0xff]  }
 0x77a   : > { %4148 = vmatpush1.bf16.msra.mxu0 %v5761_v26  ;;  %4191 = vmatpush1.bf16.msra.mxu1 %v5762_v40  ;;  %v5800_v11 = vld [vmem:[%s6465_s29 + $0xa0] sm:$0xff]   ;;  %v5804_v38 = vld [vmem:[%s6465_s29 + $0xa8] sm:$0xff]   ;;  %v5805_v9 = vld [vmem:[%s6465_s29 + $0x70] sm:$0xff]  }
 0x77b   : > { %4149 = vmatprep.subr.bf16.mxu0 %v5763_v47  ;;  %4192 = vmatprep.subr.bf16.mxu1 %v5765_v49  ;;  %v5806_v45 = vld [vmem:[%s6465_s29 + $0xf0] sm:$0xff]   ;;  %v5809_v53 = vld [vmem:[%s6465_s29 + $0x78] sm:$0xff]  }
 0x77c   : > { %v5807_v31 = vld [vmem:[%s6465_s29 + $0x30] sm:$0xff]   ;;  %v5810_v7 = vld [vmem:[%s6465_s29 + $0xf8] sm:$0xff]  }
 0x77d   : > { %v5808_v32 = vld [vmem:[%s6465_s29 + $0xb0] sm:$0xff]   ;;  %v5811_v46 = vld [vmem:[%s6465_s29 + $0x38] sm:$0xff]  }
 0x77e   : > { %4150 = vmatpush1.bf16.msra.mxu0 %v5767_v25  ;;  %4193 = vmatpush1.bf16.msra.mxu1 %v5768_v30  ;;  %v5812_v52 = vld [vmem:[%s6465_s29 + $0xb8] sm:$0xff]  }
 0x77f   : > { %4151 = vmatprep.subr.bf16.mxu0 %v5769_v29  ;;  %4194 = vmatprep.subr.bf16.mxu1 %v5771_v61  ;;  %v3957_v27 = vld [vmem:[%s441_s21] sm:$0xf] }
 0x780   : > { %v3962_v24 = vrot.slane %v3957_v27, %v3961_v54  ;;  %v3970_v62 = vrot.slane %v3957_v27, %v3969_v18  ;;  %v3966_v28 = vrot.slane %v3957_v27, %v3965_v22  ;;  %v3974_v10 = vrot.slane %v3957_v27, %v3973_v35 }
 0x782   : > { %4152 = vmatpush1.bf16.msra.mxu0 %v5773_v41  ;;  %4195 = vmatpush1.bf16.msra.mxu1 %v5774_v8 }
 0x783   : > { %4153 = vmatprep.subr.bf16.mxu0 %v5775_v4  ;;  %4196 = vmatprep.subr.bf16.mxu1 %v5777_v2 }
 0x786   : > { %4154 = vmatpush1.bf16.msra.mxu0 %v5779_v12  ;;  %4197 = vmatpush1.bf16.msra.mxu1 %v5780_v21 }
 0x787   : > { %5336 = vmatprep.subr.bf16.mxu0 %v5781_v55  ;;  %5358 = vmatprep.subr.bf16.mxu1 %v5782_v42 }
 0x789   : > { %4172 = vmatmul.mubr.bf16.vlgmr.msra.gmra.mrb[0].mxu0 %v3924_v17  ;;  %4215 = vmatmul.mubr.bf16.vlgmr.msra.gmra.mrb[0].mxu1 %v3924_v17 }
 0x78a   : > { %5337 = vmatpush3.bf16.msra.mxu0 %v5783_v33  ;;  %5359 = vmatpush3.bf16.msra.mxu1 %v5784_v36 }
 0x78b   : > { %5338 = vmatprep.subr.bf16.mxu0 %v5785_v43  ;;  %5360 = vmatprep.subr.bf16.mxu1 %v5786_v14 }
 0x78e   : > { %5339 = vmatpush3.bf16.msra.mxu0 %v5787_v39  ;;  %5361 = vmatpush3.bf16.msra.mxu1 %v5788_v50 }
 0x78f   : > { %5340 = vmatprep.subr.bf16.mxu0 %v5789_v20  ;;  %5362 = vmatprep.subr.bf16.mxu1 %v5790_v5 }
 0x792   : > { %5341 = vmatpush3.bf16.msra.mxu0 %v5791_v44  ;;  %5363 = vmatpush3.bf16.msra.mxu1 %v5792_v6 }
 0x793   : > { %5342 = vmatprep.subr.bf16.mxu0 %v5793_v58  ;;  %5364 = vmatprep.subr.bf16.mxu1 %v5794_v13 }
 0x796   : > { %5343 = vmatpush3.bf16.msra.mxu0 %v5795_v59  ;;  %5365 = vmatpush3.bf16.msra.mxu1 %v5796_v63  ;;  %v4237_v63 = vld [vmem:[#allocation3] sm:$0xff] }
 0x797   : > { %5344 = vmatprep.subr.bf16.mxu0 %v5797_v19  ;;  %5366 = vmatprep.subr.bf16.mxu1 %v5798_v57 }
 0x79a   : > { %5345 = vmatpush3.bf16.msra.mxu0 %v5799_v56  ;;  %5367 = vmatpush3.bf16.msra.mxu1 %v5800_v11 }
 0x79b   : > { %5346 = vmatprep.subr.bf16.mxu0 %v5801_v34  ;;  %5368 = vmatprep.subr.bf16.mxu1 %v5802_v51  ;;  %v4238_v51 = vld [vmem:[#allocation3 + $0x8] sm:$0xff] }
 0x79e   : > { %5347 = vmatpush3.bf16.msra.mxu0 %v5803_v16  ;;  %5369 = vmatpush3.bf16.msra.mxu1 %v5804_v38 }
 0x79f   : > { %5348 = vmatprep.subr.bf16.mxu0 %v5805_v9  ;;  %5370 = vmatprep.subr.bf16.mxu1 %v5806_v45  ;;  %v4585_v45 = vld [vmem:[#allocation10] sm:$0xff] (!%p5204_p7) }
 0x7a2   : > { %5349 = vmatpush3.bf16.msra.mxu0 %v5807_v31  ;;  %5371 = vmatpush3.bf16.msra.mxu1 %v5808_v32  ;;  %v4586_v31 = vld [vmem:[#allocation2] sm:$0xff] (!%p5204_p7) }
 0x7a3   : > { %5350 = vmatprep.subr.bf16.mxu0 %v5809_v53  ;;  %5372 = vmatprep.subr.bf16.mxu1 %v5810_v7  ;;  %v4594_v53 = vsub.s32 (!%p5204_p7), 5, %v7000_v15 }
 0x7a5   : > { %v4595_v54 = vrot.slane (!%p5204_p7), %v4585_v45, %v4594_v53 }
 0x7a6   : > { %5351 = vmatpush3.bf16.msra.mxu0 %v5811_v46  ;;  %5373 = vmatpush3.bf16.msra.mxu1 %v5812_v52  ;;  %v4587_v46 = vld [vmem:[#allocation2 + $0x8] sm:$0xff] (!%p5204_p7) }
 0x85c   : > { %v4173_v23 = vpop.f32.mrb[0].mxu0  ;;  %v4216_v60 = vpop.f32.mrb[0].mxu1 }
 0x85d   : > { %v4174_v0 = vadd.f32 %v4173_v23, %v3962_v24  ;;  %v4217_v48 = vadd.f32 %v4216_v60, %v3970_v62  ;;  %v4175_v26 = vpop.f32.mrb[1].mxu0  ;;  %v4218_v40 = vpop.f32.mrb[1].mxu1 }
 0x85e   : > { %v4176_v47 = vadd.f32 %v4175_v26, %v3966_v28  ;;  %v4219_v49 = vadd.f32 %v4218_v40, %v3974_v10  ;;  %v4177_v25 = vpop.f32.mrb[2].mxu0  ;;  %v4220_v30 = vpop.f32.mrb[2].mxu1 }
 0x85f   : > { %v4178_v29 = vadd.f32 %v4177_v25, %v3962_v24  ;;  %v4221_v61 = vadd.f32 %v4220_v30, %v3970_v62  ;;  %v4179_v41 = vpop.f32.mrb[3].mxu0  ;;  %v4222_v8 = vpop.f32.mrb[3].mxu1  ;;  %v4225_v12 = vmax.f32 %v4174_v0, 0.0  ;;  %v4227_v21 = vmax.f32 %v4217_v48, 0.0 }
 0x860   : > { %v4180_v4 = vadd.f32 %v4179_v41, %v3966_v28  ;;  %v4223_v2 = vadd.f32 %v4222_v8, %v3974_v10  ;;  %v4226_v55 = vmax.f32 %v4176_v47, 0.0  ;;  %v4228_v42 = vmax.f32 %v4219_v49, 0.0  ;;  %v5813_v47 = vld [vmem:[%s7141_s11] sm:$0xff] (!%p5204_p7)  }
 0x861   : > { %v4229_v37 = vmax.f32 %v4178_v29, 0.0  ;;  %v4231_v1 = vmax.f32 %v4221_v61, 0.0 }
 0x862   : > { %v4230_v33 = vmax.f32 %v4180_v4, 0.0  ;;  %v4232_v17 = vmax.f32 %v4223_v2, 0.0  ;;  %v4625_v4 = vrot.slane (!%p5204_p7), %v4585_v45, %v3973_v35  ;;  %v4630_v2 = vsub.s32 (!%p5204_p7), 4, %v7000_v15  ;;  %v4641_v15 = vld [vmem:[%s7142_s24 + $0x10] sm:$0xff] (!%p5204_p7)  ;;  %v4639_v35 = vld [vmem:[%s7142_s24] sm:$0xff] (!%p5204_p7) }
 0x863   : > { %v4233_v36 = vpack.c.bf16 %v4229_v37, %v4225_v12  ;;  %v4235_v43 = vpack.c.bf16 %v4231_v1, %v4227_v21 }
 0x864   : > { %v4234_v14 = vpack.c.bf16 %v4230_v33, %v4226_v55  ;;  %v4236_v39 = vpack.c.bf16 %v4232_v17, %v4228_v42  ;;  %v4631_v1 = vrot.slane (!%p5204_p7), %v4585_v45, %v4630_v2 }
 0x866   : > { %4527 = vmatprep.mubr.bf16.mxu0 %v4234_v14  ;;  %4568 = vmatprep.mubr.bf16.mxu1 %v4236_v39  ;;  %v4642_v14 = vld [vmem:[%s7142_s24 + $0x18] sm:$0xff] (!%p5204_p7) }
 0x867   : > { %4528 = vmatmul.mubr.bf16.vlgmr.msra.gmra.mrb[4].mxu0 %v4233_v36  ;;  %4569 = vmatmul.mubr.bf16.vlgmr.msra.gmra.mrb[4].mxu1 %v4235_v43  ;;  %v5814_v36 = vld [vmem:[%s7141_s11 + $0x8] sm:$0xff] (!%p5204_p7)  }
 0x868   : > { %5481 = vmatprep.mubr.msk.bf16.mxu0 (!%p5204_p7), %vm4653_vm3, %v5813_v47 }
 0x93a   : > { %v5352_v50 = vpop.f32.mrb[4].mxu0  ;;  %v5374_v20 = vpop.f32.mrb[4].mxu1 }
 0x93b   : > { %v5353_v5 = vpop.f32.mrb[5].mxu0  ;;  %v5375_v44 = vpop.f32.mrb[5].mxu1 }
 0x93c   : > { %v5354_v6 = vadd.f32 %v5353_v5, %v5352_v50  ;;  %v5376_v58 = vadd.f32 %v5375_v44, %v5374_v20  ;;  %v5355_v13 = vpop.f32.mrb[6].mxu0  ;;  %v5377_v59 = vpop.f32.mrb[6].mxu1  ;;  %v4640_v20 = vld [vmem:[%s7142_s24 + $0x8] sm:$0xff] (!%p5204_p7) }
 0x93d   : > { %v5356_v19 = vpop.f32.mrb[7].mxu0  ;;  %v5378_v57 = vpop.f32.mrb[7].mxu1 }
 0x93e   : > { %v4571_v56 = vadd.f32 %v5376_v58, %v5354_v6  ;;  %v5357_v11 = vadd.f32 %v5356_v19, %v5355_v13  ;;  %v5379_v34 = vadd.f32 %v5378_v57, %v5377_v59  ;;  %4584 = sbr.rel (%p5204_p7) target bundleno = 2923 (0xb6b), region = 96 }
 0x940   : > { %v4577_v16 = vadd.f32 %v4571_v56, %v4237_v63  ;;  %v4574_v38 = vadd.f32 %v5379_v34, %v5357_v11 }
 0x942   : > { %4579 = vst [vmem:[#allocation3] sm:$0xff] %v4577_v16  ;;  %v4578_v9 = vadd.f32 %v4574_v38, %v4238_v51 }
 0x944   : > { %4580 = vst [vmem:[#allocation3 + $0x8] sm:$0xff] %v4578_v9 }
 0x949   : > { %v4588_v32 = vld [vmem:[#allocation3] sm:$0xff] }
 0x94a   : > { %v4590_v7 = vadd.f32 %v4588_v32, %v4586_v31 }
 0x94b   : > { %v4589_v52 = vld [vmem:[#allocation3 + $0x8] sm:$0xff] }
 0x94c   : > { %v4591_v18 = vadd.f32 %v4589_v52, %v4587_v46  ;;  %v4596_v27 = vadd.f32 %v4595_v54, %v4590_v7 }
 0x94e   : > { %4598 = vadd.xlane.f32.xlu0 %v4596_v27  ;;  %v4597_v22 = vadd.f32 %v4595_v54, %v4591_v18 }
 0x952   : > { %4600 = vadd.xlane.f32.xlu0 %v4597_v22 }
 0x9db   : > { %v4599_v24 = vpop.xlane.xlu0 %4598 }
 0x9dc   : > { %v4602_v62 = vmul.f32 0.0625, %v4599_v24 }
 0x9de   : > { %v4604_v28 = vsub.f32 %v4596_v27, %v4602_v62 }
 0x9df   : > { %v4601_v10 = vpop.xlane.xlu0 %4600 }
 0x9e0   : > { %v4603_v23 = vmul.f32 0.0625, %v4601_v10  ;;  %v4606_v60 = vmul.f32 %v6462_v3, %v4604_v28 }
 0x9e2   : > { %v4605_v0 = vsub.f32 %v4597_v22, %v4603_v23  ;;  %v4608_v48 = vmul.f32 %v4606_v60, %v4606_v60 }
 0x9e4   : > { %v4607_v26 = vmul.f32 %v6462_v3, %v4605_v0  ;;  %4610 = vadd.xlane.f32.xlu1 %v4608_v48 }
 0x9e6   : > { %v4609_v40 = vmul.f32 %v4607_v26, %v4607_v26 }
 0x9e8   : > { %4612 = vadd.xlane.f32.xlu1 %v4609_v40 }
 0xa71   : > { %v4611_v49 = vpop.xlane.xlu1 %4610 }
 0xa72   : > { %v4614_v25 = vmul.f32 0.0625, %v4611_v49 }
 0xa74   : > { %v4616_v30 = vadd.f32 1e-05, %v4614_v25 }
 0xa75   : > { %v4613_v29 = vpop.xlane.xlu1 %4612 }
 0xa76   : > { %5815 = vrsqrt.f32 %v4616_v30  ;;  %v4615_v61 = vmul.f32 0.0625, %v4613_v29 }
 0xa78   : > { %v4617_v41 = vadd.f32 1e-05, %v4615_v61 }
 0xa7a   : > { %5817 = vrsqrt.f32 %v4617_v41 }
 0xa80   : > { %v5816_v8 = vpop.eup %5815 }
 0xa81   : > { %v4620_v3 = vmul.f32 %v5816_v8, %v4606_v60 }
 0xa83   : > { %v4626_v37 = vmul.f32 %v4625_v4, %v4620_v3 }
 0xa84   : > { %v5818_v12 = vpop.eup %5817 }
 0xa85   : > { %v4621_v21 = vmul.f32 %v5818_v12, %v4607_v26  ;;  %v4632_v42 = vadd.f32 %v4631_v1, %v4626_v37 }
 0xa87   : > { %v4627_v55 = vmul.f32 %v4625_v4, %v4621_v21 }
 0xa89   : > { %v4633_v33 = vadd.f32 %v4631_v1, %v4627_v55 }
 0xa8b   : > { %v4638_v17 = vpack.c.bf16 %v4633_v33, %v4632_v42 }
 0xa8d   : > { %5479 = vmatprep.subr.bf16.mxu0 %v4638_v17 }
 0xa8e   : > { %5480 = vmatpush3.bf16.msra.mxu0 %v4638_v17 }
 0xa91   : > { %5482 = vmatmul.mubr.msk.bf16.vlgmr.msra.gmra.mrb[0].mxu0 %vm4653_vm3, %v5814_v36 }
 0xb64   : > { %v5483_v43 = vpop.f32.mrb[0].mxu0 }
 0xb65   : > { %v4703_v39 = vadd.f32 %v5483_v43, %v4641_v15  ;;  %v4694_v50 = vpop.f32.mrb[1].mxu0 }
 0xb66   : > { %v4695_v5 = vadd.f32 %v4694_v50, %v4639_v35  ;;  %v5484_v44 = vpop.f32.mrb[2].mxu0 }
 0xb67   : > { %4711 = vst [vmem:[#allocation15 + $0x10] sm:$0xff] %v4703_v39  ;;  %v4706_v6 = vadd.f32 %v5484_v44, %v4642_v14  ;;  %v4697_v58 = vpop.f32.mrb[3].mxu0 }
 0xb68   : > { %4709 = vst [vmem:[#allocation15] sm:$0xff] %v4695_v5  ;;  %v4698_v13 = vadd.f32 %v4697_v58, %v4640_v20 }
 0xb69   : > { %4712 = vst [vmem:[#allocation15 + $0x18] sm:$0xff] %v4706_v6 }
 0xb6a   : > { %4710 = vst [vmem:[#allocation15 + $0x8] sm:$0xff] %v4698_v13 }
 0xb6b PF: > { %p5543_p9 = scmp.eq.s32.totalorder %s6197_s17, 3  ;;  %s6120_s21 = smov [#allocation15]  }
 0xb6c   : > { %s4719_s29 = sshll.u32 %s6120_s21, 4  ;;  %s4720_s29 = int_to_ptr.vmem [resolvable:$true] %s4719_s29 }
 0xb6d   : > { %s6021_s9 = scalar_lea.vmem %s4720_s29, 512  ;;  %p6028_p2 = scmp.lt.s32.totalorder %s4720_s29, %s4720_s29 }
 0xb6e   : > { %p6022_p4 = scmp.ne.s32.totalorder %s4720_s29, %s6021_s9  ;;  %p6029_p13 = scmp.lt.s32.totalorder %s6021_s9, %s6021_s9 }
 0xb70   : > { %p6023_p11 = pnand %p6022_p4, %p5543_p9  ;;  %p6030_p5 = por %p6029_p13, %p6028_p2 }
 0xb72   : > { %p6024_p12 = pneg %p6023_p11 }
 0xb74   : > { %p6031_p10 = pnand %p6030_p5, %p6024_p12 }
 0xb76   : > { %6034 = shalt.err (!%p6031_p10)
}
 0xb77   : > { %s7143_s27 = sld [smem:[#allocation29_spill]] }
 0xb7d   : > { %s6035_s19 = scalar_lea.hbm %s7143_s27, 512 }
 0xb7e   : > { %p6036_p1 = scmp.ne.s32.totalorder %s7143_s27, %s6035_s19  ;;  %p6041_p0 = scmp.lt.u32.totalorder %s6035_s19, %s7143_s27 }
 0xb80   : > { %p6037_p3 = pnand %p6036_p1, %p5543_p9 }
 0xb82   : > { %p6038_p8 = pneg %p6037_p3 }
 0xb84   : > { %p6043_p6 = pnand %p6041_p0, %p6038_p8 }
 0xb86   : > { %6046 = shalt.err (!%p6043_p6)
}
 0xb87   : > { %s6121_s10 = smov 128   ;;  %s6122_s26 = smov 8  }
 0xb88   : > { %5508 = dma.vmem_to_hbm [thread:$0]  (%p5543_p9), %s4720_s29, 512, %s7143_s27, [#allocation6], %s6121_s10, %s6121_s10, %s6122_s26  }
 0xb89   : > { %6080 = dma.done.wait (%p5543_p9), [#allocation6], 512  }
 0xb8a   : > { %6082 = vsyncadd (%p5543_p9), [#allocation6], 4294966784 }
 0xb8b PF: > { %s7144_s16 = sld [smem:[#allocation21_spill]]  ;;  %s7145_s12 = sld [smem:[#allocation22_spill]] }
 0xb8c   : > { %s7146_s13 = smov %s6089_s14  ;;  %s7147_s14 = smov %s6093_s15 }
 0xb91   : > { %p21_p7 = scmp.ge.s32.totalorder %s7144_s16, 6   ;;  %s7148_s15 = smov %s7145_s12 }
 0xb93   :  { %23 = sbr.rel (!%p21_p7) target bundleno = 12 (0xc), region = 142 }
 0xb9a   :  { %4735 = vsyncpa [#allocation5], 1 }
 0xb9b   :  { %4737 = vsyncpa [#allocation5 + $0x1], 1 }
 0xb9c   :  { %4738 = vsyncpa [#allocation8], 1 }
 0xb9d   :  { %4739 = vsyncpa [#allocation11], 1 }
 0xb9e   :  { %4740 = vsyncpa [#allocation6], 1 }
 0xb9f   :  { %4742 = vsyncpa [#allocation6 + $0x1], 1 }

</bundles_post_ra>
